<compile_context>
chip_gen: v7x
topology: tpu7x:2x2x1
jax: 0.10.0
libtpu: 0.0.40
codegen_flags: <defaults>
</compile_context>

<pallas_src>
import jax
import jax.numpy as jnp
from jax import lax
from jax.experimental import pallas as pl
from jax.experimental.pallas import tpu as pltpu


# ---------------------------------------------------------------------------
# Fused Bottleneck kernel (one grid step == `nb` images, NHWC layout)
# ---------------------------------------------------------------------------
def _bottleneck_kernel(x_ref, w1_ref, b1_ref, w2_ref, b2_ref, w3_ref, b3_ref,
                       o_ref, y1p_ref):
    # x_ref:   (NB, H, W, Cin)     f32   input images (also the residual)
    # w1_ref:  (Cin, Pp)           bf16  1x1 conv, BN1 folded, planes padded to Pp
    # b1_ref:  (1, Pp)             f32
    # w2_ref:  (9*Pp, Pp)          bf16  3x3 conv, BN2 folded, tap-major rows
    # b2_ref:  (1, Pp)             f32
    # w3_ref:  (Pp, Cout)          bf16  1x1 conv, BN3 folded
    # b3_ref:  (1, Cout)           f32
    # o_ref:   (NB, H, W, Cout)    f32
    # y1p_ref: (NB, H+2, W+2, Pp)  f32   zero-halo scratch for the 3x3 conv input
    NB, H, W, Cin = x_ref.shape
    Pp = w1_ref.shape[1]
    Cout = w3_ref.shape[1]
    M = NB * H * W

    # ---- Stage 1: 1x1 conv + BN1 + ReLU (bf16 operands, f32 accumulate) ----
    x_bf = x_ref[...].reshape(M, Cin).astype(jnp.bfloat16)
    y1 = jnp.dot(x_bf, w1_ref[...], preferred_element_type=jnp.float32)
    y1 = jnp.maximum(y1 + b1_ref[0, :], 0.0)
    # Padded hidden channels (real planes .. Pp) stay exactly zero: their
    # folded weights/biases are zero and ReLU(0) == 0, so they contribute
    # nothing in stages 2/3.  (Do NOT add non-zero bias / non-ReLU activation
    # on padded channels.)

    # Zero only the 1-wide halo border; the interior is fully overwritten
    # below, so re-zeroing the whole buffer every step would be pure wasted
    # store bandwidth.
    y1p_ref[:, 0:1, :, :] = jnp.zeros((NB, 1, W + 2, Pp), jnp.float32)
    y1p_ref[:, H + 1:H + 2, :, :] = jnp.zeros((NB, 1, W + 2, Pp), jnp.float32)
    y1p_ref[:, :, 0:1, :] = jnp.zeros((NB, H + 2, 1, Pp), jnp.float32)
    y1p_ref[:, :, W + 1:W + 2, :] = jnp.zeros((NB, H + 2, 1, Pp), jnp.float32)
    y1p_ref[:, 1:H + 1, 1:W + 1, :] = y1.reshape(NB, H, W, Pp)

    # ---- Stage 2: 3x3 conv as 9 accumulating K=Pp dots (no im2col buffer) ---
    acc = None
    for dy in range(3):
        for dx in range(3):
            t = dy * 3 + dx
            patch = y1p_ref[:, dy:dy + H, dx:dx + W, :].reshape(M, Pp)
            part = jnp.dot(patch.astype(jnp.bfloat16),
                           w2_ref[t * Pp:(t + 1) * Pp, :],
                           preferred_element_type=jnp.float32)
            acc = part if acc is None else acc + part
    y2 = jnp.maximum(acc + b2_ref[0, :], 0.0)

    # ---- Stage 3: 1x1 conv + BN3, identity residual, final ReLU -------------
    y3 = jnp.dot(y2.astype(jnp.bfloat16), w3_ref[...],
                 preferred_element_type=jnp.float32)
    res = x_ref[...].reshape(M, Cout)          # re-read residual (Cin == Cout)
    out = jnp.maximum(y3 + b3_ref[0, :] + res, 0.0)
    o_ref[...] = out.reshape(NB, H, W, Cout).astype(o_ref.dtype)


# ---------------------------------------------------------------------------
# Wrapper: NCHW in / NCHW out, single fused pallas_call
# ---------------------------------------------------------------------------
def bottleneck_forward(x_nchw, kp, *, images_per_step=None):
    x = jnp.transpose(x_nchw, (0, 2, 3, 1))  # NCHW -> NHWC
    N, H, W, Cin = x.shape
    Pp = kp["w1"].shape[1]
    Cout = kp["w3"].shape[1]
    assert Cin == Cout, "identity residual requires inplanes == planes * 4"

    # Pack several images into one grid step when H*W is small so M = nb*H*W
    # feeds the MXU and per-grid-step overhead is amortized.
    if images_per_step is None:
        target = max(1, 1024 // (H * W))
        nb = 1
        for d in range(1, N + 1):
            if N % d == 0 and d <= target:
                nb = d
    else:
        nb = images_per_step
    assert N % nb == 0
    steps = N // nb

    # Explicit VMEM budget (v5e scoped default is only 16 MiB).  Rough upper
    # bound: double-buffered in/out blocks + weights + halo scratch + live f32
    # intermediates, with 2x slack, clamped to stay below v7x physical VMEM.
    blk_io = nb * H * W * (Cin + Cout) * 4
    w_bytes = (Cin * Pp + 9 * Pp * Pp + Pp * Cout) * 2 + (2 * Pp + Cout) * 4
    halo = nb * (H + 2) * (W + 2) * Pp * 4
    live = 3 * nb * H * W * Pp * 4
    need = 2 * blk_io + 2 * w_bytes + halo + live
    vmem_limit = int(min(64 << 20, max(32 << 20, 2 * need)))

    out = pl.pallas_call(
        _bottleneck_kernel,
        out_shape=jax.ShapeDtypeStruct((N, H, W, Cout), jnp.float32),
        grid=(steps,),
        in_specs=[
            pl.BlockSpec((nb, H, W, Cin), lambda n: (n, 0, 0, 0)),
            pl.BlockSpec((Cin, Pp), lambda n: (0, 0)),
            pl.BlockSpec((1, Pp), lambda n: (0, 0)),
            pl.BlockSpec((9 * Pp, Pp), lambda n: (0, 0)),
            pl.BlockSpec((1, Pp), lambda n: (0, 0)),
            pl.BlockSpec((Pp, Cout), lambda n: (0, 0)),
            pl.BlockSpec((1, Cout), lambda n: (0, 0)),
        ],
        out_specs=pl.BlockSpec((nb, H, W, Cout), lambda n: (n, 0, 0, 0)),
        scratch_shapes=[
            pltpu.VMEM((nb, H + 2, W + 2, Pp), jnp.float32),   # zero-halo y1
        ],
        compiler_params=pltpu.CompilerParams(
            dimension_semantics=("parallel",),
            vmem_limit_bytes=vmem_limit),
    )(x, kp["w1"], kp["b1"], kp["w2"], kp["b2"], kp["w3"], kp["b3"])

    return jnp.transpose(out, (0, 3, 1, 2))  # NHWC -> NCHW


# ---------------------------------------------------------------------------
# Parameter construction (raw convs + BatchNorm stats, deterministic)
# ---------------------------------------------------------------------------
def make_params(key, inplanes, planes):
    outplanes = planes * 4
    ks = jax.random.split(key, 6)

    def bn_params(k, c):
        k0, k1, k2, k3 = jax.random.split(k, 4)
        gamma = 1.0 + 0.1 * jax.random.normal(k0, (c,), jnp.float32)
        beta = 0.1 * jax.random.normal(k1, (c,), jnp.float32)
        mean = 0.1 * jax.random.normal(k2, (c,), jnp.float32)
        var = jnp.abs(jax.random.normal(k3, (c,), jnp.float32)) + 0.5
        return gamma, beta, mean, var

    return {
        "w1": 0.2 * jax.random.normal(ks[0], (1, 1, inplanes, planes), jnp.float32),
        "w2": 0.1 * jax.random.normal(ks[1], (3, 3, planes, planes), jnp.float32),
        "w3": 0.1 * jax.random.normal(ks[2], (1, 1, planes, outplanes), jnp.float32),
        "bn1": bn_params(ks[3], planes),
        "bn2": bn_params(ks[4], planes),
        "bn3": bn_params(ks[5], outplanes),
    }


def fold_and_pad(p, lane=128, eps=1e-5):
    """Fold eval-mode BN into each conv, pad the hidden dim to `lane`, and
    store matmul weights in bf16 (biases stay f32 for the epilogues).

    NOTE: padding `planes` up to a 128-lane multiple keeps every contraction
    lane-dense but wastes FLOPs/VMEM when planes << 128 (e.g. this script's
    toy planes=8 -> Pp=128); for real ResNet stages (planes >= 64) the waste
    is <= 2x.  Padded weight/bias entries are zero so padded hidden channels
    stay exactly zero through the ReLUs.
    """

    def fold(w_hwio, bn):
        g, b, m, v = bn
        s = g / jnp.sqrt(v + eps)        # per-output-channel scale
        return w_hwio * s, b - m * s

    w1, b1 = fold(p["w1"], p["bn1"])     # (1,1,Cin,P), (P,)
    w2, b2 = fold(p["w2"], p["bn2"])     # (3,3,P,P),   (P,)
    w3, b3 = fold(p["w3"], p["bn3"])     # (1,1,P,Cout),(Cout,)

    P = w1.shape[3]
    Cout = w3.shape[3]
    Pp = ((P + lane - 1) // lane) * lane  # lane-dense hidden channel count
    pad = Pp - P

    w1k = jnp.pad(w1[0, 0], ((0, 0), (0, pad))).astype(jnp.bfloat16)   # (Cin, Pp)
    b1k = jnp.pad(b1, (0, pad)).reshape(1, Pp)                         # f32
    w2k = jnp.pad(w2, ((0, 0), (0, 0), (0, pad), (0, pad)))            # (3,3,Pp,Pp)
    w2k = w2k.reshape(9 * Pp, Pp).astype(jnp.bfloat16)                 # tap-major
    b2k = jnp.pad(b2, (0, pad)).reshape(1, Pp)                         # f32
    w3k = jnp.pad(w3[0, 0], ((0, pad), (0, 0))).astype(jnp.bfloat16)   # (Pp, Cout)
    b3k = b3.reshape(1, Cout)                                          # f32

    return {"w1": w1k, "b1": b1k, "w2": w2k, "b2": b2k, "w3": w3k, "b3": b3k}


# ---------------------------------------------------------------------------
# Pure-JAX reference (separate conv + BN, lax.conv, full f32 precision)
# ---------------------------------------------------------------------------
def _ref_forward(x_nchw, p, eps=1e-5):
    x = jnp.transpose(x_nchw, (0, 2, 3, 1))
    dn = ("NHWC", "HWIO", "NHWC")

    def conv(z, w, padding):
        return lax.conv_general_dilated(z, w, (1, 1), padding,
                                        dimension_numbers=dn,
                                        precision=lax.Precision.HIGHEST)

    def bn(z, params):
        g, b, m, v = params
        return (z - m) * g / jnp.sqrt(v + eps) + b

    out = jnp.maximum(bn(conv(x, p["w1"], "VALID"), p["bn1"]), 0.0)
    out = jnp.maximum(bn(conv(out, p["w2"], "SAME"), p["bn2"]), 0.0)
    out = bn(conv(out, p["w3"], "VALID"), p["bn3"])
    out = jnp.maximum(out + x, 0.0)
    return jnp.transpose(out, (0, 3, 1, 2))


if __name__ == "__main__":
    N, planes, H, W = 2, 8, 16, 16
    inplanes = planes * 4        # identity residual (downsample=None) needs this
    key = jax.random.PRNGKey(0)
    kx, kp = jax.random.split(key)
    x = jax.random.normal(kx, (N, inplanes, H, W), jnp.float32)  # NCHW

    raw_params = make_params(kp, inplanes, planes)
    kernel_params = fold_and_pad(raw_params)

    out = jax.block_until_ready(bottleneck_forward(x, kernel_params))
    ref = jax.block_until_ready(_ref_forward(x, raw_params))

    assert out.shape == (N, inplanes, H, W)
    # bf16 matmul operands (f32 accumulation) -> relaxed absolute tolerance.
    max_err = float(jnp.max(jnp.abs(out - ref)))
    assert max_err < 5e-2, f"mismatch vs reference: {max_err}"
    print("KERNEL_OK")
</pallas_src>

<mosaic_0001>
module attributes {stable_mosaic.version = 11 : i64} {
  func.func @_bottleneck_kernel(%arg0: i32, %arg1: memref<2x16x16x32xf32, #tpu.memory_space<vmem>>, %arg2: memref<32x128xbf16, #tpu.memory_space<vmem>>, %arg3: memref<1x128xf32, #tpu.memory_space<vmem>>, %arg4: memref<1152x128xbf16, #tpu.memory_space<vmem>>, %arg5: memref<1x128xf32, #tpu.memory_space<vmem>>, %arg6: memref<128x32xbf16, #tpu.memory_space<vmem>>, %arg7: memref<1x32xf32, #tpu.memory_space<vmem>>, %arg8: memref<2x16x16x32xf32, #tpu.memory_space<vmem>>, %arg9: memref<2x18x18x128xf32, #tpu.memory_space<vmem>>) attributes {dimension_semantics = [#tpu.dimension_semantics<parallel>], iteration_bounds = array<i64: 1>, scalar_prefetch = 0 : i64, scratch_operands = 1 : i64, tpu.core_type = #tpu.core_type<tc>, window_params = [{transform_indices = @transform_0, window_bounds = array<i64: 2, 16, 16, 32>}, {pipeline_mode = #tpu.pipeline_mode<synchronous>, transform_indices = @transform_1, window_bounds = array<i64: 32, 128>}, {pipeline_mode = #tpu.pipeline_mode<synchronous>, transform_indices = @transform_2, window_bounds = array<i64: 1, 128>}, {pipeline_mode = #tpu.pipeline_mode<synchronous>, transform_indices = @transform_3, window_bounds = array<i64: 1152, 128>}, {pipeline_mode = #tpu.pipeline_mode<synchronous>, transform_indices = @transform_4, window_bounds = array<i64: 1, 128>}, {pipeline_mode = #tpu.pipeline_mode<synchronous>, transform_indices = @transform_5, window_bounds = array<i64: 128, 32>}, {pipeline_mode = #tpu.pipeline_mode<synchronous>, transform_indices = @transform_6, window_bounds = array<i64: 1, 32>}, {transform_indices = @transform_7, window_bounds = array<i64: 2, 16, 16, 32>}]} {
    %c0 = arith.constant 0 : index
    %c0_0 = arith.constant 0 : index
    %c0_1 = arith.constant 0 : index
    %c0_2 = arith.constant 0 : index
    %0 = vector.load %arg1[%c0, %c0_0, %c0_1, %c0_2] : memref<2x16x16x32xf32, #tpu.memory_space<vmem>>, vector<2x16x16x32xf32>
    %1 = vector.shape_cast %0 : vector<2x16x16x32xf32> to vector<512x32xf32>
    %2 = arith.truncf %1 : vector<512x32xf32> to vector<512x32xbf16>
    %c0_3 = arith.constant 0 : index
    %c0_4 = arith.constant 0 : index
    %3 = vector.load %arg2[%c0_3, %c0_4] : memref<32x128xbf16, #tpu.memory_space<vmem>>, vector<32x128xbf16>
    %cst = arith.constant dense<0.000000e+00> : vector<512x128xf32>
    %4 = tpu.matmul %2, %3, %cst {dimension_numbers = #tpu.dot_dimension_numbers<[1], [0], [0], [1], [0, 0, 1, 1], [], []>} : vector<512x32xbf16>, vector<32x128xbf16>, vector<512x128xf32> -> vector<512x128xf32>
    %c0_5 = arith.constant 0 : index
    %c0_6 = arith.constant 0 : index
    %5 = vector.load %arg3[%c0_5, %c0_6] : memref<1x128xf32, #tpu.memory_space<vmem>>, vector<1x128xf32>
    %6 = vector.shape_cast %5 : vector<1x128xf32> to vector<128xf32>
    %7 = vector.shape_cast %6 : vector<128xf32> to vector<1x128xf32>
    %8 = vector.broadcast %7 : vector<1x128xf32> to vector<512x128xf32>
    %9 = arith.addf %4, %8 : vector<512x128xf32>
    %cst_7 = arith.constant 0.000000e+00 : f32
    %10 = vector.broadcast %cst_7 : f32 to vector<512x128xf32>
    %11 = arith.maximumf %9, %10 : vector<512x128xf32>
    %cst_8 = arith.constant 0.000000e+00 : f32
    %12 = vector.broadcast %cst_8 : f32 to vector<2x1x18x128xf32>
    %c0_9 = arith.constant 0 : index
    %c0_10 = arith.constant 0 : index
    %c0_11 = arith.constant 0 : index
    %c0_12 = arith.constant 0 : index
    %13 = vector.load %arg9[%c0_9, %c0_10, %c0_11, %c0_12] : memref<2x18x18x128xf32, #tpu.memory_space<vmem>>, vector<2x1x18x128xf32>
    tpu.vector_store %arg9[%c0_9, %c0_10, %c0_11, %c0_12], %12 {strides = array<i32>} : memref<2x18x18x128xf32, #tpu.memory_space<vmem>>, vector<2x1x18x128xf32>,
    %cst_13 = arith.constant 0.000000e+00 : f32
    %14 = vector.broadcast %cst_13 : f32 to vector<2x1x18x128xf32>
    %c0_14 = arith.constant 0 : index
    %c17 = arith.constant 17 : index
    %c0_15 = arith.constant 0 : index
    %c0_16 = arith.constant 0 : index
    %15 = vector.load %arg9[%c0_14, %c17, %c0_15, %c0_16] : memref<2x18x18x128xf32, #tpu.memory_space<vmem>>, vector<2x1x18x128xf32>
    tpu.vector_store %arg9[%c0_14, %c17, %c0_15, %c0_16], %14 {strides = array<i32>} : memref<2x18x18x128xf32, #tpu.memory_space<vmem>>, vector<2x1x18x128xf32>,
    %cst_17 = arith.constant 0.000000e+00 : f32
    %16 = vector.broadcast %cst_17 : f32 to vector<2x18x1x128xf32>
    %c0_18 = arith.constant 0 : index
    %c0_19 = arith.constant 0 : index
    %c0_20 = arith.constant 0 : index
    %c0_21 = arith.constant 0 : index
    %17 = vector.load %arg9[%c0_18, %c0_19, %c0_20, %c0_21] : memref<2x18x18x128xf32, #tpu.memory_space<vmem>>, vector<2x18x1x128xf32>
    tpu.vector_store %arg9[%c0_18, %c0_19, %c0_20, %c0_21], %16 {strides = array<i32>} : memref<2x18x18x128xf32, #tpu.memory_space<vmem>>, vector<2x18x1x128xf32>,
    %cst_22 = arith.constant 0.000000e+00 : f32
    %18 = vector.broadcast %cst_22 : f32 to vector<2x18x1x128xf32>
    %c0_23 = arith.constant 0 : index
    %c0_24 = arith.constant 0 : index
    %c17_25 = arith.constant 17 : index
    %c0_26 = arith.constant 0 : index
    %19 = vector.load %arg9[%c0_23, %c0_24, %c17_25, %c0_26] : memref<2x18x18x128xf32, #tpu.memory_space<vmem>>, vector<2x18x1x128xf32>
    tpu.vector_store %arg9[%c0_23, %c0_24, %c17_25, %c0_26], %18 {strides = array<i32>} : memref<2x18x18x128xf32, #tpu.memory_space<vmem>>, vector<2x18x1x128xf32>,
    %20 = vector.shape_cast %11 : vector<512x128xf32> to vector<2x16x16x128xf32>
    %c0_27 = arith.constant 0 : index
    %c1 = arith.constant 1 : index
    %c1_28 = arith.constant 1 : index
    %c0_29 = arith.constant 0 : index
    %21 = vector.load %arg9[%c0_27, %c1, %c1_28, %c0_29] : memref<2x18x18x128xf32, #tpu.memory_space<vmem>>, vector<2x16x16x128xf32>
    tpu.vector_store %arg9[%c0_27, %c1, %c1_28, %c0_29], %20 {strides = array<i32>} : memref<2x18x18x128xf32, #tpu.memory_space<vmem>>, vector<2x16x16x128xf32>,
    %c0_30 = arith.constant 0 : index
    %c0_31 = arith.constant 0 : index
    %c0_32 = arith.constant 0 : index
    %c0_33 = arith.constant 0 : index
    %22 = vector.load %arg9[%c0_30, %c0_31, %c0_32, %c0_33] : memref<2x18x18x128xf32, #tpu.memory_space<vmem>>, vector<2x16x16x128xf32>
    %23 = vector.shape_cast %22 : vector<2x16x16x128xf32> to vector<512x128xf32>
    %24 = arith.truncf %23 : vector<512x128xf32> to vector<512x128xbf16>
    %c0_34 = arith.constant 0 : index
    %c0_35 = arith.constant 0 : index
    %25 = vector.load %arg4[%c0_34, %c0_35] : memref<1152x128xbf16, #tpu.memory_space<vmem>>, vector<128x128xbf16>
    %cst_36 = arith.constant dense<0.000000e+00> : vector<512x128xf32>
    %26 = tpu.matmul %24, %25, %cst_36 {dimension_numbers = #tpu.dot_dimension_numbers<[1], [0], [0], [1], [0, 0, 1, 1], [], []>} : vector<512x128xbf16>, vector<128x128xbf16>, vector<512x128xf32> -> vector<512x128xf32>
    %c0_37 = arith.constant 0 : index
    %c0_38 = arith.constant 0 : index
    %c1_39 = arith.constant 1 : index
    %c0_40 = arith.constant 0 : index
    %27 = vector.load %arg9[%c0_37, %c0_38, %c1_39, %c0_40] : memref<2x18x18x128xf32, #tpu.memory_space<vmem>>, vector<2x16x16x128xf32>
    %28 = vector.shape_cast %27 : vector<2x16x16x128xf32> to vector<512x128xf32>
    %29 = arith.truncf %28 : vector<512x128xf32> to vector<512x128xbf16>
    %c128 = arith.constant 128 : index
    %c0_41 = arith.constant 0 : index
    %30 = vector.load %arg4[%c128, %c0_41] : memref<1152x128xbf16, #tpu.memory_space<vmem>>, vector<128x128xbf16>
    %cst_42 = arith.constant dense<0.000000e+00> : vector<512x128xf32>
    %31 = tpu.matmul %29, %30, %cst_42 {dimension_numbers = #tpu.dot_dimension_numbers<[1], [0], [0], [1], [0, 0, 1, 1], [], []>} : vector<512x128xbf16>, vector<128x128xbf16>, vector<512x128xf32> -> vector<512x128xf32>
    %32 = arith.addf %26, %31 : vector<512x128xf32>
    %c0_43 = arith.constant 0 : index
    %c0_44 = arith.constant 0 : index
    %c2 = arith.constant 2 : index
    %c0_45 = arith.constant 0 : index
    %33 = vector.load %arg9[%c0_43, %c0_44, %c2, %c0_45] : memref<2x18x18x128xf32, #tpu.memory_space<vmem>>, vector<2x16x16x128xf32>
    %34 = vector.shape_cast %33 : vector<2x16x16x128xf32> to vector<512x128xf32>
    %35 = arith.truncf %34 : vector<512x128xf32> to vector<512x128xbf16>
    %c256 = arith.constant 256 : index
    %c0_46 = arith.constant 0 : index
    %36 = vector.load %arg4[%c256, %c0_46] : memref<1152x128xbf16, #tpu.memory_space<vmem>>, vector<128x128xbf16>
    %cst_47 = arith.constant dense<0.000000e+00> : vector<512x128xf32>
    %37 = tpu.matmul %35, %36, %cst_47 {dimension_numbers = #tpu.dot_dimension_numbers<[1], [0], [0], [1], [0, 0, 1, 1], [], []>} : vector<512x128xbf16>, vector<128x128xbf16>, vector<512x128xf32> -> vector<512x128xf32>
    %38 = arith.addf %32, %37 : vector<512x128xf32>
    %c0_48 = arith.constant 0 : index
    %c1_49 = arith.constant 1 : index
    %c0_50 = arith.constant 0 : index
    %c0_51 = arith.constant 0 : index
    %39 = vector.load %arg9[%c0_48, %c1_49, %c0_50, %c0_51] : memref<2x18x18x128xf32, #tpu.memory_space<vmem>>, vector<2x16x16x128xf32>
    %40 = vector.shape_cast %39 : vector<2x16x16x128xf32> to vector<512x128xf32>
    %41 = arith.truncf %40 : vector<512x128xf32> to vector<512x128xbf16>
    %c384 = arith.constant 384 : index
    %c0_52 = arith.constant 0 : index
    %42 = vector.load %arg4[%c384, %c0_52] : memref<1152x128xbf16, #tpu.memory_space<vmem>>, vector<128x128xbf16>
    %cst_53 = arith.constant dense<0.000000e+00> : vector<512x128xf32>
    %43 = tpu.matmul %41, %42, %cst_53 {dimension_numbers = #tpu.dot_dimension_numbers<[1], [0], [0], [1], [0, 0, 1, 1], [], []>} : vector<512x128xbf16>, vector<128x128xbf16>, vector<512x128xf32> -> vector<512x128xf32>
    %44 = arith.addf %38, %43 : vector<512x128xf32>
    %c0_54 = arith.constant 0 : index
    %c1_55 = arith.constant 1 : index
    %c1_56 = arith.constant 1 : index
    %c0_57 = arith.constant 0 : index
    %45 = vector.load %arg9[%c0_54, %c1_55, %c1_56, %c0_57] : memref<2x18x18x128xf32, #tpu.memory_space<vmem>>, vector<2x16x16x128xf32>
    %46 = vector.shape_cast %45 : vector<2x16x16x128xf32> to vector<512x128xf32>
    %47 = arith.truncf %46 : vector<512x128xf32> to vector<512x128xbf16>
    %c512 = arith.constant 512 : index
    %c0_58 = arith.constant 0 : index
    %48 = vector.load %arg4[%c512, %c0_58] : memref<1152x128xbf16, #tpu.memory_space<vmem>>, vector<128x128xbf16>
    %cst_59 = arith.constant dense<0.000000e+00> : vector<512x128xf32>
    %49 = tpu.matmul %47, %48, %cst_59 {dimension_numbers = #tpu.dot_dimension_numbers<[1], [0], [0], [1], [0, 0, 1, 1], [], []>} : vector<512x128xbf16>, vector<128x128xbf16>, vector<512x128xf32> -> vector<512x128xf32>
    %50 = arith.addf %44, %49 : vector<512x128xf32>
    %c0_60 = arith.constant 0 : index
    %c1_61 = arith.constant 1 : index
    %c2_62 = arith.constant 2 : index
    %c0_63 = arith.constant 0 : index
    %51 = vector.load %arg9[%c0_60, %c1_61, %c2_62, %c0_63] : memref<2x18x18x128xf32, #tpu.memory_space<vmem>>, vector<2x16x16x128xf32>
    %52 = vector.shape_cast %51 : vector<2x16x16x128xf32> to vector<512x128xf32>
    %53 = arith.truncf %52 : vector<512x128xf32> to vector<512x128xbf16>
    %c640 = arith.constant 640 : index
    %c0_64 = arith.constant 0 : index
    %54 = vector.load %arg4[%c640, %c0_64] : memref<1152x128xbf16, #tpu.memory_space<vmem>>, vector<128x128xbf16>
    %cst_65 = arith.constant dense<0.000000e+00> : vector<512x128xf32>
    %55 = tpu.matmul %53, %54, %cst_65 {dimension_numbers = #tpu.dot_dimension_numbers<[1], [0], [0], [1], [0, 0, 1, 1], [], []>} : vector<512x128xbf16>, vector<128x128xbf16>, vector<512x128xf32> -> vector<512x128xf32>
    %56 = arith.addf %50, %55 : vector<512x128xf32>
    %c0_66 = arith.constant 0 : index
    %c2_67 = arith.constant 2 : index
    %c0_68 = arith.constant 0 : index
    %c0_69 = arith.constant 0 : index
    %57 = vector.load %arg9[%c0_66, %c2_67, %c0_68, %c0_69] : memref<2x18x18x128xf32, #tpu.memory_space<vmem>>, vector<2x16x16x128xf32>
    %58 = vector.shape_cast %57 : vector<2x16x16x128xf32> to vector<512x128xf32>
    %59 = arith.truncf %58 : vector<512x128xf32> to vector<512x128xbf16>
    %c768 = arith.constant 768 : index
    %c0_70 = arith.constant 0 : index
    %60 = vector.load %arg4[%c768, %c0_70] : memref<1152x128xbf16, #tpu.memory_space<vmem>>, vector<128x128xbf16>
    %cst_71 = arith.constant dense<0.000000e+00> : vector<512x128xf32>
    %61 = tpu.matmul %59, %60, %cst_71 {dimension_numbers = #tpu.dot_dimension_numbers<[1], [0], [0], [1], [0, 0, 1, 1], [], []>} : vector<512x128xbf16>, vector<128x128xbf16>, vector<512x128xf32> -> vector<512x128xf32>
    %62 = arith.addf %56, %61 : vector<512x128xf32>
    %c0_72 = arith.constant 0 : index
    %c2_73 = arith.constant 2 : index
    %c1_74 = arith.constant 1 : index
    %c0_75 = arith.constant 0 : index
    %63 = vector.load %arg9[%c0_72, %c2_73, %c1_74, %c0_75] : memref<2x18x18x128xf32, #tpu.memory_space<vmem>>, vector<2x16x16x128xf32>
    %64 = vector.shape_cast %63 : vector<2x16x16x128xf32> to vector<512x128xf32>
    %65 = arith.truncf %64 : vector<512x128xf32> to vector<512x128xbf16>
    %c896 = arith.constant 896 : index
    %c0_76 = arith.constant 0 : index
    %66 = vector.load %arg4[%c896, %c0_76] : memref<1152x128xbf16, #tpu.memory_space<vmem>>, vector<128x128xbf16>
    %cst_77 = arith.constant dense<0.000000e+00> : vector<512x128xf32>
    %67 = tpu.matmul %65, %66, %cst_77 {dimension_numbers = #tpu.dot_dimension_numbers<[1], [0], [0], [1], [0, 0, 1, 1], [], []>} : vector<512x128xbf16>, vector<128x128xbf16>, vector<512x128xf32> -> vector<512x128xf32>
    %68 = arith.addf %62, %67 : vector<512x128xf32>
    %c0_78 = arith.constant 0 : index
    %c2_79 = arith.constant 2 : index
    %c2_80 = arith.constant 2 : index
    %c0_81 = arith.constant 0 : index
    %69 = vector.load %arg9[%c0_78, %c2_79, %c2_80, %c0_81] : memref<2x18x18x128xf32, #tpu.memory_space<vmem>>, vector<2x16x16x128xf32>
    %70 = vector.shape_cast %69 : vector<2x16x16x128xf32> to vector<512x128xf32>
    %71 = arith.truncf %70 : vector<512x128xf32> to vector<512x128xbf16>
    %c1024 = arith.constant 1024 : index
    %c0_82 = arith.constant 0 : index
    %72 = vector.load %arg4[%c1024, %c0_82] : memref<1152x128xbf16, #tpu.memory_space<vmem>>, vector<128x128xbf16>
    %cst_83 = arith.constant dense<0.000000e+00> : vector<512x128xf32>
    %73 = tpu.matmul %71, %72, %cst_83 {dimension_numbers = #tpu.dot_dimension_numbers<[1], [0], [0], [1], [0, 0, 1, 1], [], []>} : vector<512x128xbf16>, vector<128x128xbf16>, vector<512x128xf32> -> vector<512x128xf32>
    %74 = arith.addf %68, %73 : vector<512x128xf32>
    %c0_84 = arith.constant 0 : index
    %c0_85 = arith.constant 0 : index
    %75 = vector.load %arg5[%c0_84, %c0_85] : memref<1x128xf32, #tpu.memory_space<vmem>>, vector<1x128xf32>
    %76 = vector.shape_cast %75 : vector<1x128xf32> to vector<128xf32>
    %77 = vector.shape_cast %76 : vector<128xf32> to vector<1x128xf32>
    %78 = vector.broadcast %77 : vector<1x128xf32> to vector<512x128xf32>
    %79 = arith.addf %74, %78 : vector<512x128xf32>
    %cst_86 = arith.constant 0.000000e+00 : f32
    %80 = vector.broadcast %cst_86 : f32 to vector<512x128xf32>
    %81 = arith.maximumf %79, %80 : vector<512x128xf32>
    %82 = arith.truncf %81 : vector<512x128xf32> to vector<512x128xbf16>
    %c0_87 = arith.constant 0 : index
    %c0_88 = arith.constant 0 : index
    %83 = vector.load %arg6[%c0_87, %c0_88] : memref<128x32xbf16, #tpu.memory_space<vmem>>, vector<128x32xbf16>
    %cst_89 = arith.constant dense<0.000000e+00> : vector<512x32xf32>
    %84 = tpu.matmul %82, %83, %cst_89 {dimension_numbers = #tpu.dot_dimension_numbers<[1], [0], [0], [1], [0, 0, 1, 1], [], []>} : vector<512x128xbf16>, vector<128x32xbf16>, vector<512x32xf32> -> vector<512x32xf32>
    %c0_90 = arith.constant 0 : index
    %c0_91 = arith.constant 0 : index
    %c0_92 = arith.constant 0 : index
    %c0_93 = arith.constant 0 : index
    %85 = vector.load %arg1[%c0_90, %c0_91, %c0_92, %c0_93] : memref<2x16x16x32xf32, #tpu.memory_space<vmem>>, vector<2x16x16x32xf32>
    %86 = vector.shape_cast %85 : vector<2x16x16x32xf32> to vector<512x32xf32>
    %c0_94 = arith.constant 0 : index
    %c0_95 = arith.constant 0 : index
    %87 = vector.load %arg7[%c0_94, %c0_95] : memref<1x32xf32, #tpu.memory_space<vmem>>, vector<1x32xf32>
    %88 = vector.shape_cast %87 : vector<1x32xf32> to vector<32xf32>
    %89 = vector.shape_cast %88 : vector<32xf32> to vector<1x32xf32>
    %90 = vector.broadcast %89 : vector<1x32xf32> to vector<512x32xf32>
    %91 = arith.addf %84, %90 : vector<512x32xf32>
    %92 = arith.addf %91, %86 : vector<512x32xf32>
    %cst_96 = arith.constant 0.000000e+00 : f32
    %93 = vector.broadcast %cst_96 : f32 to vector<512x32xf32>
    %94 = arith.maximumf %92, %93 : vector<512x32xf32>
    %95 = vector.shape_cast %94 : vector<512x32xf32> to vector<2x16x16x32xf32>
    %c0_97 = arith.constant 0 : index
    %c0_98 = arith.constant 0 : index
    %c0_99 = arith.constant 0 : index
    %c0_100 = arith.constant 0 : index
    %96 = vector.load %arg8[%c0_97, %c0_98, %c0_99, %c0_100] : memref<2x16x16x32xf32, #tpu.memory_space<vmem>>, vector<2x16x16x32xf32>
    tpu.vector_store %arg8[%c0_97, %c0_98, %c0_99, %c0_100], %95 {strides = array<i32>} : memref<2x16x16x32xf32, #tpu.memory_space<vmem>>, vector<2x16x16x32xf32>,
    return
  }
  func.func @transform_0(%arg0: i32) -> (i32, i32, i32, i32) {
    %c0_i32 = arith.constant 0 : i32
    %c0_i32_0 = arith.constant 0 : i32
    %c0_i32_1 = arith.constant 0 : i32
    %c0_i32_2 = arith.constant 0 : i32
    return %arg0, %c0_i32, %c0_i32_0, %c0_i32_1 : i32, i32, i32, i32
  }
  func.func @transform_1(%arg0: i32) -> (i32, i32) {
    %c0_i32 = arith.constant 0 : i32
    %c0_i32_0 = arith.constant 0 : i32
    %c0_i32_1 = arith.constant 0 : i32
    return %c0_i32, %c0_i32_0 : i32, i32
  }
  func.func @transform_2(%arg0: i32) -> (i32, i32) {
    %c0_i32 = arith.constant 0 : i32
    %c0_i32_0 = arith.constant 0 : i32
    %c0_i32_1 = arith.constant 0 : i32
    return %c0_i32, %c0_i32_0 : i32, i32
  }
  func.func @transform_3(%arg0: i32) -> (i32, i32) {
    %c0_i32 = arith.constant 0 : i32
    %c0_i32_0 = arith.constant 0 : i32
    %c0_i32_1 = arith.constant 0 : i32
    return %c0_i32, %c0_i32_0 : i32, i32
  }
  func.func @transform_4(%arg0: i32) -> (i32, i32) {
    %c0_i32 = arith.constant 0 : i32
    %c0_i32_0 = arith.constant 0 : i32
    %c0_i32_1 = arith.constant 0 : i32
    return %c0_i32, %c0_i32_0 : i32, i32
  }
  func.func @transform_5(%arg0: i32) -> (i32, i32) {
    %c0_i32 = arith.constant 0 : i32
    %c0_i32_0 = arith.constant 0 : i32
    %c0_i32_1 = arith.constant 0 : i32
    return %c0_i32, %c0_i32_0 : i32, i32
  }
  func.func @transform_6(%arg0: i32) -> (i32, i32) {
    %c0_i32 = arith.constant 0 : i32
    %c0_i32_0 = arith.constant 0 : i32
    %c0_i32_1 = arith.constant 0 : i32
    return %c0_i32, %c0_i32_0 : i32, i32
  }
  func.func @transform_7(%arg0: i32) -> (i32, i32, i32, i32) {
    %c0_i32 = arith.constant 0 : i32
    %c0_i32_0 = arith.constant 0 : i32
    %c0_i32_1 = arith.constant 0 : i32
    %c0_i32_2 = arith.constant 0 : i32
    return %arg0, %c0_i32, %c0_i32_0, %c0_i32_1 : i32, i32, i32, i32
  }
}

</mosaic_0001>

<bundles_post_ra>
// kernel: tpu_custom_call.1
= control target key start
LH: loop header
LB: loop body
LE: loop exit
PB: predicated region body
PF: predicated region fallthrough
CT: control target
= control target key end

     0   :  { %12 = vsyncpa [#allocation4], 0  ;;  %s9044_s0 = inlined_call_operand.hbm [shape: f32[2,16,16,32], index: 0, kind: input, shape index: {}]   ;;  %s9045_s1 = inlined_call_operand.vmem [shape: bf16[32,128], index: 1, kind: input, shape index: {}]   ;;  %s9046_s2 = inlined_call_operand.vmem [shape: f32[1,128], index: 2, kind: input, shape index: {}]   ;;  %s9047_s3 = inlined_call_operand.hbm [shape: bf16[1152,128], index: 3, kind: input, shape index: {}]   ;;  %s9048_s4 = inlined_call_operand.vmem [shape: f32[1,128], index: 4, kind: input, shape index: {}]   ;;  %s9049_s5 = inlined_call_operand.vmem [shape: bf16[128,32], index: 5, kind: input, shape index: {}]   ;;  %s9050_s6 = inlined_call_operand.vmem [shape: f32[1,32], index: 6, kind: input, shape index: {}]   ;;  %s9051_s7 = inlined_call_operand.hbm [shape: f32[2,16,16,32], index: 7, kind: output, shape index: {}]  }
   0x1   :  { %13 = vsyncpa [#allocation7], 0 }
   0x2   :  { %14 = vsyncpa [#allocation5], 0  ;;  %s8185_s24 = smov [#allocation3]   ;;  %s8113_s28 = scalar_lea.hbm %s9044_s0, 8192 }
   0x3   :  { %s20_s25 = sshll.u32 %s8185_s24, 4  ;;  %p8114_p0 = scmp.ne.s32.totalorder %s9044_s0, %s8113_s28  ;;  %s21_s25 = int_to_ptr.vmem [resolvable:$true] %s20_s25 }
   0x4   :  { %p8117_p1 = scmp.lt.u32.totalorder %s8113_s28, %s9044_s0 }
   0x6   :  { %p8119_p2 = pnand %p8117_p1, %p8114_p0 }
   0x8   :  { %8122 = shalt.err (!%p8119_p2)
}
   0x9   :  { %s8123_s10 = scalar_lea.vmem %s21_s25, 8192  ;;  %p8128_p4 = scmp.lt.s32.totalorder %s21_s25, %s21_s25 }
   0xa   :  { %p8124_p3 = scmp.ne.s32.totalorder %s21_s25, %s8123_s10  ;;  %p8129_p5 = scmp.lt.s32.totalorder %s8123_s10, %s8123_s10 }
   0xc   :  { %p8130_p6 = por %p8129_p5, %p8128_p4 }
   0xe   :  { %p8131_p7 = pnand %p8130_p6, %p8124_p3 }
  0x10   :  { %8134 = shalt.err (!%p8131_p7)
}
  0x11   :  { %s8186_s11 = smov 128   ;;  %s8187_s12 = smov 8  }
  0x12   :  { %26 = dma.hbm_to_vmem [thread:$0]  %s9044_s0, 8192, %s21_s25, [#allocation4], %s8186_s11, %s8186_s11, %s8187_s12  }
  0x13   :  { %s8188_s15 = smov [#allocation6]   ;;  %s8135_s19 = scalar_lea.hbm %s9047_s3, 9216 }
  0x14   :  { %s36_s16 = sshll.u32 %s8188_s15, 4  ;;  %p8136_p8 = scmp.ne.s32.totalorder %s9047_s3, %s8135_s19  ;;  %s37_s16 = int_to_ptr.vmem [resolvable:$true] %s36_s16 }
  0x15   :  { %p8139_p9 = scmp.lt.u32.totalorder %s8135_s19, %s9047_s3 }
  0x17   :  { %p8141_p10 = pnand %p8139_p9, %p8136_p8 }
  0x19   :  { %8144 = shalt.err (!%p8141_p10)
}
  0x1a   :  { %s8145_s24 = scalar_lea.vmem %s37_s16, 9216  ;;  %p8150_p12 = scmp.lt.s32.totalorder %s37_s16, %s37_s16 }
  0x1b   :  { %p8146_p11 = scmp.ne.s32.totalorder %s37_s16, %s8145_s24  ;;  %p8151_p13 = scmp.lt.s32.totalorder %s8145_s24, %s8145_s24 }
  0x1d   :  { %p8152_p0 = por %p8151_p13, %p8150_p12 }
  0x1f   :  { %p8153_p1 = pnand %p8152_p0, %p8146_p11 }
  0x21   :  { %8156 = shalt.err (!%p8153_p1)
}
  0x22   :  { %s8189_s0 = smov 64   ;;  %s8190_s25 = smov 4  }
  0x23   :  { %42 = dma.hbm_to_vmem [thread:$0]  %s9047_s3, 9216, %s37_s16, [#allocation7], %s8189_s0, %s8189_s0, %s8190_s25  }
  0x24   :  { %8179 = dma.done.wait [#allocation4], 8192  }
  0x25   :  { %8180 = vsyncadd [#allocation4], 4294959104 }
  0x26   :  { %8181 = dma.done.wait [#allocation7], 9216  }
  0x27   :  { %8182 = vsyncadd [#allocation7], 4294958080  ;;  %v8021_v0 = vld [vmem:[%s9045_s1] sm:$0xff]   ;;  %v8022_v1 = vld [vmem:[%s9045_s1 + $0x8] sm:$0xff]   ;;  %vm175_vm0 = vcmask 261120  }
  0x28   :  { %6617 = vmatprep.subr.bf16.mxu0 %v8021_v0  ;;  %v56_v2 = vld [vmem:[#allocation3] sm:$0xff]  ;;  %v57_v3 = vld [vmem:[#allocation3 + $0x8] sm:$0xff]  ;;  %v58_v5 = vld [vmem:[#allocation3 + $0x10] sm:$0xff] }
  0x29   :  { %6618 = vmatpush3.bf16.msra.mxu0 %v8021_v0  ;;  %v120_v4 = vpack.c.bf16 %v57_v3, %v56_v2  ;;  %v59_v6 = vld [vmem:[#allocation3 + $0x18] sm:$0xff]  ;;  %v60_v7 = vld [vmem:[#allocation3 + $0x20] sm:$0xff]  ;;  %v61_v8 = vld [vmem:[#allocation3 + $0x28] sm:$0xff] }
  0x2a   :  { %6619 = vmatprep.subr.bf16.mxu0 %v8022_v1  ;;  %v121_v9 = vpack.c.bf16 %v59_v6, %v58_v5  ;;  %v122_v10 = vpack.c.bf16 %v61_v8, %v60_v7  ;;  %v62_v11 = vld [vmem:[#allocation3 + $0x30] sm:$0xff]  ;;  %v63_v12 = vld [vmem:[#allocation3 + $0x38] sm:$0xff]  ;;  %v64_v13 = vld [vmem:[#allocation3 + $0x40] sm:$0xff] }
  0x2b   :  { %6621 = vmatprep.mubr.msk.bf16.mxu0 %vm175_vm0, %v120_v4  ;;  %v65_v14 = vld [vmem:[#allocation3 + $0x48] sm:$0xff]  ;;  %v123_v15 = vpack.c.bf16 %v63_v12, %v62_v11  ;;  %v66_v17 = vld [vmem:[#allocation3 + $0x50] sm:$0xff]  ;;  %v67_v18 = vld [vmem:[#allocation3 + $0x58] sm:$0xff] }
  0x2c   :  { %v124_v16 = vpack.c.bf16 %v65_v14, %v64_v13  ;;  %v68_v19 = vld [vmem:[#allocation3 + $0x60] sm:$0xff]  ;;  %v69_v20 = vld [vmem:[#allocation3 + $0x68] sm:$0xff]  ;;  %v125_v21 = vpack.c.bf16 %v67_v18, %v66_v17  ;;  %v70_v24 = vld [vmem:[#allocation3 + $0x70] sm:$0xff]  ;;  %v8191_v17 = vmov 0.0  }
  0x2d   :  { %6620 = vmatpush3.bf16.msra.mxu0 %v8022_v1  ;;  %v126_v22 = vpack.c.bf16 %v69_v20, %v68_v19  ;;  %v8023_v23 = vld [vmem:[#allocation6 + $0x40] sm:$0xff]   ;;  %v71_v25 = vld [vmem:[#allocation3 + $0x78] sm:$0xff]  ;;  %v8024_v26 = vld [vmem:[#allocation6 + $0x48] sm:$0xff]   ;;  %625 = vst [vmem:[#allocation2] sm:$0xff] %v8191_v17 }
  0x2e   :  { %v72_v27 = vld [vmem:[#allocation3 + $0x80] sm:$0xff]  ;;  %v73_v28 = vld [vmem:[#allocation3 + $0x88] sm:$0xff]  ;;  %6685 = vmatprep.subr.bf16.mxu0 %v8023_v23  ;;  %v8025_v29 = vld [vmem:[#allocation6 + $0x50] sm:$0xff]   ;;  %v127_v30 = vpack.c.bf16 %v71_v25, %v70_v24  ;;  %626 = vst [vmem:[#allocation2 + $0x8] sm:$0xff] %v8191_v17 }
  0x2f   :  { %v8026_v31 = vld [vmem:[#allocation6 + $0x58] sm:$0xff]   ;;  %v128_v32 = vpack.c.bf16 %v73_v28, %v72_v27  ;;  %v74_v33 = vld [vmem:[#allocation3 + $0x90] sm:$0xff]  ;;  %v76_v35 = vld [vmem:[#allocation3 + $0xa0] sm:$0xff]  ;;  %627 = vst [vmem:[#allocation2 + $0x10] sm:$0x3] %v8191_v17 }
  0x30   :  { %6622 = vmatmul.mubr.msk.bf16.vlgmr.msra.gmra.mrb[0].mxu0 %vm175_vm0, %v121_v9  ;;  %v75_v34 = vld [vmem:[#allocation3 + $0x98] sm:$0xff]  ;;  %v77_v36 = vld [vmem:[#allocation3 + $0xa8] sm:$0xff]  ;;  %v78_v39 = vld [vmem:[#allocation3 + $0xb0] sm:$0xff]  ;;  %628 = vst [vmem:[#allocation2 + $0x1b0] sm:$0xff] %v8191_v17 }
  0x31   :  { %6625 = vmatprep.mubr.msk.bf16.mxu0 %vm175_vm0, %v122_v10  ;;  %6686 = vmatpush3.bf16.msra.mxu0 %v8023_v23  ;;  %v129_v37 = vpack.c.bf16 %v75_v34, %v74_v33  ;;  %v130_v38 = vpack.c.bf16 %v77_v36, %v76_v35  ;;  %v79_v40 = vld [vmem:[#allocation3 + $0xb8] sm:$0xff]  ;;  %v80_v41 = vld [vmem:[#allocation3 + $0xc0] sm:$0xff]  ;;  %v81_v42 = vld [vmem:[#allocation3 + $0xc8] sm:$0xff]  ;;  %629 = vst [vmem:[#allocation2 + $0x1b8] sm:$0xff] %v8191_v17 }
  0x32   :  { %6687 = vmatprep.subr.bf16.mxu0 %v8024_v26  ;;  %v131_v43 = vpack.c.bf16 %v79_v40, %v78_v39  ;;  %v132_v44 = vpack.c.bf16 %v81_v42, %v80_v41  ;;  %v82_v45 = vld [vmem:[#allocation3 + $0xd0] sm:$0xff]  ;;  %v83_v46 = vld [vmem:[#allocation3 + $0xd8] sm:$0xff]  ;;  %v84_v47 = vld [vmem:[#allocation3 + $0xe0] sm:$0xff]  ;;  %630 = vst [vmem:[#allocation2 + $0x1c0] sm:$0x3] %v8191_v17 }
  0x33   :  { %v85_v48 = vld [vmem:[#allocation3 + $0xe8] sm:$0xff]  ;;  %v133_v49 = vpack.c.bf16 %v83_v46, %v82_v45  ;;  %v86_v51 = vld [vmem:[#allocation3 + $0xf0] sm:$0xff]  ;;  %v87_v52 = vld [vmem:[#allocation3 + $0xf8] sm:$0xff]  ;;  %632 = vst [vmem:[#allocation2 + $0x198] sm:$0xff] %v8191_v17 }
  0x34   :  { %v134_v50 = vpack.c.bf16 %v85_v48, %v84_v47  ;;  %v88_v53 = vld [vmem:[#allocation3 + $0x100] sm:$0xff]  ;;  %v89_v54 = vld [vmem:[#allocation3 + $0x108] sm:$0xff]  ;;  %v135_v55 = vpack.c.bf16 %v87_v52, %v86_v51  ;;  %v90_v57 = vld [vmem:[#allocation3 + $0x110] sm:$0xff]  ;;  %633 = vst [vmem:[#allocation2 + $0x1a0] sm:$0xff] %v8191_v17 }
  0x35   :  { %6688 = vmatpush3.bf16.msra.mxu0 %v8024_v26  ;;  %v136_v56 = vpack.c.bf16 %v89_v54, %v88_v53  ;;  %v91_v58 = vld [vmem:[#allocation3 + $0x118] sm:$0xff]  ;;  %v92_v59 = vld [vmem:[#allocation3 + $0x120] sm:$0xff]  ;;  %v93_v60 = vld [vmem:[#allocation3 + $0x128] sm:$0xff]  ;;  %634 = vst [vmem:[#allocation2 + $0x1a8] sm:$0x3] %v8191_v17 }
  0x36   :  { %6689 = vmatprep.subr.bf16.mxu0 %v8025_v29  ;;  %v137_v61 = vpack.c.bf16 %v91_v58, %v90_v57  ;;  %v138_v62 = vpack.c.bf16 %v93_v60, %v92_v59  ;;  %v94_v63 = vld [vmem:[#allocation3 + $0x130] sm:$0xff]  ;;  %v95_v0 = vld [vmem:[#allocation3 + $0x138] sm:$0xff]  ;;  %v96_v1 = vld [vmem:[#allocation3 + $0x140] sm:$0xff]  ;;  %635 = vst [vmem:[#allocation2 + $0x348] sm:$0xff] %v8191_v17 }
  0x37   :  { %v97_v2 = vld [vmem:[#allocation3 + $0x148] sm:$0xff]  ;;  %v139_v3 = vpack.c.bf16 %v95_v0, %v94_v63  ;;  %v98_v5 = vld [vmem:[#allocation3 + $0x150] sm:$0xff]  ;;  %v99_v6 = vld [vmem:[#allocation3 + $0x158] sm:$0xff]  ;;  %636 = vst [vmem:[#allocation2 + $0x350] sm:$0xff] %v8191_v17 }
  0x38   :  { %6626 = vmatmul.mubr.msk.bf16.gmra.mrb[4].mxu0 %vm175_vm0, %v123_v15  ;;  %v140_v4 = vpack.c.bf16 %v97_v2, %v96_v1  ;;  %v100_v7 = vld [vmem:[#allocation3 + $0x160] sm:$0xff]  ;;  %v101_v8 = vld [vmem:[#allocation3 + $0x168] sm:$0xff]  ;;  %v141_v10 = vpack.c.bf16 %v99_v6, %v98_v5  ;;  %v8289_v13 = vld [vmem:[#allocation3 + $0x170] sm:$0xff]  ;;  %637 = vst [vmem:[#allocation2 + $0x358] sm:$0x3] %v8191_v17 }
  0x39   :  { %6629 = vmatprep.mubr.msk.bf16.mxu0 %vm175_vm0, %v124_v16  ;;  %6690 = vmatpush3.bf16.msra.mxu0 %v8025_v29  ;;  %v8027_v9 = vld [vmem:[#allocation6 + $0x60] sm:$0xff]   ;;  %v142_v11 = vpack.c.bf16 %v101_v8, %v100_v7  ;;  %v8028_v12 = vld [vmem:[#allocation6 + $0x68] sm:$0xff]   ;;  %v8291_v14 = vld [vmem:[#allocation3 + $0x178] sm:$0xff]  ;;  %639 = vst [vmem:[#allocation2 + $0x18] sm:$0x1] %v8191_v17 }
  0x3a   :  { %6691 = vmatprep.subr.bf16.mxu0 %v8026_v31  ;;  %v8293_v15 = vld [vmem:[#allocation3 + $0x180] sm:$0xff]  ;;  %v8295_v16 = vld [vmem:[#allocation3 + $0x188] sm:$0xff]  ;;  %640 = vst [vmem:[#allocation2 + $0x30] sm:$0x1] %v8191_v17  ;;  %641 = vst [vmem:[#allocation2 + $0x48] sm:$0x1] %v8191_v17  ;;  %v143_v19 = vpack.c.bf16 %v8291_v14, %v8289_v13 }
  0x3b   :  { %642 = vst [vmem:[#allocation2 + $0x60] sm:$0x1] %v8191_v17  ;;  %643 = vst [vmem:[#allocation2 + $0x78] sm:$0x1] %v8191_v17  ;;  %v8029_v18 = vld [vmem:[#allocation6 + $0x70] sm:$0xff]   ;;  %v144_v20 = vpack.c.bf16 %v8295_v16, %v8293_v15  ;;  %v107_v23 = vld [vmem:[#allocation3 + $0x198] sm:$0xff] }
  0x3c   :  { %644 = vst [vmem:[#allocation2 + $0x90] sm:$0x1] %v8191_v17  ;;  %645 = vst [vmem:[#allocation2 + $0xa8] sm:$0x1] %v8191_v17  ;;  %v108_v24 = vld [vmem:[#allocation3 + $0x1a0] sm:$0xff]  ;;  %v109_v25 = vld [vmem:[#allocation3 + $0x1a8] sm:$0xff] }
  0x3d   :  { %6692 = vmatpush3.bf16.msra.mxu0 %v8026_v31  ;;  %646 = vst [vmem:[#allocation2 + $0xc0] sm:$0x1] %v8191_v17  ;;  %647 = vst [vmem:[#allocation2 + $0xd8] sm:$0x1] %v8191_v17  ;;  %v146_v27 = vpack.c.bf16 %v109_v25, %v108_v24  ;;  %v110_v28 = vld [vmem:[#allocation3 + $0x1b0] sm:$0xff]  ;;  %v111_v29 = vld [vmem:[#allocation3 + $0x1b8] sm:$0xff] }
  0x3e   :  { %6693 = vmatprep.subr.bf16.mxu0 %v8027_v9  ;;  %648 = vst [vmem:[#allocation2 + $0xf0] sm:$0x1] %v8191_v17  ;;  %649 = vst [vmem:[#allocation2 + $0x108] sm:$0x1] %v8191_v17  ;;  %v113_v31 = vld [vmem:[#allocation3 + $0x1c8] sm:$0xff]  ;;  %v114_v34 = vld [vmem:[#allocation3 + $0x1d0] sm:$0xff] }
  0x3f   :  { %650 = vst [vmem:[#allocation2 + $0x120] sm:$0x1] %v8191_v17  ;;  %651 = vst [vmem:[#allocation2 + $0x138] sm:$0x1] %v8191_v17  ;;  %v115_v35 = vld [vmem:[#allocation3 + $0x1d8] sm:$0xff]  ;;  %v116_v36 = vld [vmem:[#allocation3 + $0x1e0] sm:$0xff] }
  0x40   :  { %6630 = vmatmul.mubr.msk.bf16.gmra.mrb[8].mxu0 %vm175_vm0, %v125_v21  ;;  %652 = vst [vmem:[#allocation2 + $0x150] sm:$0x1] %v8191_v17  ;;  %653 = vst [vmem:[#allocation2 + $0x168] sm:$0x1] %v8191_v17  ;;  %v8030_v21 = vld [vmem:[#allocation6 + $0x78] sm:$0xff]   ;;  %v118_v40 = vld [vmem:[#allocation3 + $0x1f0] sm:$0xff] }
  0x41   :  { %6633 = vmatprep.mubr.msk.bf16.mxu0 %vm175_vm0, %v126_v22  ;;  %6694 = vmatpush3.bf16.msra.mxu0 %v8027_v9  ;;  %654 = vst [vmem:[#allocation2 + $0x180] sm:$0x1] %v8191_v17  ;;  %657 = vst [vmem:[#allocation2 + $0x1c8] sm:$0x1] %v8191_v17  ;;  %v106_v22 = vld [vmem:[#allocation3 + $0x190] sm:$0xff]  ;;  %v119_v41 = vld [vmem:[#allocation3 + $0x1f8] sm:$0xff] }
  0x42   :  { %6695 = vmatprep.subr.bf16.mxu0 %v8028_v12  ;;  %658 = vst [vmem:[#allocation2 + $0x1e0] sm:$0x1] %v8191_v17  ;;  %659 = vst [vmem:[#allocation2 + $0x1f8] sm:$0x1] %v8191_v17  ;;  %v145_v26 = vpack.c.bf16 %v107_v23, %v106_v22  ;;  %v887_v42 = vld [vmem:[#allocation2 + $0x1] sm:$0xff]  ;;  %v8033_v48 = vld [vmem:[#allocation6 + $0xd0] sm:$0xff]  }
  0x43   :  { %660 = vst [vmem:[#allocation2 + $0x210] sm:$0x1] %v8191_v17  ;;  %661 = vst [vmem:[#allocation2 + $0x228] sm:$0x1] %v8191_v17  ;;  %v8031_v46 = vld [vmem:[#allocation6 + $0xc0] sm:$0xff]   ;;  %v8032_v47 = vld [vmem:[#allocation6 + $0xc8] sm:$0xff]  }
  0x44   :  { %662 = vst [vmem:[#allocation2 + $0x240] sm:$0x1] %v8191_v17  ;;  %663 = vst [vmem:[#allocation2 + $0x258] sm:$0x1] %v8191_v17  ;;  %7485 = vmatprep.subr.bf16.mxu1 %v8031_v46  ;;  %v8036_v51 = vld [vmem:[#allocation6 + $0xe8] sm:$0xff]   ;;  %v8037_v52 = vld [vmem:[#allocation6 + $0xf0] sm:$0xff]  }
  0x45   :  { %6696 = vmatpush3.bf16.msra.mxu0 %v8028_v12  ;;  %664 = vst [vmem:[#allocation2 + $0x270] sm:$0x1] %v8191_v17  ;;  %665 = vst [vmem:[#allocation2 + $0x288] sm:$0x1] %v8191_v17  ;;  %7493 = vmatpush3.bf16.msra.mxu1 %v8031_v46  ;;  %v8038_v53 = vld [vmem:[#allocation6 + $0xf8] sm:$0xff]   ;;  %v8394_v54 = vld [vmem:[#allocation6 + $0x100] sm:$0xff]  }
  0x46   :  { %666 = vst [vmem:[#allocation2 + $0x2a0] sm:$0x1] %v8191_v17  ;;  %667 = vst [vmem:[#allocation2 + $0x2b8] sm:$0x1] %v8191_v17  ;;  %6697 = vmatprep.subr.bf16.mxu0 %v8029_v18  ;;  %7486 = vmatprep.subr.bf16.mxu1 %v8032_v47  ;;  %v8044_v8 = vld [vmem:[#allocation6 + $0x8] sm:$0xff]   ;;  %v8048_v24 = vld [vmem:[#allocation6 + $0x18] sm:$0xff]  }
  0x47   :  { %668 = vst [vmem:[#allocation2 + $0x2d0] sm:$0x1] %v8191_v17  ;;  %669 = vst [vmem:[#allocation2 + $0x2e8] sm:$0x1] %v8191_v17 }
  0x48   :  { %6634 = vmatmul.mubr.msk.bf16.gmra.mrb[12].mxu0 %vm175_vm0, %v127_v30  ;;  %670 = vst [vmem:[#allocation2 + $0x300] sm:$0x1] %v8191_v17  ;;  %671 = vst [vmem:[#allocation2 + $0x318] sm:$0x1] %v8191_v17  ;;  %v112_v30 = vld [vmem:[#allocation3 + $0x1c0] sm:$0xff] }
  0x49   :  { %6637 = vmatprep.mubr.msk.bf16.mxu0 %vm175_vm0, %v128_v32  ;;  %672 = vst [vmem:[#allocation2 + $0x330] sm:$0x1] %v8191_v17  ;;  %675 = vst [vmem:[#allocation2 + $0x29] sm:$0x1] %v8191_v17  ;;  %6698 = vmatpush3.bf16.msra.mxu0 %v8029_v18  ;;  %v147_v32 = vpack.c.bf16 %v111_v29, %v110_v28  ;;  %v148_v33 = vpack.c.bf16 %v113_v31, %v112_v30  ;;  %v8046_v18 = vld [vmem:[#allocation6 + $0x10] sm:$0xff]  }
  0x4a   :  { %676 = vst [vmem:[#allocation2 + $0x41] sm:$0x1] %v8191_v17  ;;  %677 = vst [vmem:[#allocation2 + $0x59] sm:$0x1] %v8191_v17  ;;  %6699 = vmatprep.subr.bf16.mxu0 %v8030_v21  ;;  %7494 = vmatpush3.bf16.msra.mxu1 %v8032_v47 }
  0x4b   :  { %678 = vst [vmem:[#allocation2 + $0x71] sm:$0x1] %v8191_v17  ;;  %679 = vst [vmem:[#allocation2 + $0x89] sm:$0x1] %v8191_v17  ;;  %7487 = vmatprep.subr.bf16.mxu1 %v8033_v48 }
  0x4c   :  { %680 = vst [vmem:[#allocation2 + $0xa1] sm:$0x1] %v8191_v17  ;;  %681 = vst [vmem:[#allocation2 + $0xb9] sm:$0x1] %v8191_v17 }
  0x4d   :  { %682 = vst [vmem:[#allocation2 + $0xd1] sm:$0x1] %v8191_v17  ;;  %683 = vst [vmem:[#allocation2 + $0xe9] sm:$0x1] %v8191_v17  ;;  %6700 = vmatpush3.bf16.msra.mxu0 %v8030_v21 }
  0x4e   :  { %684 = vst [vmem:[#allocation2 + $0x101] sm:$0x1] %v8191_v17  ;;  %685 = vst [vmem:[#allocation2 + $0x119] sm:$0x1] %v8191_v17  ;;  %7495 = vmatpush3.bf16.msra.mxu1 %v8033_v48 }
  0x4f   :  { %686 = vst [vmem:[#allocation2 + $0x131] sm:$0x1] %v8191_v17  ;;  %687 = vst [vmem:[#allocation2 + $0x149] sm:$0x1] %v8191_v17 }
  0x50   :  { %6638 = vmatmul.mubr.msk.bf16.gmra.mrb[16].mxu0 %vm175_vm0, %v129_v37  ;;  %688 = vst [vmem:[#allocation2 + $0x161] sm:$0x1] %v8191_v17  ;;  %689 = vst [vmem:[#allocation2 + $0x179] sm:$0x1] %v8191_v17  ;;  %v117_v37 = vld [vmem:[#allocation3 + $0x1e8] sm:$0xff] }
  0x51   :  { %6641 = vmatprep.mubr.msk.bf16.mxu0 %vm175_vm0, %v130_v38  ;;  %690 = vst [vmem:[#allocation2 + $0x191] sm:$0x1] %v8191_v17  ;;  %693 = vst [vmem:[#allocation2 + $0x1d9] sm:$0x1] %v8191_v17  ;;  %v149_v38 = vpack.c.bf16 %v115_v35, %v114_v34  ;;  %v150_v39 = vpack.c.bf16 %v117_v37, %v116_v36  ;;  %v8049_v34 = vld [vmem:[#allocation6 + $0x20] sm:$0xff]  }
  0x52   :  { %694 = vst [vmem:[#allocation2 + $0x1f1] sm:$0x1] %v8191_v17  ;;  %695 = vst [vmem:[#allocation2 + $0x209] sm:$0x1] %v8191_v17 }
  0x53   :  { %696 = vst [vmem:[#allocation2 + $0x221] sm:$0x1] %v8191_v17  ;;  %697 = vst [vmem:[#allocation2 + $0x239] sm:$0x1] %v8191_v17 }
  0x54   :  { %698 = vst [vmem:[#allocation2 + $0x251] sm:$0x1] %v8191_v17  ;;  %699 = vst [vmem:[#allocation2 + $0x269] sm:$0x1] %v8191_v17 }
  0x55   :  { %700 = vst [vmem:[#allocation2 + $0x281] sm:$0x1] %v8191_v17  ;;  %701 = vst [vmem:[#allocation2 + $0x299] sm:$0x1] %v8191_v17 }
  0x56   :  { %702 = vst [vmem:[#allocation2 + $0x2b1] sm:$0x1] %v8191_v17  ;;  %703 = vst [vmem:[#allocation2 + $0x2c9] sm:$0x1] %v8191_v17 }
  0x57   :  { %704 = vst [vmem:[#allocation2 + $0x2e1] sm:$0x1] %v8191_v17  ;;  %705 = vst [vmem:[#allocation2 + $0x2f9] sm:$0x1] %v8191_v17 }
  0x58   :  { %6642 = vmatmul.mubr.msk.bf16.gmra.mrb[20].mxu0 %vm175_vm0, %v131_v43  ;;  %706 = vst [vmem:[#allocation2 + $0x311] sm:$0x1] %v8191_v17  ;;  %707 = vst [vmem:[#allocation2 + $0x329] sm:$0x1] %v8191_v17  ;;  %v888_v43 = vld [vmem:[#allocation2 + $0x9] sm:$0xff] }
  0x59   :  { %6645 = vmatprep.mubr.msk.bf16.mxu0 %vm175_vm0, %v132_v44  ;;  %708 = vst [vmem:[#allocation2 + $0x341] sm:$0x1] %v8191_v17  ;;  %638 = vst [vmem:[#allocation2] sm:$0x1] %v8191_v17  ;;  %v151_v44 = vpack.c.bf16 %v119_v41, %v118_v40  ;;  %v951_v45 = vpack.c.bf16 %v888_v43, %v887_v42  ;;  %v8051_v40 = vld [vmem:[#allocation6 + $0x28] sm:$0xff]  }
  0x5a   :  { %674 = vst [vmem:[#allocation2 + $0x11] sm:$0x1] %v8191_v17  ;;  %655 = vst [vmem:[#allocation2 + $0x198] sm:$0x1] %v8191_v17 }
  0x5b   :  { %656 = vst [vmem:[#allocation2 + $0x1b0] sm:$0x1] %v8191_v17  ;;  %673 = vst [vmem:[#allocation2 + $0x348] sm:$0x1] %v8191_v17 }
  0x5c   :  { %691 = vst [vmem:[#allocation2 + $0x1a9] sm:$0x1] %v8191_v17  ;;  %692 = vst [vmem:[#allocation2 + $0x1c1] sm:$0x1] %v8191_v17 }
  0x5d   :  { %709 = vst [vmem:[#allocation2 + $0x359] sm:$0x1] %v8191_v17 }
  0x60   :  { %6646 = vmatmul.mubr.msk.bf16.gmra.mrb[24].mxu0 %vm175_vm0, %v133_v49  ;;  %v8034_v49 = vld [vmem:[#allocation6 + $0xd8] sm:$0xff]  }
  0x61   :  { %6649 = vmatprep.mubr.msk.bf16.mxu0 %vm175_vm0, %v134_v50  ;;  %7488 = vmatprep.subr.bf16.mxu1 %v8034_v49  ;;  %v8035_v50 = vld [vmem:[#allocation6 + $0xe0] sm:$0xff]  }
  0x62   :  { %7496 = vmatpush3.bf16.msra.mxu1 %v8034_v49 }
  0x63   :  { %7489 = vmatprep.subr.bf16.mxu1 %v8035_v50 }
  0x66   :  { %7497 = vmatpush3.bf16.msra.mxu1 %v8035_v50  ;;  %v8052_v50 = vld [vmem:[#allocation6 + $0x30] sm:$0xff]  }
  0x67   :  { %7490 = vmatprep.subr.bf16.mxu1 %v8036_v51 }
  0x68   :  { %6650 = vmatmul.mubr.msk.bf16.gmra.mrb[28].mxu0 %vm175_vm0, %v135_v55  ;;  %v8043_v55 = vld [vmem:[#allocation6] sm:$0xff]  }
  0x69   :  { %6653 = vmatprep.mubr.msk.bf16.mxu0 %vm175_vm0, %v136_v56  ;;  %6765 = vmatprep.subr.bf16.mxu0 %v8043_v55  ;;  %v8400_v56 = vld [vmem:[%s9046_s2] ss:$0 sm:$0xff] }
  0x6a   :  { %7498 = vmatpush3.bf16.msra.mxu1 %v8036_v51 }
  0x6b   :  { %7491 = vmatprep.subr.bf16.mxu1 %v8037_v52 }
  0x6e   :  { %7499 = vmatpush3.bf16.msra.mxu1 %v8037_v52 }
  0x6f   :  { %7492 = vmatprep.subr.bf16.mxu1 %v8038_v53 }
  0x70   :  { %6654 = vmatmul.mubr.msk.bf16.gmra.mrb[32].mxu0 %vm175_vm0, %v137_v61 }
  0x71   :  { %6657 = vmatprep.mubr.msk.bf16.mxu0 %vm175_vm0, %v138_v62 }
  0x72   :  { %7500 = vmatpush3.bf16.msra.mxu1 %v8038_v53 }
  0x73   :  { %7005 = vmatprep.subr.bf16.mxu1 %v8394_v54 }
  0x78   :  { %6658 = vmatmul.mubr.msk.bf16.gmra.mrb[36].mxu0 %vm175_vm0, %v139_v3 }
  0x79   :  { %6661 = vmatprep.mubr.msk.bf16.mxu0 %vm175_vm0, %v140_v4 }
  0x80   :  { %6662 = vmatmul.mubr.msk.bf16.gmra.mrb[40].mxu0 %vm175_vm0, %v141_v10 }
  0x81   :  { %6665 = vmatprep.mubr.msk.bf16.mxu0 %vm175_vm0, %v142_v11 }
  0x88   :  { %6666 = vmatmul.mubr.msk.bf16.gmra.mrb[44].mxu0 %vm175_vm0, %v143_v19 }
  0x89   :  { %6669 = vmatprep.mubr.msk.bf16.mxu0 %vm175_vm0, %v144_v20 }
  0x90   :  { %6670 = vmatmul.mubr.msk.bf16.gmra.mrb[48].mxu0 %vm175_vm0, %v145_v26 }
  0x91   :  { %6673 = vmatprep.mubr.msk.bf16.mxu0 %vm175_vm0, %v146_v27 }
  0x98   :  { %6674 = vmatmul.mubr.msk.bf16.gmra.mrb[52].mxu0 %vm175_vm0, %v147_v32 }
  0x99   :  { %6677 = vmatprep.mubr.msk.bf16.mxu0 %vm175_vm0, %v148_v33 }
  0xa0   :  { %6678 = vmatmul.mubr.msk.bf16.gmra.mrb[56].mxu0 %vm175_vm0, %v149_v38 }
  0xa1   :  { %6681 = vmatprep.mubr.msk.bf16.mxu0 %vm175_vm0, %v150_v39 }
  0xa8   :  { %6682 = vmatmul.mubr.msk.bf16.gmra.mrb[60].mxu0 %vm175_vm0, %v151_v44 }
  0xa9   :  { %6701 = vmatprep.mubr.bf16.mxu0 %v951_v45 }
 0x103   :  { %v6623_v57 = vpop.f32.mrb[0].mxu0 }
 0x104   :  { %v315_v58 = vadd.f32 %v6623_v57, %v8400_v56  ;;  %v306_v59 = vpop.f32.mrb[1].mxu0 }
 0x105   :  { %v307_v60 = vadd.f32 %v8400_v56, %v306_v59  ;;  %v6624_v61 = vpop.f32.mrb[2].mxu0 }
 0x106   :  { %v563_v62 = vmax.f32 %v315_v58, 0.0  ;;  %v318_v63 = vadd.f32 %v6624_v61, %v8400_v56  ;;  %v309_v0 = vpop.f32.mrb[3].mxu0  ;;  %v8054_v58 = vld [vmem:[#allocation6 + $0x38] sm:$0xff]  }
 0x107   :  { %v561_v1 = vmax.f32 %v307_v60, 0.0  ;;  %v310_v2 = vadd.f32 %v8400_v56, %v309_v0 }
 0x108   :  { %713 = vst [vmem:[#allocation2 + $0x31] sm:$0xff] %v563_v62  ;;  %v564_v3 = vmax.f32 %v318_v63, 0.0 }
 0x109   :  { %711 = vst [vmem:[#allocation2 + $0x19] sm:$0xff] %v561_v1  ;;  %v562_v4 = vmax.f32 %v310_v2, 0.0 }
 0x10a   :  { %714 = vst [vmem:[#allocation2 + $0x39] sm:$0xff] %v564_v3  ;;  %v953_v5 = vpack.c.bf16 %v564_v3, %v563_v62 }
 0x10b   :  { %712 = vst [vmem:[#allocation2 + $0x21] sm:$0xff] %v562_v4  ;;  %v6627_v6 = vpop.f32.mrb[4].mxu0  ;;  %v952_v7 = vpack.c.bf16 %v562_v4, %v561_v1 }
 0x10c   :  { %v331_v9 = vadd.f32 %v6627_v6, %v8400_v56  ;;  %v322_v10 = vpop.f32.mrb[5].mxu0 }
 0x10d   :  { %v323_v11 = vadd.f32 %v8400_v56, %v322_v10  ;;  %v6628_v12 = vpop.f32.mrb[6].mxu0  ;;  %6702 = vmatmul.mubr.bf16.vlgmr.msra.gmra.mrb[64].mxu0 %v952_v7 }
 0x10e   :  { %v567_v13 = vmax.f32 %v331_v9, 0.0  ;;  %v334_v14 = vadd.f32 %v6628_v12, %v8400_v56  ;;  %v325_v15 = vpop.f32.mrb[7].mxu0  ;;  %6705 = vmatprep.mubr.bf16.mxu0 %v953_v5  ;;  %6766 = vmatpush3.bf16.msra.mxu0 %v8043_v55 }
 0x10f   :  { %v565_v16 = vmax.f32 %v323_v11, 0.0  ;;  %v326_v17 = vadd.f32 %v8400_v56, %v325_v15  ;;  %6767 = vmatprep.subr.bf16.mxu0 %v8044_v8 }
 0x110   :  { %717 = vst [vmem:[#allocation2 + $0x61] sm:$0xff] %v567_v13  ;;  %v568_v19 = vmax.f32 %v334_v14, 0.0 }
 0x111   :  { %715 = vst [vmem:[#allocation2 + $0x49] sm:$0xff] %v565_v16  ;;  %v566_v20 = vmax.f32 %v326_v17, 0.0 }
 0x112   :  { %718 = vst [vmem:[#allocation2 + $0x69] sm:$0xff] %v568_v19  ;;  %v955_v21 = vpack.c.bf16 %v568_v19, %v567_v13  ;;  %6768 = vmatpush3.bf16.msra.mxu0 %v8044_v8 }
 0x113   :  { %716 = vst [vmem:[#allocation2 + $0x51] sm:$0xff] %v566_v20  ;;  %v6631_v22 = vpop.f32.mrb[8].mxu0  ;;  %v954_v23 = vpack.c.bf16 %v566_v20, %v565_v16  ;;  %6769 = vmatprep.subr.bf16.mxu0 %v8046_v18 }
 0x114   :  { %v347_v25 = vadd.f32 %v6631_v22, %v8400_v56  ;;  %v338_v26 = vpop.f32.mrb[9].mxu0 }
 0x115   :  { %v339_v27 = vadd.f32 %v8400_v56, %v338_v26  ;;  %v6632_v28 = vpop.f32.mrb[10].mxu0  ;;  %6706 = vmatmul.mubr.bf16.gmra.mrb[68].mxu0 %v954_v23 }
 0x116   :  { %v571_v29 = vmax.f32 %v347_v25, 0.0  ;;  %v350_v30 = vadd.f32 %v6632_v28, %v8400_v56  ;;  %v341_v31 = vpop.f32.mrb[11].mxu0  ;;  %6709 = vmatprep.mubr.bf16.mxu0 %v955_v21  ;;  %6770 = vmatpush3.bf16.msra.mxu0 %v8046_v18 }
 0x117   :  { %v569_v32 = vmax.f32 %v339_v27, 0.0  ;;  %v342_v33 = vadd.f32 %v8400_v56, %v341_v31  ;;  %6771 = vmatprep.subr.bf16.mxu0 %v8048_v24 }
 0x118   :  { %721 = vst [vmem:[#allocation2 + $0x91] sm:$0xff] %v571_v29  ;;  %v572_v35 = vmax.f32 %v350_v30, 0.0 }
 0x119   :  { %719 = vst [vmem:[#allocation2 + $0x79] sm:$0xff] %v569_v32  ;;  %v570_v36 = vmax.f32 %v342_v33, 0.0 }
 0x11a   :  { %722 = vst [vmem:[#allocation2 + $0x99] sm:$0xff] %v572_v35  ;;  %v957_v37 = vpack.c.bf16 %v572_v35, %v571_v29  ;;  %6772 = vmatpush3.bf16.msra.mxu0 %v8048_v24 }
 0x11b   :  { %720 = vst [vmem:[#allocation2 + $0x81] sm:$0xff] %v570_v36  ;;  %v6635_v38 = vpop.f32.mrb[12].mxu0  ;;  %v956_v39 = vpack.c.bf16 %v570_v36, %v569_v32  ;;  %6773 = vmatprep.subr.bf16.mxu0 %v8049_v34 }
 0x11c   :  { %v363_v41 = vadd.f32 %v6635_v38, %v8400_v56  ;;  %v354_v42 = vpop.f32.mrb[13].mxu0 }
 0x11d   :  { %v355_v43 = vadd.f32 %v8400_v56, %v354_v42  ;;  %v6636_v44 = vpop.f32.mrb[14].mxu0  ;;  %6710 = vmatmul.mubr.bf16.gmra.mrb[72].mxu0 %v956_v39 }
 0x11e   :  { %v575_v45 = vmax.f32 %v363_v41, 0.0  ;;  %v366_v46 = vadd.f32 %v6636_v44, %v8400_v56  ;;  %v357_v47 = vpop.f32.mrb[15].mxu0  ;;  %6713 = vmatprep.mubr.bf16.mxu0 %v957_v37  ;;  %6774 = vmatpush3.bf16.msra.mxu0 %v8049_v34 }
 0x11f   :  { %v573_v48 = vmax.f32 %v355_v43, 0.0  ;;  %v358_v49 = vadd.f32 %v8400_v56, %v357_v47  ;;  %6775 = vmatprep.subr.bf16.mxu0 %v8051_v40  ;;  %v920_v47 = vld [vmem:[#allocation2 + $0x1b9] sm:$0xff] }
 0x120   :  { %725 = vst [vmem:[#allocation2 + $0xc1] sm:$0xff] %v575_v45  ;;  %v576_v51 = vmax.f32 %v366_v46, 0.0  ;;  %v919_v46 = vld [vmem:[#allocation2 + $0x1b1] sm:$0xff] }
 0x121   :  { %723 = vst [vmem:[#allocation2 + $0xa9] sm:$0xff] %v573_v48  ;;  %v574_v52 = vmax.f32 %v358_v49, 0.0 }
 0x122   :  { %726 = vst [vmem:[#allocation2 + $0xc9] sm:$0xff] %v576_v51  ;;  %v959_v53 = vpack.c.bf16 %v576_v51, %v575_v45  ;;  %6776 = vmatpush3.bf16.msra.mxu0 %v8051_v40 }
 0x123   :  { %724 = vst [vmem:[#allocation2 + $0xb1] sm:$0xff] %v574_v52  ;;  %v6639_v55 = vpop.f32.mrb[16].mxu0  ;;  %v958_v57 = vpack.c.bf16 %v574_v52, %v573_v48  ;;  %6777 = vmatprep.subr.bf16.mxu0 %v8052_v50 }
 0x124   :  { %v379_v59 = vadd.f32 %v6639_v55, %v8400_v56  ;;  %v370_v60 = vpop.f32.mrb[17].mxu0 }
 0x125   :  { %v371_v61 = vadd.f32 %v8400_v56, %v370_v60  ;;  %v6640_v62 = vpop.f32.mrb[18].mxu0  ;;  %6714 = vmatmul.mubr.bf16.gmra.mrb[76].mxu0 %v958_v57 }
 0x126   :  { %v579_v63 = vmax.f32 %v379_v59, 0.0  ;;  %v382_v0 = vadd.f32 %v6640_v62, %v8400_v56  ;;  %v373_v1 = vpop.f32.mrb[19].mxu0  ;;  %6717 = vmatprep.mubr.bf16.mxu0 %v959_v53  ;;  %6778 = vmatpush3.bf16.msra.mxu0 %v8052_v50  ;;  %v967_v50 = vpack.c.bf16 %v920_v47, %v919_v46 }
 0x127   :  { %v577_v2 = vmax.f32 %v371_v61, 0.0  ;;  %v374_v3 = vadd.f32 %v8400_v56, %v373_v1  ;;  %6779 = vmatprep.subr.bf16.mxu0 %v8054_v58 }
 0x128   :  { %729 = vst [vmem:[#allocation2 + $0xf1] sm:$0xff] %v579_v63  ;;  %v580_v4 = vmax.f32 %v382_v0, 0.0 }
 0x129   :  { %727 = vst [vmem:[#allocation2 + $0xd9] sm:$0xff] %v577_v2  ;;  %v578_v5 = vmax.f32 %v374_v3, 0.0 }
 0x12a   :  { %730 = vst [vmem:[#allocation2 + $0xf9] sm:$0xff] %v580_v4  ;;  %v961_v6 = vpack.c.bf16 %v580_v4, %v579_v63  ;;  %6780 = vmatpush3.bf16.msra.mxu0 %v8054_v58 }
 0x12b   :  { %728 = vst [vmem:[#allocation2 + $0xe1] sm:$0xff] %v578_v5  ;;  %v6643_v7 = vpop.f32.mrb[20].mxu0  ;;  %v960_v8 = vpack.c.bf16 %v578_v5, %v577_v2 }
 0x12c   :  { %v395_v9 = vadd.f32 %v6643_v7, %v8400_v56  ;;  %v386_v10 = vpop.f32.mrb[21].mxu0 }
 0x12d   :  { %v387_v11 = vadd.f32 %v8400_v56, %v386_v10  ;;  %v6644_v12 = vpop.f32.mrb[22].mxu0  ;;  %6718 = vmatmul.mubr.bf16.gmra.mrb[80].mxu0 %v960_v8 }
 0x12e   :  { %v583_v13 = vmax.f32 %v395_v9, 0.0  ;;  %v398_v14 = vadd.f32 %v6644_v12, %v8400_v56  ;;  %v389_v15 = vpop.f32.mrb[23].mxu0  ;;  %6721 = vmatprep.mubr.bf16.mxu0 %v961_v6 }
 0x12f   :  { %v581_v16 = vmax.f32 %v387_v11, 0.0  ;;  %v390_v17 = vadd.f32 %v8400_v56, %v389_v15 }
 0x130   :  { %733 = vst [vmem:[#allocation2 + $0x121] sm:$0xff] %v583_v13  ;;  %v584_v18 = vmax.f32 %v398_v14, 0.0 }
 0x131   :  { %731 = vst [vmem:[#allocation2 + $0x109] sm:$0xff] %v581_v16  ;;  %v582_v19 = vmax.f32 %v390_v17, 0.0 }
 0x132   :  { %734 = vst [vmem:[#allocation2 + $0x129] sm:$0xff] %v584_v18  ;;  %v963_v20 = vpack.c.bf16 %v584_v18, %v583_v13 }
 0x133   :  { %732 = vst [vmem:[#allocation2 + $0x111] sm:$0xff] %v582_v19  ;;  %v6647_v21 = vpop.f32.mrb[24].mxu0  ;;  %v962_v22 = vpack.c.bf16 %v582_v19, %v581_v16 }
 0x134   :  { %v411_v23 = vadd.f32 %v6647_v21, %v8400_v56  ;;  %v402_v24 = vpop.f32.mrb[25].mxu0 }
 0x135   :  { %v403_v25 = vadd.f32 %v8400_v56, %v402_v24  ;;  %v6648_v26 = vpop.f32.mrb[26].mxu0  ;;  %6722 = vmatmul.mubr.bf16.gmra.mrb[84].mxu0 %v962_v22 }
 0x136   :  { %v587_v27 = vmax.f32 %v411_v23, 0.0  ;;  %v414_v28 = vadd.f32 %v6648_v26, %v8400_v56  ;;  %v405_v29 = vpop.f32.mrb[27].mxu0  ;;  %6725 = vmatprep.mubr.bf16.mxu0 %v963_v20 }
 0x137   :  { %v585_v30 = vmax.f32 %v403_v25, 0.0  ;;  %v406_v31 = vadd.f32 %v8400_v56, %v405_v29 }
 0x138   :  { %737 = vst [vmem:[#allocation2 + $0x151] sm:$0xff] %v587_v27  ;;  %v588_v32 = vmax.f32 %v414_v28, 0.0 }
 0x139   :  { %735 = vst [vmem:[#allocation2 + $0x139] sm:$0xff] %v585_v30  ;;  %v586_v33 = vmax.f32 %v406_v31, 0.0 }
 0x13a   :  { %738 = vst [vmem:[#allocation2 + $0x159] sm:$0xff] %v588_v32  ;;  %v965_v34 = vpack.c.bf16 %v588_v32, %v587_v27 }
 0x13b   :  { %736 = vst [vmem:[#allocation2 + $0x141] sm:$0xff] %v586_v33  ;;  %v6651_v35 = vpop.f32.mrb[28].mxu0  ;;  %v964_v36 = vpack.c.bf16 %v586_v33, %v585_v30 }
 0x13c   :  { %v427_v37 = vadd.f32 %v6651_v35, %v8400_v56  ;;  %v418_v38 = vpop.f32.mrb[29].mxu0 }
 0x13d   :  { %v419_v39 = vadd.f32 %v8400_v56, %v418_v38  ;;  %v6652_v40 = vpop.f32.mrb[30].mxu0  ;;  %6726 = vmatmul.mubr.bf16.gmra.mrb[88].mxu0 %v964_v36 }
 0x13e   :  { %v591_v41 = vmax.f32 %v427_v37, 0.0  ;;  %v430_v42 = vadd.f32 %v6652_v40, %v8400_v56  ;;  %v421_v43 = vpop.f32.mrb[31].mxu0  ;;  %6729 = vmatprep.mubr.bf16.mxu0 %v965_v34 }
 0x13f   :  { %v589_v44 = vmax.f32 %v419_v39, 0.0  ;;  %v422_v45 = vadd.f32 %v8400_v56, %v421_v43 }
 0x140   :  { %741 = vst [vmem:[#allocation2 + $0x181] sm:$0xff] %v591_v41  ;;  %v592_v48 = vmax.f32 %v430_v42, 0.0  ;;  %v8040_v41 = vld [vmem:[#allocation6 + $0x108] sm:$0xff]  }
 0x141   :  { %739 = vst [vmem:[#allocation2 + $0x169] sm:$0xff] %v589_v44  ;;  %v590_v49 = vmax.f32 %v422_v45, 0.0 }
 0x142   :  { %742 = vst [vmem:[#allocation2 + $0x189] sm:$0xff] %v592_v48 }
 0x143   :  { %740 = vst [vmem:[#allocation2 + $0x171] sm:$0xff] %v590_v49  ;;  %v6655_v51 = vpop.f32.mrb[32].mxu0  ;;  %v966_v52 = vpack.c.bf16 %v590_v49, %v589_v44 }
 0x144   :  { %v443_v53 = vadd.f32 %v6655_v51, %v8400_v56  ;;  %v434_v55 = vpop.f32.mrb[33].mxu0 }
 0x145   :  { %v435_v57 = vadd.f32 %v8400_v56, %v434_v55  ;;  %v6656_v58 = vpop.f32.mrb[34].mxu0  ;;  %6730 = vmatmul.mubr.bf16.gmra.mrb[92].mxu0 %v966_v52 }
 0x146   :  { %v595_v59 = vmax.f32 %v443_v53, 0.0  ;;  %v446_v60 = vadd.f32 %v6656_v58, %v8400_v56  ;;  %v437_v61 = vpop.f32.mrb[35].mxu0  ;;  %6733 = vmatprep.mubr.bf16.mxu0 %v967_v50  ;;  %v8041_v50 = vld [vmem:[#allocation6 + $0x110] sm:$0xff]  }
 0x147   :  { %v593_v62 = vmax.f32 %v435_v57, 0.0  ;;  %v438_v63 = vadd.f32 %v8400_v56, %v437_v61 }
 0x148   :  { %745 = vst [vmem:[#allocation2 + $0x1e1] sm:$0xff] %v595_v59  ;;  %v596_v0 = vmax.f32 %v446_v60, 0.0 }
 0x149   :  { %743 = vst [vmem:[#allocation2 + $0x1c9] sm:$0xff] %v593_v62  ;;  %v594_v1 = vmax.f32 %v438_v63, 0.0 }
 0x14a   :  { %746 = vst [vmem:[#allocation2 + $0x1e9] sm:$0xff] %v596_v0  ;;  %v969_v2 = vpack.c.bf16 %v596_v0, %v595_v59  ;;  %v8042_v0 = vld [vmem:[#allocation6 + $0x118] sm:$0xff]  }
 0x14b   :  { %744 = vst [vmem:[#allocation2 + $0x1d1] sm:$0xff] %v594_v1  ;;  %v6659_v3 = vpop.f32.mrb[36].mxu0  ;;  %v8438_v4 = vpack.c.bf16 %v594_v1, %v593_v62 }
 0x14c   :  { %v459_v5 = vadd.f32 %v6659_v3, %v8400_v56  ;;  %v450_v6 = vpop.f32.mrb[37].mxu0 }
 0x14d   :  { %v451_v7 = vadd.f32 %v8400_v56, %v450_v6  ;;  %v6660_v8 = vpop.f32.mrb[38].mxu0  ;;  %6734 = vmatmul.mubr.bf16.gmra.mrb[96].mxu0 %v8438_v4 }
 0x14e   :  { %v599_v9 = vmax.f32 %v459_v5, 0.0  ;;  %v462_v10 = vadd.f32 %v6660_v8, %v8400_v56  ;;  %v453_v11 = vpop.f32.mrb[39].mxu0  ;;  %6737 = vmatprep.mubr.bf16.mxu0 %v969_v2 }
 0x14f   :  { %v597_v12 = vmax.f32 %v451_v7, 0.0  ;;  %v454_v13 = vadd.f32 %v8400_v56, %v453_v11 }
 0x150   :  { %749 = vst [vmem:[#allocation2 + $0x211] sm:$0xff] %v599_v9  ;;  %v8445_v14 = vmax.f32 %v462_v10, 0.0  ;;  %v8045_v10 = vld [vmem:[#allocation6 + $0x120] sm:$0xff]  }
 0x151   :  { %747 = vst [vmem:[#allocation2 + $0x1f9] sm:$0xff] %v597_v12  ;;  %v598_v15 = vmax.f32 %v454_v13, 0.0 }
 0x152   :  { %750 = vst [vmem:[#allocation2 + $0x219] sm:$0xff] %v8445_v14  ;;  %v971_v16 = vpack.c.bf16 %v8445_v14, %v599_v9 }
 0x153   :  { %748 = vst [vmem:[#allocation2 + $0x201] sm:$0xff] %v598_v15  ;;  %v6663_v17 = vpop.f32.mrb[40].mxu0  ;;  %v8449_v18 = vpack.c.bf16 %v598_v15, %v597_v12 }
 0x154   :  { %v475_v19 = vadd.f32 %v6663_v17, %v8400_v56  ;;  %v466_v20 = vpop.f32.mrb[41].mxu0 }
 0x155   :  { %v467_v21 = vadd.f32 %v8400_v56, %v466_v20  ;;  %v6664_v22 = vpop.f32.mrb[42].mxu0  ;;  %6738 = vmatmul.mubr.bf16.gmra.mrb[100].mxu0 %v8449_v18 }
 0x156   :  { %v603_v23 = vmax.f32 %v475_v19, 0.0  ;;  %v478_v24 = vadd.f32 %v6664_v22, %v8400_v56  ;;  %v469_v25 = vpop.f32.mrb[43].mxu0  ;;  %6741 = vmatprep.mubr.bf16.mxu0 %v971_v16  ;;  %v8495_v22 = vld [vmem:[#allocation6 + $0x80] sm:$0xff]  }
 0x157   :  { %v601_v26 = vmax.f32 %v467_v21, 0.0  ;;  %v470_v27 = vadd.f32 %v8400_v56, %v469_v25  ;;  %v2224_v36 = vld [vmem:[#allocation2 + $0x210] sm:$0xff]  ;;  %6845 = vmatprep.subr.bf16.mxu0 %v8495_v22 }
 0x158   :  { %753 = vst [vmem:[#allocation2 + $0x241] sm:$0xff] %v603_v23  ;;  %v604_v28 = vmax.f32 %v478_v24, 0.0  ;;  %v2222_v31 = vld [vmem:[#allocation2 + $0x1f8] sm:$0xff] }
 0x159   :  { %751 = vst [vmem:[#allocation2 + $0x229] sm:$0xff] %v601_v26  ;;  %v602_v29 = vmax.f32 %v470_v27, 0.0  ;;  %v2225_v30 = vld [vmem:[#allocation2 + $0x218] sm:$0xff] }
 0x15a   :  { %754 = vst [vmem:[#allocation2 + $0x249] sm:$0xff] %v604_v28  ;;  %v2223_v32 = vld [vmem:[#allocation2 + $0x200] sm:$0xff]  ;;  %v8456_v33 = vpack.c.bf16 %v604_v28, %v603_v23  ;;  %v8463_v40 = vpack.c.bf16 %v2225_v30, %v2224_v36 }
 0x15b   :  { %752 = vst [vmem:[#allocation2 + $0x231] sm:$0xff] %v602_v29  ;;  %v6667_v34 = vpop.f32.mrb[44].mxu0  ;;  %v8458_v35 = vpack.c.bf16 %v2223_v32, %v2222_v31  ;;  %v8460_v37 = vpack.c.bf16 %v602_v29, %v601_v26  ;;  %v8047_v26 = vld [vmem:[#allocation6 + $0x128] sm:$0xff]  }
 0x15c   :  { %v491_v38 = vadd.f32 %v6667_v34, %v8400_v56  ;;  %v482_v39 = vpop.f32.mrb[45].mxu0 }
 0x15d   :  { %v483_v42 = vadd.f32 %v8400_v56, %v482_v39  ;;  %v6668_v43 = vpop.f32.mrb[46].mxu0  ;;  %6977 = vmatprep.mubr.bf16.mxu1 %v8458_v35  ;;  %6742 = vmatmul.mubr.bf16.gmra.mrb[104].mxu0 %v8460_v37 }
 0x15e   :  { %v607_v44 = vmax.f32 %v491_v38, 0.0  ;;  %v494_v45 = vadd.f32 %v6668_v43, %v8400_v56  ;;  %v485_v46 = vpop.f32.mrb[47].mxu0  ;;  %6978 = vmatmul.mubr.bf16.vlgmr.msra.gmra.mrb[0].mxu1 %v8463_v40  ;;  %6745 = vmatprep.mubr.bf16.mxu0 %v8456_v33  ;;  %v8050_v38 = vld [vmem:[#allocation6 + $0x130] sm:$0xff]  }
 0x15f   :  { %v605_v47 = vmax.f32 %v483_v42, 0.0  ;;  %v486_v48 = vadd.f32 %v8400_v56, %v485_v46  ;;  %7006 = vmatpush3.bf16.msra.mxu1 %v8394_v54  ;;  %v2228_v60 = vld [vmem:[#allocation2 + $0x240] sm:$0xff] }
 0x160   :  { %757 = vst [vmem:[#allocation2 + $0x271] sm:$0xff] %v607_v44  ;;  %v608_v49 = vmax.f32 %v494_v45, 0.0  ;;  %7007 = vmatprep.subr.bf16.mxu1 %v8040_v41  ;;  %v2226_v53 = vld [vmem:[#allocation2 + $0x228] sm:$0xff] }
 0x161   :  { %755 = vst [vmem:[#allocation2 + $0x259] sm:$0xff] %v605_v47  ;;  %v606_v51 = vmax.f32 %v486_v48, 0.0  ;;  %v2229_v52 = vld [vmem:[#allocation2 + $0x248] sm:$0xff] }
 0x162   :  { %758 = vst [vmem:[#allocation2 + $0x279] sm:$0xff] %v608_v49  ;;  %v2227_v55 = vld [vmem:[#allocation2 + $0x230] sm:$0xff]  ;;  %v8473_v57 = vpack.c.bf16 %v608_v49, %v607_v44  ;;  %v8480_v63 = vpack.c.bf16 %v2229_v52, %v2228_v60  ;;  %v8053_v52 = vld [vmem:[#allocation6 + $0x138] sm:$0xff]  }
 0x163   :  { %756 = vst [vmem:[#allocation2 + $0x261] sm:$0xff] %v606_v51  ;;  %v6671_v58 = vpop.f32.mrb[48].mxu0  ;;  %v8475_v59 = vpack.c.bf16 %v2227_v55, %v2226_v53  ;;  %7008 = vmatpush3.bf16.msra.mxu1 %v8040_v41  ;;  %v8477_v61 = vpack.c.bf16 %v606_v51, %v605_v47 }
 0x164   :  { %v507_v54 = vadd.f32 %v6671_v58, %v8400_v56  ;;  %v498_v62 = vpop.f32.mrb[49].mxu0  ;;  %7009 = vmatprep.subr.bf16.mxu1 %v8041_v50 }
 0x165   :  { %v499_v1 = vadd.f32 %v8400_v56, %v498_v62  ;;  %v6672_v2 = vpop.f32.mrb[50].mxu0  ;;  %6981 = vmatprep.mubr.bf16.mxu1 %v8475_v59  ;;  %6746 = vmatmul.mubr.bf16.gmra.mrb[108].mxu0 %v8477_v61 }
 0x166   :  { %v611_v3 = vmax.f32 %v507_v54, 0.0  ;;  %v510_v5 = vadd.f32 %v6672_v2, %v8400_v56  ;;  %v501_v6 = vpop.f32.mrb[51].mxu0  ;;  %6982 = vmatmul.mubr.bf16.gmra.mrb[4].mxu1 %v8480_v63  ;;  %6749 = vmatprep.mubr.bf16.mxu0 %v8473_v57  ;;  %v8524_v2 = vld [vmem:[#allocation6 + $0x140] sm:$0xff]  }
 0x167   :  { %v609_v7 = vmax.f32 %v499_v1, 0.0  ;;  %v502_v8 = vadd.f32 %v8400_v56, %v501_v6  ;;  %7010 = vmatpush3.bf16.msra.mxu1 %v8041_v50  ;;  %v2232_v20 = vld [vmem:[#allocation2 + $0x270] sm:$0xff] }
 0x168   :  { %761 = vst [vmem:[#allocation2 + $0x2a1] sm:$0xff] %v611_v3  ;;  %v612_v9 = vmax.f32 %v510_v5, 0.0  ;;  %7011 = vmatprep.subr.bf16.mxu1 %v8042_v0  ;;  %v2230_v13 = vld [vmem:[#allocation2 + $0x258] sm:$0xff] }
 0x169   :  { %759 = vst [vmem:[#allocation2 + $0x289] sm:$0xff] %v609_v7  ;;  %v610_v11 = vmax.f32 %v502_v8, 0.0  ;;  %v2233_v12 = vld [vmem:[#allocation2 + $0x278] sm:$0xff] }
 0x16a   :  { %762 = vst [vmem:[#allocation2 + $0x2a9] sm:$0xff] %v612_v9  ;;  %v2231_v15 = vld [vmem:[#allocation2 + $0x260] sm:$0xff]  ;;  %v8489_v16 = vpack.c.bf16 %v612_v9, %v611_v3  ;;  %v8498_v25 = vpack.c.bf16 %v2233_v12, %v2232_v20 }
 0x16b   :  { %760 = vst [vmem:[#allocation2 + $0x291] sm:$0xff] %v610_v11  ;;  %v6675_v17 = vpop.f32.mrb[52].mxu0  ;;  %v8491_v19 = vpack.c.bf16 %v2231_v15, %v2230_v13  ;;  %7012 = vmatpush3.bf16.msra.mxu1 %v8042_v0  ;;  %v8493_v21 = vpack.c.bf16 %v610_v11, %v609_v7 }
 0x16c   :  { %v523_v23 = vadd.f32 %v6675_v17, %v8400_v56  ;;  %v514_v24 = vpop.f32.mrb[53].mxu0  ;;  %7013 = vmatprep.subr.bf16.mxu1 %v8045_v10 }
 0x16d   :  { %v515_v27 = vadd.f32 %v8400_v56, %v514_v24  ;;  %v6676_v28 = vpop.f32.mrb[54].mxu0  ;;  %6985 = vmatprep.mubr.bf16.mxu1 %v8491_v19  ;;  %6750 = vmatmul.mubr.bf16.gmra.mrb[112].mxu0 %v8493_v21 }
 0x16e   :  { %v615_v29 = vmax.f32 %v523_v23, 0.0  ;;  %v526_v30 = vadd.f32 %v6676_v28, %v8400_v56  ;;  %v517_v31 = vpop.f32.mrb[55].mxu0  ;;  %6986 = vmatmul.mubr.bf16.gmra.mrb[8].mxu1 %v8498_v25  ;;  %6753 = vmatprep.mubr.bf16.mxu0 %v8489_v16 }
 0x16f   :  { %v613_v32 = vmax.f32 %v515_v27, 0.0  ;;  %v518_v34 = vadd.f32 %v8400_v56, %v517_v31  ;;  %7014 = vmatpush3.bf16.msra.mxu1 %v8045_v10  ;;  %v2236_v47 = vld [vmem:[#allocation2 + $0x2a0] sm:$0xff] }
 0x170   :  { %765 = vst [vmem:[#allocation2 + $0x2d1] sm:$0xff] %v615_v29  ;;  %v616_v36 = vmax.f32 %v526_v30, 0.0  ;;  %7015 = vmatprep.subr.bf16.mxu1 %v8047_v26  ;;  %v2234_v42 = vld [vmem:[#allocation2 + $0x288] sm:$0xff]  ;;  %v775_v30 = vld [vmem:[#allocation2] sm:$0xff] }
 0x171   :  { %763 = vst [vmem:[#allocation2 + $0x2b9] sm:$0xff] %v613_v32  ;;  %v614_v39 = vmax.f32 %v518_v34, 0.0  ;;  %v2237_v41 = vld [vmem:[#allocation2 + $0x2a8] sm:$0xff] }
 0x172   :  { %766 = vst [vmem:[#allocation2 + $0x2d9] sm:$0xff] %v616_v36  ;;  %v2235_v43 = vld [vmem:[#allocation2 + $0x290] sm:$0xff]  ;;  %v8508_v44 = vpack.c.bf16 %v616_v36, %v615_v29  ;;  %v8515_v51 = vpack.c.bf16 %v2237_v41, %v2236_v47 }
 0x173   :  { %764 = vst [vmem:[#allocation2 + $0x2c1] sm:$0xff] %v614_v39  ;;  %v6679_v45 = vpop.f32.mrb[56].mxu0  ;;  %v8510_v46 = vpack.c.bf16 %v2235_v43, %v2234_v42  ;;  %v8512_v48 = vpack.c.bf16 %v614_v39, %v613_v32  ;;  %7016 = vmatpush3.bf16.msra.mxu1 %v8047_v26  ;;  %v8543_v39 = vld [vmem:[#allocation2 + $0x8] sm:$0xff] }
 0x174   :  { %v539_v49 = vadd.f32 %v6679_v45, %v8400_v56  ;;  %v530_v50 = vpop.f32.mrb[57].mxu0  ;;  %7017 = vmatprep.subr.bf16.mxu1 %v8050_v38  ;;  %v839_v41 = vpack.c.bf16 %v8543_v39, %v775_v30  ;;  %v2703_v30 = vld [vmem:[#allocation2 + $0x49] sm:$0xff] }
 0x175   :  { %v531_v53 = vadd.f32 %v8400_v56, %v530_v50  ;;  %v6680_v55 = vpop.f32.mrb[58].mxu0  ;;  %6989 = vmatprep.mubr.bf16.mxu1 %v8510_v46  ;;  %6754 = vmatmul.mubr.bf16.gmra.mrb[116].mxu0 %v8512_v48 }
 0x176   :  { %v619_v58 = vmax.f32 %v539_v49, 0.0  ;;  %v542_v60 = vadd.f32 %v6680_v55, %v8400_v56  ;;  %v533_v54 = vpop.f32.mrb[59].mxu0  ;;  %6990 = vmatmul.mubr.bf16.gmra.mrb[12].mxu1 %v8515_v51  ;;  %6757 = vmatprep.mubr.bf16.mxu0 %v8508_v44  ;;  %v778_v49 = vld [vmem:[#allocation2 + $0x20] sm:$0xff] }
 0x177   :  { %v617_v62 = vmax.f32 %v531_v53, 0.0  ;;  %v534_v0 = vadd.f32 %v8400_v56, %v533_v54  ;;  %7018 = vmatpush3.bf16.msra.mxu1 %v8050_v38  ;;  %v2240_v11 = vld [vmem:[#allocation2 + $0x2d0] sm:$0xff]  ;;  %v780_v53 = vld [vmem:[#allocation2 + $0x38] sm:$0xff] }
 0x178   :  { %769 = vst [vmem:[#allocation2 + $0x301] sm:$0xff] %v619_v58  ;;  %v620_v1 = vmax.f32 %v542_v60, 0.0  ;;  %7019 = vmatprep.subr.bf16.mxu1 %v8053_v52  ;;  %v2238_v6 = vld [vmem:[#allocation2 + $0x2b8] sm:$0xff]  ;;  %v2700_v60 = vld [vmem:[#allocation2 + $0x21] sm:$0xff] }
 0x179   :  { %767 = vst [vmem:[#allocation2 + $0x2e9] sm:$0xff] %v617_v62  ;;  %v618_v3 = vmax.f32 %v534_v0, 0.0  ;;  %v2241_v5 = vld [vmem:[#allocation2 + $0x2d8] sm:$0xff] }
 0x17a   :  { %770 = vst [vmem:[#allocation2 + $0x309] sm:$0xff] %v620_v1  ;;  %v2239_v7 = vld [vmem:[#allocation2 + $0x2c0] sm:$0xff]  ;;  %v8526_v8 = vpack.c.bf16 %v620_v1, %v619_v58  ;;  %v8533_v17 = vpack.c.bf16 %v2241_v5, %v2240_v11  ;;  %v779_v1 = vld [vmem:[#allocation2 + $0x30] sm:$0xff] }
 0x17b   :  { %768 = vst [vmem:[#allocation2 + $0x2f1] sm:$0xff] %v618_v3  ;;  %v6683_v9 = vpop.f32.mrb[60].mxu0  ;;  %v8528_v10 = vpack.c.bf16 %v2239_v7, %v2238_v6  ;;  %v8530_v12 = vpack.c.bf16 %v618_v3, %v617_v62  ;;  %7020 = vmatpush3.bf16.msra.mxu1 %v8053_v52  ;;  %v777_v52 = vld [vmem:[#allocation2 + $0x18] sm:$0xff]  ;;  %v841_v6 = vpack.c.bf16 %v780_v53, %v779_v1  ;;  %v8063_v7 = vld [vmem:[#allocation6 + $0x88] sm:$0xff]   ;;  %v782_v11 = vld [vmem:[#allocation2 + $0x50] sm:$0xff] }
 0x17c   :  { %v555_v13 = vadd.f32 %v6683_v9, %v8400_v56  ;;  %v546_v15 = vpop.f32.mrb[61].mxu0  ;;  %7085 = vmatprep.subr.bf16.mxu1 %v8524_v2  ;;  %v840_v0 = vpack.c.bf16 %v778_v49, %v777_v52  ;;  %v2699_v5 = vld [vmem:[#allocation2 + $0x19] sm:$0xff]  ;;  %v2705_v53 = vld [vmem:[#allocation2 + $0x61] sm:$0xff] }
 0x17d   :  { %v547_v20 = vadd.f32 %v8400_v56, %v546_v15  ;;  %v6684_v23 = vpop.f32.mrb[62].mxu0  ;;  %6993 = vmatprep.mubr.bf16.mxu1 %v8528_v10  ;;  %6758 = vmatmul.mubr.bf16.gmra.mrb[120].mxu0 %v8530_v12  ;;  %v2763_v9 = vpack.c.bf16 %v2700_v60, %v2699_v5  ;;  %v2702_v15 = vld [vmem:[#allocation2 + $0x39] sm:$0xff]  ;;  %v790_v5 = vld [vmem:[#allocation2 + $0xb0] sm:$0xff] }
 0x17e   :  { %v623_v24 = vmax.f32 %v555_v13, 0.0  ;;  %v558_v26 = vadd.f32 %v6684_v23, %v8400_v56  ;;  %v549_v27 = vpop.f32.mrb[63].mxu0  ;;  %6994 = vmatmul.mubr.bf16.gmra.mrb[16].mxu1 %v8533_v17  ;;  %6761 = vmatprep.mubr.bf16.mxu0 %v8526_v8  ;;  %v8064_v13 = vld [vmem:[#allocation6 + $0x90] sm:$0xff]   ;;  %v8066_v49 = vld [vmem:[#allocation6 + $0xa0] sm:$0xff]   ;;  %v785_v52 = vld [vmem:[#allocation2 + $0x78] sm:$0xff] }
 0x17f   :  { %v621_v28 = vmax.f32 %v547_v20, 0.0  ;;  %v550_v29 = vadd.f32 %v8400_v56, %v549_v27  ;;  %v2244_v45 = vld [vmem:[#allocation2 + $0x300] sm:$0xff]  ;;  %v784_v20 = vld [vmem:[#allocation2 + $0x68] sm:$0xff]  ;;  %v2704_v23 = vld [vmem:[#allocation2 + $0x51] sm:$0xff] }
 0x180   :  { %773 = vst [vmem:[#allocation2 + $0x331] sm:$0xff] %v623_v24  ;;  %v624_v31 = vmax.f32 %v558_v26, 0.0  ;;  %v2242_v36 = vld [vmem:[#allocation2 + $0x2e8] sm:$0xff]  ;;  %v2701_v26 = vld [vmem:[#allocation2 + $0x31] sm:$0xff] }
 0x181   :  { %771 = vst [vmem:[#allocation2 + $0x319] sm:$0xff] %v621_v28  ;;  %v622_v32 = vmax.f32 %v550_v29, 0.0  ;;  %v2245_v34 = vld [vmem:[#allocation2 + $0x308] sm:$0xff]  ;;  %v2764_v29 = vpack.c.bf16 %v2702_v15, %v2701_v26 }
 0x182   :  { %774 = vst [vmem:[#allocation2 + $0x339] sm:$0xff] %v624_v31  ;;  %v2243_v38 = vld [vmem:[#allocation2 + $0x2f0] sm:$0xff]  ;;  %v8546_v42 = vpack.c.bf16 %v624_v31, %v623_v24  ;;  %v8552_v47 = vpack.c.bf16 %v2245_v34, %v2244_v45  ;;  %v781_v24 = vld [vmem:[#allocation2 + $0x48] sm:$0xff]  ;;  %v2765_v34 = vpack.c.bf16 %v2704_v23, %v2703_v30  ;;  %v788_v45 = vld [vmem:[#allocation2 + $0x98] sm:$0xff] }
 0x183   :  { %772 = vst [vmem:[#allocation2 + $0x321] sm:$0xff] %v622_v32  ;;  %v8548_v43 = vpack.c.bf16 %v2243_v38, %v2242_v36  ;;  %v8550_v56 = vpack.c.bf16 %v622_v32, %v621_v28  ;;  %v842_v27 = vpack.c.bf16 %v782_v11, %v781_v24  ;;  %v783_v28 = vld [vmem:[#allocation2 + $0x60] sm:$0xff]  ;;  %v8056_v32 = vld [vmem:[#allocation6 + $0x148] sm:$0xff]   ;;  %v8065_v36 = vld [vmem:[#allocation6 + $0x98] sm:$0xff]  }
 0x184   :  { %v843_v31 = vpack.c.bf16 %v784_v20, %v783_v28  ;;  %v8057_v38 = vld [vmem:[#allocation6 + $0x150] sm:$0xff]   ;;  %v789_v15 = vld [vmem:[#allocation2 + $0xa8] sm:$0xff]  ;;  %v791_v24 = vld [vmem:[#allocation2 + $0xc0] sm:$0xff] }
 0x185   :  { %6997 = vmatprep.mubr.bf16.mxu1 %v8548_v43  ;;  %6762 = vmatmul.mubr.bf16.gmra.mrb[124].mxu0 %v8550_v56  ;;  %v8069_v11 = vld [vmem:[#allocation6 + $0xb0] sm:$0xff]   ;;  %v846_v23 = vpack.c.bf16 %v790_v5, %v789_v15 }
 0x186   :  { %6998 = vmatmul.mubr.bf16.gmra.mrb[20].mxu1 %v8552_v47  ;;  %6781 = vmatprep.mubr.bf16.mxu0 %v839_v41  ;;  %v2706_v41 = vld [vmem:[#allocation2 + $0x69] sm:$0xff]  ;;  %v2709_v20 = vld [vmem:[#allocation2 + $0x91] sm:$0xff] }
 0x187   :  { %v2248_v62 = vld [vmem:[#allocation2 + $0x330] sm:$0xff]  ;;  %v2766_v60 = vpack.c.bf16 %v2706_v41, %v2705_v53  ;;  %v793_v41 = vld [vmem:[#allocation2 + $0xd8] sm:$0xff] }
 0x188   :  { %v2246_v55 = vld [vmem:[#allocation2 + $0x318] sm:$0xff]  ;;  %v2719_v15 = vld [vmem:[#allocation2 + $0x109] sm:$0xff] }
 0x189   :  { %v2249_v50 = vld [vmem:[#allocation2 + $0x338] sm:$0xff] }
 0x18a   :  { %v2247_v58 = vld [vmem:[#allocation2 + $0x320] sm:$0xff]  ;;  %v2281_v3 = vpack.c.bf16 %v2249_v50, %v2248_v62  ;;  %v2720_v5 = vld [vmem:[#allocation2 + $0x111] sm:$0xff] }
 0x18b   :  { %v8557_v54 = vpack.c.bf16 %v2247_v58, %v2246_v55  ;;  %v2708_v50 = vld [vmem:[#allocation2 + $0x81] sm:$0xff]  ;;  %v787_v58 = vld [vmem:[#allocation2 + $0x90] sm:$0xff]  ;;  %v2707_v62 = vld [vmem:[#allocation2 + $0x79] sm:$0xff] }
 0x18c   :  { %v2767_v1 = vpack.c.bf16 %v2708_v50, %v2707_v62  ;;  %v795_v50 = vld [vmem:[#allocation2 + $0xf0] sm:$0xff]  ;;  %v2715_v53 = vld [vmem:[#allocation2 + $0xd9] sm:$0xff] }
 0x18d   :  { %7001 = vmatprep.mubr.bf16.mxu1 %v8557_v54  ;;  %6782 = vmatmul.mubr.bf16.vlgmr.msra.gmra.mrb[64].mxu0 %v840_v0  ;;  %v845_v0 = vpack.c.bf16 %v788_v45, %v787_v58  ;;  %v2713_v45 = vld [vmem:[#allocation2 + $0xc1] sm:$0xff]  ;;  %v8067_v58 = vld [vmem:[#allocation6 + $0x178] sm:$0xff]  }
 0x18e   :  { %7002 = vmatmul.mubr.bf16.gmra.mrb[24].mxu1 %v2281_v3  ;;  %6785 = vmatprep.mubr.bf16.mxu0 %v841_v6  ;;  %v8068_v3 = vld [vmem:[#allocation6 + $0xa8] sm:$0xff]   ;;  %v8059_v6 = vld [vmem:[#allocation6 + $0x160] sm:$0xff]  }
 0x18f   :  { %7021 = vmatprep.mubr.bf16.mxu1 %v2763_v9  ;;  %6846 = vmatpush3.bf16.msra.mxu0 %v8495_v22  ;;  %v786_v22 = vld [vmem:[#allocation2 + $0x80] sm:$0xff]  ;;  %v792_v9 = vld [vmem:[#allocation2 + $0xc8] sm:$0xff] }
 0x190   :  { %6847 = vmatprep.subr.bf16.mxu0 %v8063_v7  ;;  %v844_v55 = vpack.c.bf16 %v786_v22, %v785_v52  ;;  %v847_v28 = vpack.c.bf16 %v792_v9, %v791_v24  ;;  %v796_v22 = vld [vmem:[#allocation2 + $0xf8] sm:$0xff]  ;;  %v8562_v62 = vld [vmem:[#allocation6 + $0xc0] sm:$0xff]  }
 0x191   :  { %v802_v24 = vld [vmem:[#allocation2 + $0x140] sm:$0xff] }
 0x193   :  { %6848 = vmatpush3.bf16.msra.mxu0 %v8063_v7  ;;  %v2710_v7 = vld [vmem:[#allocation2 + $0x99] sm:$0xff] }
 0x194   :  { %6849 = vmatprep.subr.bf16.mxu0 %v8064_v13  ;;  %v2768_v26 = vpack.c.bf16 %v2710_v7, %v2709_v20  ;;  %v2717_v7 = vld [vmem:[#allocation2 + $0xf1] sm:$0xff] }
 0x195   :  { %6786 = vmatmul.mubr.bf16.gmra.mrb[68].mxu0 %v842_v27  ;;  %v2711_v27 = vld [vmem:[#allocation2 + $0xa9] sm:$0xff] }
 0x196   :  { %7022 = vmatmul.mubr.bf16.vlgmr.msra.gmra.mrb[28].mxu1 %v2764_v29  ;;  %6789 = vmatprep.mubr.bf16.mxu0 %v843_v31  ;;  %v8060_v29 = vld [vmem:[#allocation6 + $0x168] sm:$0xff]   ;;  %v8070_v31 = vld [vmem:[#allocation6 + $0xb8] sm:$0xff]  }
 0x197   :  { %7086 = vmatpush3.bf16.msra.mxu1 %v8524_v2  ;;  %7025 = vmatprep.mubr.bf16.mxu1 %v2765_v34  ;;  %v8058_v2 = vld [vmem:[#allocation6 + $0x158] sm:$0xff]   ;;  %v8062_v34 = vld [vmem:[#allocation6 + $0x170] sm:$0xff]  }
 0x198   :  { %7087 = vmatprep.subr.bf16.mxu1 %v8056_v32  ;;  %6850 = vmatpush3.bf16.msra.mxu0 %v8064_v13  ;;  %v2712_v13 = vld [vmem:[#allocation2 + $0xb1] sm:$0xff] }
 0x199   :  { %6851 = vmatprep.subr.bf16.mxu0 %v8065_v36  ;;  %v2769_v30 = vpack.c.bf16 %v2712_v13, %v2711_v27  ;;  %v804_v27 = vld [vmem:[#allocation2 + $0x158] sm:$0xff] }
 0x19b   :  { %7088 = vmatpush3.bf16.msra.mxu1 %v8056_v32  ;;  %v794_v32 = vld [vmem:[#allocation2 + $0xe0] sm:$0xff] }
 0x19c   :  { %7089 = vmatprep.subr.bf16.mxu1 %v8057_v38  ;;  %6852 = vmatpush3.bf16.msra.mxu0 %v8065_v36  ;;  %v2714_v36 = vld [vmem:[#allocation2 + $0xc9] sm:$0xff] }
 0x19d   :  { %6790 = vmatmul.mubr.bf16.gmra.mrb[72].mxu0 %v844_v55  ;;  %6853 = vmatprep.subr.bf16.mxu0 %v8066_v49  ;;  %v2770_v52 = vpack.c.bf16 %v2714_v36, %v2713_v45  ;;  %v849_v55 = vpack.c.bf16 %v796_v22, %v795_v50  ;;  %v2723_v36 = vld [vmem:[#allocation2 + $0x139] sm:$0xff]  ;;  %v806_v45 = vld [vmem:[#allocation2 + $0x170] sm:$0xff] }
 0x19e   :  { %7026 = vmatmul.mubr.bf16.gmra.mrb[32].mxu1 %v2766_v60  ;;  %6793 = vmatprep.mubr.bf16.mxu0 %v845_v0  ;;  %v798_v0 = vld [vmem:[#allocation2 + $0x110] sm:$0xff] }
 0x19f   :  { %7029 = vmatprep.mubr.bf16.mxu1 %v2767_v1  ;;  %7090 = vmatpush3.bf16.msra.mxu1 %v8057_v38  ;;  %v2716_v38 = vld [vmem:[#allocation2 + $0xe1] sm:$0xff]  ;;  %v2718_v1 = vld [vmem:[#allocation2 + $0xf9] sm:$0xff]  ;;  %v2728_v50 = vld [vmem:[#allocation2 + $0x171] sm:$0xff] }
 0x1a0   :  { %7091 = vmatprep.subr.bf16.mxu1 %v8058_v2  ;;  %6854 = vmatpush3.bf16.msra.mxu0 %v8066_v49  ;;  %v848_v49 = vpack.c.bf16 %v794_v32, %v793_v41  ;;  %v2771_v60 = vpack.c.bf16 %v2716_v38, %v2715_v53  ;;  %v2772_v13 = vpack.c.bf16 %v2718_v1, %v2717_v7  ;;  %v803_v32 = vld [vmem:[#allocation2 + $0x150] sm:$0xff]  ;;  %v809_v7 = vld [vmem:[#allocation2 + $0x1c8] sm:$0xff] }
 0x1a1   :  { %6855 = vmatprep.subr.bf16.mxu0 %v8068_v3  ;;  %v853_v22 = vpack.c.bf16 %v804_v27, %v803_v32  ;;  %v807_v41 = vld [vmem:[#allocation2 + $0x1b0] sm:$0xff] }
 0x1a2   :  { %v855_v53 = vpack.c.bf16 %v8543_v39, %v807_v41  ;;  %v2734_v39 = vld [vmem:[#allocation2 + $0x1e9] sm:$0xff] }
 0x1a3   :  { %7092 = vmatpush3.bf16.msra.mxu1 %v8058_v2  ;;  %v8565_v2 = vld [vmem:[#allocation6 + $0x180] sm:$0xff]  }
 0x1a4   :  { %7093 = vmatprep.subr.bf16.mxu1 %v8059_v6  ;;  %6856 = vmatpush3.bf16.msra.mxu0 %v8068_v3  ;;  %v800_v3 = vld [vmem:[#allocation2 + $0x128] sm:$0xff] }
 0x1a5   :  { %6794 = vmatmul.mubr.bf16.gmra.mrb[76].mxu0 %v846_v23  ;;  %6857 = vmatprep.subr.bf16.mxu0 %v8069_v11  ;;  %v2773_v23 = vpack.c.bf16 %v2720_v5, %v2719_v15  ;;  %v2730_v5 = vld [vmem:[#allocation2 + $0x189] sm:$0xff] }
 0x1a6   :  { %7030 = vmatmul.mubr.bf16.gmra.mrb[36].mxu1 %v2768_v26  ;;  %6797 = vmatprep.mubr.bf16.mxu0 %v847_v28  ;;  %v2722_v26 = vld [vmem:[#allocation2 + $0x129] sm:$0xff]  ;;  %v2724_v28 = vld [vmem:[#allocation2 + $0x141] sm:$0xff] }
 0x1a7   :  { %7033 = vmatprep.mubr.bf16.mxu1 %v2769_v30  ;;  %7094 = vmatpush3.bf16.msra.mxu1 %v8059_v6  ;;  %v797_v6 = vld [vmem:[#allocation2 + $0x108] sm:$0xff]  ;;  %v2775_v38 = vpack.c.bf16 %v2724_v28, %v2723_v36  ;;  %v8075_v28 = vld [vmem:[#allocation6 + $0x1a0] sm:$0xff]  }
 0x1a8   :  { %7095 = vmatprep.subr.bf16.mxu1 %v8060_v29  ;;  %6858 = vmatpush3.bf16.msra.mxu0 %v8069_v11  ;;  %v850_v9 = vpack.c.bf16 %v798_v0, %v797_v6  ;;  %v799_v11 = vld [vmem:[#allocation2 + $0x120] sm:$0xff]  ;;  %v2727_v0 = vld [vmem:[#allocation2 + $0x169] sm:$0xff] }
 0x1a9   :  { %6859 = vmatprep.subr.bf16.mxu0 %v8070_v31  ;;  %v851_v20 = vpack.c.bf16 %v800_v3, %v799_v11  ;;  %v2721_v30 = vld [vmem:[#allocation2 + $0x121] sm:$0xff]  ;;  %v2777_v1 = vpack.c.bf16 %v2728_v50, %v2727_v0  ;;  %v810_v3 = vld [vmem:[#allocation2 + $0x1d0] sm:$0xff] }
 0x1aa   :  { %v812_v6 = vld [vmem:[#allocation2 + $0x1e8] sm:$0xff]  ;;  %v856_v11 = vpack.c.bf16 %v810_v3, %v809_v7  ;;  %v1694_v50 = vld [vmem:[#allocation2 + $0xfa] sm:$0xff]  ;;  %v3233_v0 = vld [vmem:[#allocation2 + $0x112] sm:$0xff] }
 0x1ab   :  { %7096 = vmatpush3.bf16.msra.mxu1 %v8060_v29  ;;  %v801_v29 = vld [vmem:[#allocation2 + $0x138] sm:$0xff]  ;;  %v8076_v36 = vld [vmem:[#allocation6 + $0x1a8] sm:$0xff]  }
 0x1ac   :  { %7097 = vmatprep.subr.bf16.mxu1 %v8062_v34  ;;  %6860 = vmatpush3.bf16.msra.mxu0 %v8070_v31  ;;  %v852_v31 = vpack.c.bf16 %v802_v24, %v801_v29  ;;  %v1689_v29 = vld [vmem:[#allocation2 + $0xc2] sm:$0xff] }
 0x1ad   :  { %6798 = vmatmul.mubr.bf16.gmra.mrb[80].mxu0 %v848_v49  ;;  %6925 = vmatprep.subr.bf16.mxu0 %v8562_v62  ;;  %v2726_v49 = vld [vmem:[#allocation2 + $0x159] sm:$0xff]  ;;  %v3229_v41 = vld [vmem:[#allocation2 + $0xe2] sm:$0xff] }
 0x1ae   :  { %7034 = vmatmul.mubr.bf16.gmra.mrb[40].mxu1 %v2770_v52  ;;  %6801 = vmatprep.mubr.bf16.mxu0 %v849_v55  ;;  %v805_v52 = vld [vmem:[#allocation2 + $0x168] sm:$0xff]  ;;  %v2725_v55 = vld [vmem:[#allocation2 + $0x151] sm:$0xff] }
 0x1af   :  { %7037 = vmatprep.mubr.bf16.mxu1 %v2771_v60  ;;  %7098 = vmatpush3.bf16.msra.mxu1 %v8062_v34  ;;  %v2774_v34 = vpack.c.bf16 %v2722_v26, %v2721_v30  ;;  %v2776_v60 = vpack.c.bf16 %v2726_v49, %v2725_v55  ;;  %v2737_v26 = vld [vmem:[#allocation2 + $0x211] sm:$0xff]  ;;  %v1697_v3 = vld [vmem:[#allocation2 + $0x122] sm:$0xff] }
 0x1b0   :  { %7099 = vmatprep.subr.bf16.mxu1 %v8067_v58  ;;  %v2782_v27 = vpack.c.bf16 %v8445_v14, %v2737_v26  ;;  %v1674_v14 = vld [vmem:[#allocation2 + $0xa] sm:$0xff]  ;;  %v1693_v49 = vld [vmem:[#allocation2 + $0xf2] sm:$0xff] }
 0x1b1   :  { %v1690_v30 = vld [vmem:[#allocation2 + $0xca] sm:$0xff]  ;;  %v1747_v55 = vpack.c.bf16 %v1694_v50, %v1693_v49  ;;  %v3269_v50 = vld [vmem:[#allocation2 + $0x2f2] sm:$0xff] }
 0x1b2   :  { %v3240_v26 = vld [vmem:[#allocation2 + $0x16a] sm:$0xff] }
 0x1b3   :  { %7100 = vmatpush3.bf16.msra.mxu1 %v8067_v58  ;;  %v854_v58 = vpack.c.bf16 %v806_v45, %v805_v52  ;;  %v8077_v45 = vld [vmem:[#allocation6 + $0x1b0] sm:$0xff]   ;;  %v8111_v52 = vld [vmem:[#allocation6 + $0xf8] sm:$0xff]  }
 0x1b4   :  { %7165 = vmatprep.subr.bf16.mxu1 %v8565_v2  ;;  %v3268_v49 = vld [vmem:[#allocation2 + $0x2ea] sm:$0xff] }
 0x1b5   :  { %6802 = vmatmul.mubr.bf16.gmra.mrb[84].mxu0 %v850_v9  ;;  %v2729_v9 = vld [vmem:[#allocation2 + $0x181] sm:$0xff] }
 0x1b6   :  { %7038 = vmatmul.mubr.bf16.gmra.mrb[44].mxu1 %v2772_v13  ;;  %6805 = vmatprep.mubr.bf16.mxu0 %v851_v20  ;;  %v811_v13 = vld [vmem:[#allocation2 + $0x1e0] sm:$0xff]  ;;  %v2778_v15 = vpack.c.bf16 %v2730_v5, %v2729_v9  ;;  %v1698_v5 = vld [vmem:[#allocation2 + $0x12a] sm:$0xff] }
 0x1b7   :  { %7041 = vmatprep.mubr.bf16.mxu1 %v2773_v23  ;;  %v857_v20 = vpack.c.bf16 %v812_v6, %v811_v13  ;;  %v2733_v23 = vld [vmem:[#allocation2 + $0x1e1] sm:$0xff]  ;;  %v1749_v7 = vpack.c.bf16 %v1698_v5, %v1697_v3  ;;  %v1701_v13 = vld [vmem:[#allocation2 + $0x152] sm:$0xff] }
 0x1b8   :  { %v2780_v24 = vpack.c.bf16 %v2734_v39, %v2733_v23  ;;  %v3236_v9 = vld [vmem:[#allocation2 + $0x13a] sm:$0xff]  ;;  %v1705_v23 = vld [vmem:[#allocation2 + $0x1b2] sm:$0xff] }
 0x1b9   :  { %v2187_v3 = vld [vmem:[#allocation2 + $0x20] sm:$0xff] }
 0x1bd   :  { %6806 = vmatmul.mubr.bf16.gmra.mrb[88].mxu0 %v852_v31  ;;  %v8109_v31 = vld [vmem:[#allocation6 + $0xe8] sm:$0xff]  }
 0x1be   :  { %7042 = vmatmul.mubr.bf16.gmra.mrb[48].mxu1 %v2774_v34  ;;  %6809 = vmatprep.mubr.bf16.mxu0 %v853_v22  ;;  %v1745_v34 = vpack.c.bf16 %v1690_v30, %v1689_v29  ;;  %v8110_v22 = vld [vmem:[#allocation6 + $0xf0] sm:$0xff]   ;;  %v1725_v29 = vld [vmem:[#allocation2 + $0x2a2] sm:$0xff] }
 0x1bf   :  { %7045 = vmatprep.mubr.bf16.mxu1 %v2775_v38  ;;  %v3228_v38 = vld [vmem:[#allocation2 + $0xda] sm:$0xff]  ;;  %v1726_v30 = vld [vmem:[#allocation2 + $0x2aa] sm:$0xff] }
 0x1c5   :  { %6810 = vmatmul.mubr.bf16.gmra.mrb[92].mxu0 %v854_v58  ;;  %v8078_v58 = vld [vmem:[#allocation6 + $0x1b8] sm:$0xff]  }
 0x1c6   :  { %7046 = vmatmul.mubr.bf16.gmra.mrb[52].mxu1 %v2776_v60  ;;  %6813 = vmatprep.mubr.bf16.mxu0 %v855_v53  ;;  %v3284_v53 = vpack.c.bf16 %v3229_v41, %v3228_v38  ;;  %v3232_v60 = vld [vmem:[#allocation2 + $0x10a] sm:$0xff]  ;;  %v1730_v38 = vld [vmem:[#allocation2 + $0x2da] sm:$0xff] }
 0x1c7   :  { %7049 = vmatprep.mubr.bf16.mxu1 %v2777_v1  ;;  %v8599_v1 = vld [vmem:[#allocation6 + $0x1c0] sm:$0xff]   ;;  %v3286_v6 = vpack.c.bf16 %v3233_v0, %v3232_v60 }
 0x1c8   :  { %v3272_v60 = vld [vmem:[#allocation2 + $0x31a] sm:$0xff]  ;;  %v3273_v0 = vld [vmem:[#allocation2 + $0x322] sm:$0xff] }
 0x1c9   :  { %v3306_v5 = vpack.c.bf16 %v3273_v0, %v3272_v60  ;;  %v3756_v0 = vld [vmem:[#allocation2 + $0x198] sm:$0xff] }
 0x1cd   :  { %6814 = vmatmul.mubr.bf16.gmra.mrb[96].mxu0 %v856_v11  ;;  %v3237_v11 = vld [vmem:[#allocation2 + $0x142] sm:$0xff] }
 0x1ce   :  { %7050 = vmatmul.mubr.bf16.gmra.mrb[56].mxu1 %v2778_v15  ;;  %6817 = vmatprep.mubr.bf16.mxu0 %v857_v20  ;;  %v1702_v15 = vld [vmem:[#allocation2 + $0x15a] sm:$0xff]  ;;  %v3288_v20 = vpack.c.bf16 %v3237_v11, %v3236_v9  ;;  %v3274_v11 = vld [vmem:[#allocation2 + $0x332] sm:$0xff] }
 0x1cf   :  { %7053 = vmatprep.mubr.bf16.mxu1 %v8438_v4  ;;  %v1673_v4 = vld [vmem:[#allocation2 + $0x2] sm:$0xff]  ;;  %v1751_v39 = vpack.c.bf16 %v1702_v15, %v1701_v13  ;;  %v3727_v9 = vld [vmem:[#allocation2 + $0x38] sm:$0xff]  ;;  %v2191_v15 = vld [vmem:[#allocation2 + $0x50] sm:$0xff] }
 0x1d0   :  { %v3275_v13 = vld [vmem:[#allocation2 + $0x33a] sm:$0xff] }
 0x1d5   :  { %6818 = vmatmul.mubr.bf16.gmra.mrb[100].mxu0 %v8458_v35  ;;  %v3213_v35 = vld [vmem:[#allocation2 + $0x22] sm:$0xff] }
 0x1d6   :  { %7054 = vmatmul.mubr.bf16.gmra.mrb[60].mxu1 %v2780_v24  ;;  %6821 = vmatprep.mubr.bf16.mxu0 %v8463_v40  ;;  %v1678_v40 = vld [vmem:[#allocation2 + $0x3a] sm:$0xff] }
 0x1d7   :  { %7057 = vmatprep.mubr.bf16.mxu1 %v8449_v18  ;;  %v1737_v18 = vpack.c.bf16 %v1674_v14, %v1673_v4  ;;  %v1706_v24 = vld [vmem:[#allocation2 + $0x1ba] sm:$0xff] }
 0x1d8   :  { %v1753_v4 = vpack.c.bf16 %v1706_v24, %v1705_v23  ;;  %v2190_v23 = vld [vmem:[#allocation2 + $0x48] sm:$0xff]  ;;  %v3307_v24 = vpack.c.bf16 %v3275_v13, %v3274_v11  ;;  %v3761_v11 = vld [vmem:[#allocation2 + $0x200] sm:$0xff]  ;;  %v3763_v13 = vld [vmem:[#allocation2 + $0x218] sm:$0xff] }
 0x1dd   :  { %6822 = vmatmul.mubr.bf16.gmra.mrb[104].mxu0 %v8475_v59 }
 0x1de   :  { %7058 = vmatmul.mubr.bf16.gmra.mrb[0].mxu1 %v2782_v27  ;;  %6825 = vmatprep.mubr.bf16.mxu0 %v8480_v63  ;;  %v3217_v63 = vld [vmem:[#allocation2 + $0x52] sm:$0xff] }
 0x1df   :  { %7061 = vmatprep.mubr.bf16.mxu1 %v8460_v37  ;;  %v1677_v37 = vld [vmem:[#allocation2 + $0x32] sm:$0xff] }
 0x1e0   :  { %v1739_v59 = vpack.c.bf16 %v1678_v40, %v1677_v37  ;;  %v3241_v27 = vld [vmem:[#allocation2 + $0x172] sm:$0xff]  ;;  %v3243_v37 = vld [vmem:[#allocation2 + $0x18a] sm:$0xff]  ;;  %v1709_v40 = vld [vmem:[#allocation2 + $0x1e2] sm:$0xff] }
 0x1e1   :  { %v3290_v14 = vpack.c.bf16 %v3241_v27, %v3240_v26  ;;  %v2252_v26 = vpack.c.bf16 %v2191_v15, %v2190_v23  ;;  %v3731_v27 = vld [vmem:[#allocation2 + $0x68] sm:$0xff]  ;;  %v3760_v15 = vld [vmem:[#allocation2 + $0x1f8] sm:$0xff] }
 0x1e5   :  { %6826 = vmatmul.mubr.bf16.gmra.mrb[108].mxu0 %v8491_v19  ;;  %v1681_v19 = vld [vmem:[#allocation2 + $0x62] sm:$0xff] }
 0x1e6   :  { %7062 = vmatmul.mubr.bf16.gmra.mrb[4].mxu1 %v8456_v33  ;;  %6829 = vmatprep.mubr.bf16.mxu0 %v8498_v25  ;;  %v3212_v33 = vld [vmem:[#allocation2 + $0x1a] sm:$0xff] }
 0x1e7   :  { %7065 = vmatprep.mubr.bf16.mxu1 %v8477_v61  ;;  %v3216_v61 = vld [vmem:[#allocation2 + $0x4a] sm:$0xff] }
 0x1e8   :  { %v3278_v25 = vpack.c.bf16 %v3217_v63, %v3216_v61 }
 0x1ed   :  { %6830 = vmatmul.mubr.bf16.gmra.mrb[112].mxu0 %v8510_v46  ;;  %v8072_v46 = vld [vmem:[#allocation6 + $0x188] sm:$0xff]  }
 0x1ee   :  { %7066 = vmatmul.mubr.bf16.gmra.mrb[8].mxu1 %v8473_v57  ;;  %6833 = vmatprep.mubr.bf16.mxu0 %v8515_v51  ;;  %v3276_v57 = vpack.c.bf16 %v3213_v35, %v3212_v33  ;;  %v3220_v51 = vld [vmem:[#allocation2 + $0x7a] sm:$0xff]  ;;  %v3244_v33 = vld [vmem:[#allocation2 + $0x1ca] sm:$0xff]  ;;  %v3245_v35 = vld [vmem:[#allocation2 + $0x1d2] sm:$0xff] }
 0x1ef   :  { %7069 = vmatprep.mubr.bf16.mxu1 %v8493_v21  ;;  %v1682_v21 = vld [vmem:[#allocation2 + $0x6a] sm:$0xff] }
 0x1f5   :  { %6834 = vmatmul.mubr.bf16.gmra.mrb[116].mxu0 %v8528_v10  ;;  %v8073_v10 = vld [vmem:[#allocation6 + $0x190] sm:$0xff]  }
 0x1f6   :  { %7070 = vmatmul.mubr.bf16.gmra.mrb[12].mxu1 %v8489_v16  ;;  %6837 = vmatprep.mubr.bf16.mxu0 %v8533_v17  ;;  %v8105_v16 = vld [vmem:[#allocation6 + $0xc8] sm:$0xff]   ;;  %v1686_v17 = vld [vmem:[#allocation2 + $0x9a] sm:$0xff] }
 0x1f7   :  { %7073 = vmatprep.mubr.bf16.mxu1 %v8512_v48  ;;  %v8106_v48 = vld [vmem:[#allocation6 + $0xd0] sm:$0xff]  }
 0x1fd   :  { %6838 = vmatmul.mubr.bf16.gmra.mrb[120].mxu0 %v8548_v43 }
 0x1fe   :  { %7074 = vmatmul.mubr.bf16.gmra.mrb[16].mxu1 %v8508_v44  ;;  %6841 = vmatprep.mubr.bf16.mxu0 %v8552_v47  ;;  %v1741_v44 = vpack.c.bf16 %v1682_v21, %v1681_v19  ;;  %v8074_v47 = vld [vmem:[#allocation6 + $0x198] sm:$0xff]   ;;  %v3249_v19 = vld [vmem:[#allocation2 + $0x202] sm:$0xff] }
 0x1ff   :  { %7077 = vmatprep.mubr.bf16.mxu1 %v8530_v12  ;;  %v1685_v12 = vld [vmem:[#allocation2 + $0x92] sm:$0xff] }
 0x200   :  { %v1713_v21 = vld [vmem:[#allocation2 + $0x212] sm:$0xff] }
 0x205   :  { %6842 = vmatmul.mubr.bf16.gmra.mrb[124].mxu0 %v8557_v54  ;;  %v8108_v54 = vld [vmem:[#allocation6 + $0xe0] sm:$0xff]  }
 0x206   :  { %7078 = vmatmul.mubr.bf16.gmra.mrb[20].mxu1 %v8526_v8  ;;  %6861 = vmatprep.mubr.bf16.mxu0 %v1737_v18  ;;  %v3221_v8 = vld [vmem:[#allocation2 + $0x82] sm:$0xff] }
 0x207   :  { %7081 = vmatprep.mubr.bf16.mxu1 %v8550_v56  ;;  %v3280_v43 = vpack.c.bf16 %v3221_v8, %v3220_v51  ;;  %v1743_v56 = vpack.c.bf16 %v1686_v17, %v1685_v12  ;;  %v3242_v18 = vld [vmem:[#allocation2 + $0x182] sm:$0xff]  ;;  %v3253_v51 = vld [vmem:[#allocation2 + $0x232] sm:$0xff] }
 0x208   :  { %v3291_v61 = vpack.c.bf16 %v3243_v37, %v3242_v18  ;;  %v1717_v8 = vld [vmem:[#allocation2 + $0x242] sm:$0xff] }
 0x209   :  { %v8080_v37 = vld [vmem:[#allocation6 + $0x1c8] sm:$0xff]  }
 0x20d   :  { %6862 = vmatmul.mubr.bf16.vlgmr.msra.gmra.mrb[64].mxu0 %v3276_v57 }
 0x20e   :  { %7082 = vmatmul.mubr.bf16.gmra.mrb[24].mxu1 %v8546_v42  ;;  %6865 = vmatprep.mubr.bf16.mxu0 %v1739_v59  ;;  %v8107_v42 = vld [vmem:[#allocation6 + $0xd8] sm:$0xff]  }
 0x20f   :  { %7101 = vmatprep.mubr.bf16.mxu1 %v3276_v57  ;;  %6926 = vmatpush3.bf16.msra.mxu0 %v8562_v62  ;;  %v3224_v62 = vld [vmem:[#allocation2 + $0xaa] sm:$0xff] }
 0x210   :  { %6927 = vmatprep.subr.bf16.mxu0 %v8105_v16  ;;  %v1710_v57 = vld [vmem:[#allocation2 + $0x1ea] sm:$0xff] }
 0x211   :  { %v1755_v63 = vpack.c.bf16 %v1710_v57, %v1709_v40  ;;  %v3735_v40 = vld [vmem:[#allocation2 + $0x98] sm:$0xff]  ;;  %v8081_v57 = vld [vmem:[#allocation6 + $0x1d0] sm:$0xff]  }
 0x213   :  { %6928 = vmatpush3.bf16.msra.mxu0 %v8105_v16  ;;  %v3248_v16 = vld [vmem:[#allocation2 + $0x1fa] sm:$0xff] }
 0x214   :  { %6929 = vmatprep.subr.bf16.mxu0 %v8106_v48 }
 0x215   :  { %6866 = vmatmul.mubr.bf16.gmra.mrb[68].mxu0 %v3278_v25 }
 0x216   :  { %7102 = vmatmul.mubr.bf16.vlgmr.msra.gmra.mrb[28].mxu1 %v1739_v59  ;;  %6869 = vmatprep.mubr.bf16.mxu0 %v1741_v44  ;;  %v3292_v59 = vpack.c.bf16 %v3245_v35, %v3244_v33  ;;  %v2194_v33 = vld [vmem:[#allocation2 + $0x78] sm:$0xff] }
 0x217   :  { %7166 = vmatpush3.bf16.msra.mxu1 %v8565_v2  ;;  %7105 = vmatprep.mubr.bf16.mxu1 %v3278_v25  ;;  %v3225_v2 = vld [vmem:[#allocation2 + $0xb2] sm:$0xff]  ;;  %v1714_v25 = vld [vmem:[#allocation2 + $0x21a] sm:$0xff] }
 0x218   :  { %7167 = vmatprep.subr.bf16.mxu1 %v8072_v46  ;;  %6930 = vmatpush3.bf16.msra.mxu0 %v8106_v48  ;;  %v3282_v32 = vpack.c.bf16 %v3225_v2, %v3224_v62  ;;  %v3252_v48 = vld [vmem:[#allocation2 + $0x22a] sm:$0xff] }
 0x219   :  { %6931 = vmatprep.subr.bf16.mxu0 %v8107_v42  ;;  %v3296_v12 = vpack.c.bf16 %v3253_v51, %v3252_v48  ;;  %v3260_v2 = vld [vmem:[#allocation2 + $0x28a] sm:$0xff]  ;;  %v2202_v51 = vld [vmem:[#allocation2 + $0xd8] sm:$0xff] }
 0x21b   :  { %7168 = vmatpush3.bf16.msra.mxu1 %v8072_v46  ;;  %v1757_v46 = vpack.c.bf16 %v1714_v25, %v1713_v21  ;;  %v8082_v21 = vld [vmem:[#allocation6 + $0x1d8] sm:$0xff]   ;;  %v3739_v25 = vld [vmem:[#allocation2 + $0xc8] sm:$0xff] }
 0x21c   :  { %7169 = vmatprep.subr.bf16.mxu1 %v8073_v10  ;;  %6932 = vmatpush3.bf16.msra.mxu0 %v8107_v42  ;;  %v3256_v42 = vld [vmem:[#allocation2 + $0x25a] sm:$0xff] }
 0x21d   :  { %6870 = vmatmul.mubr.bf16.gmra.mrb[72].mxu0 %v3280_v43  ;;  %6933 = vmatprep.subr.bf16.mxu0 %v8108_v54 }
 0x21e   :  { %7106 = vmatmul.mubr.bf16.gmra.mrb[32].mxu1 %v1741_v44  ;;  %6873 = vmatprep.mubr.bf16.mxu0 %v1743_v56  ;;  %v3294_v44 = vpack.c.bf16 %v3249_v19, %v3248_v16  ;;  %v2198_v16 = vld [vmem:[#allocation2 + $0xa8] sm:$0xff] }
 0x21f   :  { %7109 = vmatprep.mubr.bf16.mxu1 %v3280_v43  ;;  %7170 = vmatpush3.bf16.msra.mxu1 %v8073_v10  ;;  %v1718_v10 = vld [vmem:[#allocation2 + $0x24a] sm:$0xff]  ;;  %v3257_v43 = vld [vmem:[#allocation2 + $0x262] sm:$0xff] }
 0x220   :  { %7171 = vmatprep.subr.bf16.mxu1 %v8074_v47  ;;  %6934 = vmatpush3.bf16.msra.mxu0 %v8108_v54  ;;  %v1759_v17 = vpack.c.bf16 %v1718_v10, %v1717_v8  ;;  %v3298_v54 = vpack.c.bf16 %v3257_v43, %v3256_v42  ;;  %v8084_v10 = vld [vmem:[#allocation6 + $0x1e8] sm:$0xff]   ;;  %v2207_v42 = vld [vmem:[#allocation2 + $0x110] sm:$0xff] }
 0x221   :  { %6935 = vmatprep.subr.bf16.mxu0 %v8109_v31  ;;  %v3742_v43 = vld [vmem:[#allocation2 + $0xf0] sm:$0xff] }
 0x223   :  { %7172 = vmatpush3.bf16.msra.mxu1 %v8074_v47  ;;  %v1722_v47 = vld [vmem:[#allocation2 + $0x27a] sm:$0xff] }
 0x224   :  { %7173 = vmatprep.subr.bf16.mxu1 %v8075_v28  ;;  %6936 = vmatpush3.bf16.msra.mxu0 %v8109_v31 }
 0x225   :  { %6874 = vmatmul.mubr.bf16.gmra.mrb[76].mxu0 %v3282_v32  ;;  %6937 = vmatprep.subr.bf16.mxu0 %v8110_v22 }
 0x226   :  { %7110 = vmatmul.mubr.bf16.gmra.mrb[36].mxu1 %v1743_v56  ;;  %6877 = vmatprep.mubr.bf16.mxu0 %v1745_v34  ;;  %v1721_v56 = vld [vmem:[#allocation2 + $0x272] sm:$0xff] }
 0x227   :  { %7113 = vmatprep.mubr.bf16.mxu1 %v3282_v32  ;;  %7174 = vmatpush3.bf16.msra.mxu1 %v8075_v28  ;;  %v1761_v62 = vpack.c.bf16 %v1722_v47, %v1721_v56  ;;  %v3261_v28 = vld [vmem:[#allocation2 + $0x292] sm:$0xff]  ;;  %v1763_v32 = vpack.c.bf16 %v1726_v30, %v1725_v29  ;;  %v2206_v47 = vld [vmem:[#allocation2 + $0x108] sm:$0xff]  ;;  %v2211_v29 = vld [vmem:[#allocation2 + $0x140] sm:$0xff] }
 0x228   :  { %7175 = vmatprep.subr.bf16.mxu1 %v8076_v36  ;;  %6938 = vmatpush3.bf16.msra.mxu0 %v8110_v22  ;;  %v3300_v31 = vpack.c.bf16 %v3261_v28, %v3260_v2  ;;  %v1729_v22 = vld [vmem:[#allocation2 + $0x2d2] sm:$0xff]  ;;  %v3747_v2 = vld [vmem:[#allocation2 + $0x128] sm:$0xff]  ;;  %v8603_v28 = vld [vmem:[#allocation6 + $0x200] sm:$0xff]  }
 0x229   :  { %6939 = vmatprep.subr.bf16.mxu0 %v8111_v52  ;;  %v3746_v30 = vld [vmem:[#allocation2 + $0x120] sm:$0xff] }
 0x22b   :  { %7176 = vmatpush3.bf16.msra.mxu1 %v8076_v36  ;;  %v3265_v36 = vld [vmem:[#allocation2 + $0x2c2] sm:$0xff] }
 0x22c   :  { %7177 = vmatprep.subr.bf16.mxu1 %v8077_v45  ;;  %6940 = vmatpush3.bf16.msra.mxu0 %v8111_v52  ;;  %v1733_v52 = vld [vmem:[#allocation2 + $0x302] sm:$0xff] }
 0x22d   :  { %6878 = vmatmul.mubr.bf16.gmra.mrb[80].mxu0 %v3284_v53 }
 0x22e   :  { %7114 = vmatmul.mubr.bf16.gmra.mrb[40].mxu1 %v1745_v34  ;;  %6881 = vmatprep.mubr.bf16.mxu0 %v1747_v55  ;;  %v3264_v34 = vld [vmem:[#allocation2 + $0x2ba] sm:$0xff] }
 0x22f   :  { %7117 = vmatprep.mubr.bf16.mxu1 %v3284_v53  ;;  %7178 = vmatpush3.bf16.msra.mxu1 %v8077_v45  ;;  %v3302_v41 = vpack.c.bf16 %v3265_v36, %v3264_v34  ;;  %v1765_v45 = vpack.c.bf16 %v1730_v38, %v1729_v22  ;;  %v1734_v53 = vld [vmem:[#allocation2 + $0x30a] sm:$0xff]  ;;  %v3751_v36 = vld [vmem:[#allocation2 + $0x158] sm:$0xff] }
 0x230   :  { %7179 = vmatprep.subr.bf16.mxu1 %v8078_v58  ;;  %v2215_v22 = vld [vmem:[#allocation2 + $0x170] sm:$0xff] }
 0x231   :  { %v3750_v38 = vld [vmem:[#allocation2 + $0x150] sm:$0xff] }
 0x233   :  { %7180 = vmatpush3.bf16.msra.mxu1 %v8078_v58  ;;  %v1767_v58 = vpack.c.bf16 %v1734_v53, %v1733_v52  ;;  %v2219_v52 = vld [vmem:[#allocation2 + $0x1d0] sm:$0xff]  ;;  %v3754_v53 = vld [vmem:[#allocation2 + $0x180] sm:$0xff] }
 0x234   :  { %7245 = vmatprep.subr.bf16.mxu1 %v8599_v1 }
 0x235   :  { %6882 = vmatmul.mubr.bf16.gmra.mrb[84].mxu0 %v3286_v6 }
 0x236   :  { %7118 = vmatmul.mubr.bf16.gmra.mrb[44].mxu1 %v1747_v55  ;;  %6885 = vmatprep.mubr.bf16.mxu0 %v1749_v7  ;;  %v3304_v55 = vpack.c.bf16 %v3269_v50, %v3268_v49  ;;  %v3755_v50 = vld [vmem:[#allocation2 + $0x188] sm:$0xff] }
 0x237   :  { %7121 = vmatprep.mubr.bf16.mxu1 %v3286_v6  ;;  %v2186_v6 = vld [vmem:[#allocation2 + $0x18] sm:$0xff] }
 0x23d   :  { %6886 = vmatmul.mubr.bf16.gmra.mrb[88].mxu0 %v3288_v20 }
 0x23e   :  { %7122 = vmatmul.mubr.bf16.gmra.mrb[48].mxu1 %v1749_v7  ;;  %6889 = vmatprep.mubr.bf16.mxu0 %v1751_v39  ;;  %v2250_v7 = vpack.c.bf16 %v2187_v3, %v2186_v6  ;;  %v3759_v3 = vld [vmem:[#allocation2 + $0x1e8] sm:$0xff] }
 0x23f   :  { %7125 = vmatprep.mubr.bf16.mxu1 %v3288_v20  ;;  %v3726_v20 = vld [vmem:[#allocation2 + $0x30] sm:$0xff] }
 0x245   :  { %6890 = vmatmul.mubr.bf16.gmra.mrb[92].mxu0 %v3290_v14 }
 0x246   :  { %7126 = vmatmul.mubr.bf16.gmra.mrb[52].mxu1 %v1751_v39  ;;  %6893 = vmatprep.mubr.bf16.mxu0 %v1753_v4  ;;  %v3790_v39 = vpack.c.bf16 %v3727_v9, %v3726_v20  ;;  %v2195_v4 = vld [vmem:[#allocation2 + $0x80] sm:$0xff]  ;;  %v3807_v20 = vpack.c.bf16 %v3761_v11, %v3760_v15  ;;  %v4250_v11 = vld [vmem:[#allocation2 + $0xb1] sm:$0xff] }
 0x247   :  { %7129 = vmatprep.mubr.bf16.mxu1 %v3290_v14  ;;  %v3730_v14 = vld [vmem:[#allocation2 + $0x60] sm:$0xff]  ;;  %v2254_v35 = vpack.c.bf16 %v2195_v4, %v2194_v33 }
 0x248   :  { %v3792_v18 = vpack.c.bf16 %v3731_v27, %v3730_v14  ;;  %v3764_v27 = vld [vmem:[#allocation2 + $0x228] sm:$0xff]  ;;  %v3766_v14 = vld [vmem:[#allocation2 + $0x240] sm:$0xff] }
 0x249   :  { %v3769_v33 = vld [vmem:[#allocation2 + $0x260] sm:$0xff] }
 0x24d   :  { %6894 = vmatmul.mubr.bf16.gmra.mrb[96].mxu0 %v3292_v59 }
 0x24e   :  { %7130 = vmatmul.mubr.bf16.gmra.mrb[56].mxu1 %v3291_v61  ;;  %6897 = vmatprep.mubr.bf16.mxu0 %v1755_v63  ;;  %v3734_v61 = vld [vmem:[#allocation2 + $0x90] sm:$0xff] }
 0x24f   :  { %7133 = vmatprep.mubr.bf16.mxu1 %v3292_v59  ;;  %v2199_v59 = vld [vmem:[#allocation2 + $0xb0] sm:$0xff] }
 0x250   :  { %v2256_v19 = vpack.c.bf16 %v2199_v59, %v2198_v16  ;;  %v3772_v16 = vld [vmem:[#allocation2 + $0x288] sm:$0xff] }
 0x255   :  { %6898 = vmatmul.mubr.bf16.gmra.mrb[100].mxu0 %v3294_v44 }
 0x256   :  { %7134 = vmatmul.mubr.bf16.gmra.mrb[60].mxu1 %v1755_v63  ;;  %6901 = vmatprep.mubr.bf16.mxu0 %v1757_v46  ;;  %v3794_v63 = vpack.c.bf16 %v3735_v40, %v3734_v61  ;;  %v3773_v61 = vld [vmem:[#allocation2 + $0x290] sm:$0xff] }
 0x257   :  { %7137 = vmatprep.mubr.bf16.mxu1 %v3294_v44  ;;  %v2203_v44 = vld [vmem:[#allocation2 + $0xe0] sm:$0xff] }
 0x258   :  { %v2258_v8 = vpack.c.bf16 %v2203_v44, %v2202_v51  ;;  %v3779_v44 = vld [vmem:[#allocation2 + $0x2d8] sm:$0xff]  ;;  %v3778_v51 = vld [vmem:[#allocation2 + $0x2d0] sm:$0xff] }
 0x25d   :  { %6902 = vmatmul.mubr.bf16.gmra.mrb[104].mxu0 %v3296_v12 }
 0x25e   :  { %7138 = vmatmul.mubr.bf16.gmra.mrb[0].mxu1 %v1757_v46  ;;  %6905 = vmatprep.mubr.bf16.mxu0 %v1759_v17  ;;  %v3738_v46 = vld [vmem:[#allocation2 + $0xc0] sm:$0xff] }
 0x25f   :  { %7141 = vmatprep.mubr.bf16.mxu1 %v3296_v12  ;;  %v3796_v48 = vpack.c.bf16 %v3739_v25, %v3738_v46  ;;  %v3743_v12 = vld [vmem:[#allocation2 + $0xf8] sm:$0xff] }
 0x260   :  { %v3798_v56 = vpack.c.bf16 %v3743_v12, %v3742_v43  ;;  %v3776_v46 = vld [vmem:[#allocation2 + $0x2b8] sm:$0xff]  ;;  %v3783_v12 = vld [vmem:[#allocation2 + $0x308] sm:$0xff]  ;;  %v3782_v43 = vld [vmem:[#allocation2 + $0x300] sm:$0xff] }
 0x265   :  { %6906 = vmatmul.mubr.bf16.gmra.mrb[108].mxu0 %v3298_v54 }
 0x266   :  { %7142 = vmatmul.mubr.bf16.gmra.mrb[4].mxu1 %v1759_v17  ;;  %6909 = vmatprep.mubr.bf16.mxu0 %v1761_v62  ;;  %v8085_v17 = vld [vmem:[#allocation6 + $0x1f0] sm:$0xff]  }
 0x267   :  { %7145 = vmatprep.mubr.bf16.mxu1 %v3298_v54  ;;  %v2260_v54 = vpack.c.bf16 %v2207_v42, %v2206_v47  ;;  %v3785_v47 = vld [vmem:[#allocation2 + $0x320] sm:$0xff] }
 0x26d   :  { %6910 = vmatmul.mubr.bf16.gmra.mrb[112].mxu0 %v3300_v31 }
 0x26e   :  { %7146 = vmatmul.mubr.bf16.gmra.mrb[8].mxu1 %v1761_v62  ;;  %6913 = vmatprep.mubr.bf16.mxu0 %v1763_v32  ;;  %v8086_v62 = vld [vmem:[#allocation6 + $0x1f8] sm:$0xff]  }
 0x26f   :  { %7149 = vmatprep.mubr.bf16.mxu1 %v3300_v31  ;;  %v3800_v31 = vpack.c.bf16 %v3747_v2, %v3746_v30 }
 0x275   :  { %6914 = vmatmul.mubr.bf16.gmra.mrb[116].mxu0 %v3302_v41 }
 0x276   :  { %7150 = vmatmul.mubr.bf16.gmra.mrb[12].mxu1 %v1763_v32  ;;  %6917 = vmatprep.mubr.bf16.mxu0 %v1765_v45  ;;  %v2210_v32 = vld [vmem:[#allocation2 + $0x138] sm:$0xff] }
 0x277   :  { %7153 = vmatprep.mubr.bf16.mxu1 %v3302_v41  ;;  %v2262_v34 = vpack.c.bf16 %v2211_v29, %v2210_v32  ;;  %v3802_v41 = vpack.c.bf16 %v3751_v36, %v3750_v38  ;;  %v3786_v29 = vld [vmem:[#allocation2 + $0x330] sm:$0xff] }
 0x278   :  { %v4239_v36 = vld [vmem:[#allocation2 + $0x31] sm:$0xff] }
 0x279   :  { %v4242_v38 = vld [vmem:[#allocation2 + $0x51] sm:$0xff] }
 0x27d   :  { %6918 = vmatmul.mubr.bf16.gmra.mrb[120].mxu0 %v3304_v55 }
 0x27e   :  { %7154 = vmatmul.mubr.bf16.gmra.mrb[16].mxu1 %v1765_v45  ;;  %6921 = vmatprep.mubr.bf16.mxu0 %v1767_v58  ;;  %v2214_v45 = vld [vmem:[#allocation2 + $0x168] sm:$0xff] }
 0x27f   :  { %7157 = vmatprep.mubr.bf16.mxu1 %v3304_v55  ;;  %v2264_v49 = vpack.c.bf16 %v2215_v22, %v2214_v45  ;;  %v3804_v55 = vpack.c.bf16 %v3755_v50, %v3754_v53  ;;  %v4241_v45 = vld [vmem:[#allocation2 + $0x49] sm:$0xff]  ;;  %v4243_v50 = vld [vmem:[#allocation2 + $0x61] sm:$0xff] }
 0x285   :  { %6922 = vmatmul.mubr.bf16.gmra.mrb[124].mxu0 %v3306_v5 }
 0x286   :  { %7158 = vmatmul.mubr.bf16.gmra.mrb[20].mxu1 %v1767_v58  ;;  %6941 = vmatprep.mubr.bf16.mxu0 %v2250_v7  ;;  %v2218_v58 = vld [vmem:[#allocation2 + $0x1c8] sm:$0xff]  ;;  %v3758_v7 = vld [vmem:[#allocation2 + $0x1e0] sm:$0xff] }
 0x287   :  { %7161 = vmatprep.mubr.bf16.mxu1 %v3306_v5  ;;  %v2266_v60 = vpack.c.bf16 %v2219_v52, %v2218_v58  ;;  %v8606_v5 = vld [vmem:[#allocation2 + $0x8] sm:$0xff]  ;;  %v3806_v9 = vpack.c.bf16 %v3759_v3, %v3758_v7 }
 0x288   :  { %v3805_v6 = vpack.c.bf16 %v8606_v5, %v3756_v0  ;;  %v8088_v52 = vld [vmem:[#allocation6 + $0x208] sm:$0xff]   ;;  %v4245_v0 = vld [vmem:[#allocation2 + $0x79] sm:$0xff] }
 0x289   :  { %v4246_v58 = vld [vmem:[#allocation2 + $0x81] sm:$0xff] }
 0x28a   :  { %v4306_v3 = vpack.c.bf16 %v4246_v58, %v4245_v0 }
 0x28d   :  { %6942 = vmatmul.mubr.bf16.vlgmr.msra.gmra.mrb[64].mxu0 %v3790_v39 }
 0x28e   :  { %7162 = vmatmul.mubr.bf16.gmra.mrb[24].mxu1 %v3307_v24  ;;  %6945 = vmatprep.mubr.bf16.mxu0 %v2252_v26  ;;  %v3765_v24 = vld [vmem:[#allocation2 + $0x230] sm:$0xff] }
 0x28f   :  { %7181 = vmatprep.mubr.bf16.mxu1 %v3790_v39  ;;  %v3762_v39 = vld [vmem:[#allocation2 + $0x210] sm:$0xff]  ;;  %v3809_v4 = vpack.c.bf16 %v3765_v24, %v3764_v27  ;;  %v4254_v27 = vld [vmem:[#allocation2 + $0xe1] sm:$0xff] }
 0x290   :  { %v3808_v23 = vpack.c.bf16 %v3763_v13, %v3762_v39  ;;  %v4252_v13 = vld [vmem:[#allocation2 + $0xc9] sm:$0xff] }
 0x291   :  { %v8092_v39 = vld [vmem:[#allocation6 + $0x228] sm:$0xff]  }
 0x295   :  { %6946 = vmatmul.mubr.bf16.gmra.mrb[68].mxu0 %v3792_v18 }
 0x296   :  { %7182 = vmatmul.mubr.bf16.vlgmr.msra.gmra.mrb[28].mxu1 %v2252_v26  ;;  %6949 = vmatprep.mubr.bf16.mxu0 %v2254_v35  ;;  %v3767_v26 = vld [vmem:[#allocation2 + $0x248] sm:$0xff] }
 0x297   :  { %7246 = vmatpush3.bf16.msra.mxu1 %v8599_v1  ;;  %7185 = vmatprep.mubr.bf16.mxu1 %v3792_v18  ;;  %v8083_v1 = vld [vmem:[#allocation6 + $0x1e0] sm:$0xff]   ;;  %v3810_v18 = vpack.c.bf16 %v3767_v26, %v3766_v14  ;;  %v8093_v26 = vld [vmem:[#allocation6 + $0x230] sm:$0xff]  }
 0x298   :  { %7247 = vmatprep.subr.bf16.mxu1 %v8080_v37  ;;  %v4256_v14 = vld [vmem:[#allocation2 + $0xf9] sm:$0xff] }
 0x29b   :  { %7248 = vmatpush3.bf16.msra.mxu1 %v8080_v37  ;;  %v3768_v37 = vld [vmem:[#allocation2 + $0x258] sm:$0xff] }
 0x29c   :  { %7249 = vmatprep.subr.bf16.mxu1 %v8081_v57  ;;  %v3811_v40 = vpack.c.bf16 %v3769_v33, %v3768_v37  ;;  %v4253_v33 = vld [vmem:[#allocation2 + $0xd9] sm:$0xff] }
 0x29d   :  { %6950 = vmatmul.mubr.bf16.gmra.mrb[72].mxu0 %v3794_v63  ;;  %v4310_v37 = vpack.c.bf16 %v4254_v27, %v4253_v33  ;;  %v4280_v27 = vld [vmem:[#allocation2 + $0x249] sm:$0xff] }
 0x29e   :  { %7186 = vmatmul.mubr.bf16.gmra.mrb[32].mxu1 %v2254_v35  ;;  %6953 = vmatprep.mubr.bf16.mxu0 %v2256_v19  ;;  %v3771_v35 = vld [vmem:[#allocation2 + $0x278] sm:$0xff]  ;;  %v4277_v33 = vld [vmem:[#allocation2 + $0x229] sm:$0xff] }
 0x29f   :  { %7189 = vmatprep.mubr.bf16.mxu1 %v3794_v63  ;;  %7250 = vmatpush3.bf16.msra.mxu1 %v8081_v57  ;;  %v3770_v57 = vld [vmem:[#allocation2 + $0x270] sm:$0xff]  ;;  %v3775_v63 = vld [vmem:[#allocation2 + $0x2a8] sm:$0xff] }
 0x2a0   :  { %7251 = vmatprep.subr.bf16.mxu1 %v8082_v21  ;;  %v3812_v59 = vpack.c.bf16 %v3771_v35, %v3770_v57  ;;  %v8094_v57 = vld [vmem:[#allocation6 + $0x238] sm:$0xff]  }
 0x2a3   :  { %7252 = vmatpush3.bf16.msra.mxu1 %v8082_v21  ;;  %v3774_v21 = vld [vmem:[#allocation2 + $0x2a0] sm:$0xff] }
 0x2a4   :  { %7253 = vmatprep.subr.bf16.mxu1 %v8083_v1  ;;  %v3814_v25 = vpack.c.bf16 %v3775_v63, %v3774_v21  ;;  %v4258_v63 = vld [vmem:[#allocation2 + $0x111] sm:$0xff] }
 0x2a5   :  { %6954 = vmatmul.mubr.bf16.gmra.mrb[76].mxu0 %v3796_v48 }
 0x2a6   :  { %7190 = vmatmul.mubr.bf16.gmra.mrb[36].mxu1 %v2256_v19  ;;  %6957 = vmatprep.mubr.bf16.mxu0 %v2258_v8  ;;  %v3813_v19 = vpack.c.bf16 %v3773_v61, %v3772_v16 }
 0x2a7   :  { %7193 = vmatprep.mubr.bf16.mxu1 %v3796_v48  ;;  %7254 = vmatpush3.bf16.msra.mxu1 %v8083_v1  ;;  %v3777_v1 = vld [vmem:[#allocation2 + $0x2c0] sm:$0xff] }
 0x2a8   :  { %7255 = vmatprep.subr.bf16.mxu1 %v8084_v10  ;;  %v3815_v48 = vpack.c.bf16 %v3777_v1, %v3776_v46  ;;  %v4259_v46 = vld [vmem:[#allocation2 + $0x121] sm:$0xff] }
 0x2ab   :  { %7256 = vmatpush3.bf16.msra.mxu1 %v8084_v10  ;;  %v3781_v10 = vld [vmem:[#allocation2 + $0x2f0] sm:$0xff] }
 0x2ac   :  { %7257 = vmatprep.subr.bf16.mxu1 %v8085_v17 }
 0x2ad   :  { %6958 = vmatmul.mubr.bf16.gmra.mrb[80].mxu0 %v3798_v56 }
 0x2ae   :  { %7194 = vmatmul.mubr.bf16.gmra.mrb[40].mxu1 %v2258_v8  ;;  %6961 = vmatprep.mubr.bf16.mxu0 %v2260_v54  ;;  %v3816_v8 = vpack.c.bf16 %v3779_v44, %v3778_v51 }
 0x2af   :  { %7197 = vmatprep.mubr.bf16.mxu1 %v3798_v56  ;;  %7258 = vmatpush3.bf16.msra.mxu1 %v8085_v17  ;;  %v3780_v17 = vld [vmem:[#allocation2 + $0x2e8] sm:$0xff]  ;;  %v3818_v56 = vpack.c.bf16 %v3783_v12, %v3782_v43  ;;  %v4264_v12 = vld [vmem:[#allocation2 + $0x159] sm:$0xff] }
 0x2b0   :  { %7259 = vmatprep.subr.bf16.mxu1 %v8086_v62  ;;  %v3817_v42 = vpack.c.bf16 %v3781_v10, %v3780_v17 }
 0x2b3   :  { %7260 = vmatpush3.bf16.msra.mxu1 %v8086_v62  ;;  %v3784_v62 = vld [vmem:[#allocation2 + $0x318] sm:$0xff] }
 0x2b4   :  { %7325 = vmatprep.subr.bf16.mxu1 %v8603_v28  ;;  %v3819_v2 = vpack.c.bf16 %v3785_v47, %v3784_v62  ;;  %v4263_v47 = vld [vmem:[#allocation2 + $0x151] sm:$0xff] }
 0x2b5   :  { %6962 = vmatmul.mubr.bf16.gmra.mrb[84].mxu0 %v3800_v31 }
 0x2b6   :  { %7198 = vmatmul.mubr.bf16.gmra.mrb[44].mxu1 %v2260_v54  ;;  %6965 = vmatprep.mubr.bf16.mxu0 %v2262_v34  ;;  %v3787_v54 = vld [vmem:[#allocation2 + $0x338] sm:$0xff] }
 0x2b7   :  { %7201 = vmatprep.mubr.bf16.mxu1 %v3800_v31  ;;  %v3820_v30 = vpack.c.bf16 %v3787_v54, %v3786_v29  ;;  %v3788_v31 = vld [vmem:[#allocation2 + $0x348] sm:$0xff]  ;;  %v4315_v54 = vpack.c.bf16 %v4264_v12, %v4263_v47 }
 0x2b8   :  { %v3821_v32 = vpack.c.bf16 %v8606_v5, %v3788_v31  ;;  %v4247_v5 = vld [vmem:[#allocation2 + $0x91] sm:$0xff] }
 0x2bd   :  { %6966 = vmatmul.mubr.bf16.gmra.mrb[88].mxu0 %v3802_v41 }
 0x2be   :  { %7202 = vmatmul.mubr.bf16.gmra.mrb[48].mxu1 %v2262_v34  ;;  %6969 = vmatprep.mubr.bf16.mxu0 %v2264_v49  ;;  %v4240_v34 = vld [vmem:[#allocation2 + $0x39] sm:$0xff] }
 0x2bf   :  { %7205 = vmatprep.mubr.bf16.mxu1 %v3802_v41  ;;  %v4303_v22 = vpack.c.bf16 %v4240_v34, %v4239_v36  ;;  %v4244_v41 = vld [vmem:[#allocation2 + $0x69] sm:$0xff] }
 0x2c0   :  { %v4305_v53 = vpack.c.bf16 %v4244_v41, %v4243_v50  ;;  %v4269_v41 = vld [vmem:[#allocation2 + $0x199] sm:$0xff] }
 0x2c5   :  { %6970 = vmatmul.mubr.bf16.gmra.mrb[92].mxu0 %v3804_v55 }
 0x2c6   :  { %7206 = vmatmul.mubr.bf16.gmra.mrb[52].mxu1 %v2264_v49  ;;  %6973 = vmatprep.mubr.bf16.mxu0 %v2266_v60  ;;  %v4304_v49 = vpack.c.bf16 %v4242_v38, %v4241_v45  ;;  %v4248_v60 = vld [vmem:[#allocation2 + $0x99] sm:$0xff]  ;;  %v4270_v45 = vld [vmem:[#allocation2 + $0x1a1] sm:$0xff] }
 0x2c7   :  { %7209 = vmatprep.mubr.bf16.mxu1 %v3804_v55  ;;  %v8089_v55 = vld [vmem:[#allocation6 + $0x210] sm:$0xff]   ;;  %v4307_v7 = vpack.c.bf16 %v4248_v60, %v4247_v5  ;;  %v4271_v60 = vld [vmem:[#allocation2 + $0x1e1] sm:$0xff] }
 0x2c8   :  { %v4274_v5 = vld [vmem:[#allocation2 + $0x201] sm:$0xff] }
 0x2cd   :  { %6974 = vmatmul.mubr.bf16.gmra.mrb[96].mxu0 %v3806_v9 }
 0x2ce   :  { %7210 = vmatmul.mubr.bf16.gmra.mrb[56].mxu1 %v3805_v6  ;;  %v8090_v6 = vld [vmem:[#allocation6 + $0x218] sm:$0xff]  }
 0x2cf   :  { %7213 = vmatprep.mubr.bf16.mxu1 %v3806_v9  ;;  %v8091_v9 = vld [vmem:[#allocation6 + $0x220] sm:$0xff]  }
 0x2d6   :  { %7214 = vmatmul.mubr.bf16.gmra.mrb[60].mxu1 %v3807_v20  ;;  %v4251_v20 = vld [vmem:[#allocation2 + $0xc1] sm:$0xff] }
 0x2d7   :  { %7217 = vmatprep.mubr.bf16.mxu1 %v3808_v23  ;;  %v4309_v23 = vpack.c.bf16 %v4252_v13, %v4251_v20 }
 0x2de   :  { %7218 = vmatmul.mubr.bf16.gmra.mrb[0].mxu1 %v3809_v4 }
 0x2df   :  { %7221 = vmatprep.mubr.bf16.mxu1 %v3810_v18 }
 0x2e6   :  { %7222 = vmatmul.mubr.bf16.gmra.mrb[4].mxu1 %v3811_v40  ;;  %v4255_v40 = vld [vmem:[#allocation2 + $0xf1] sm:$0xff] }
 0x2e7   :  { %7225 = vmatprep.mubr.bf16.mxu1 %v3812_v59  ;;  %v4311_v59 = vpack.c.bf16 %v4256_v14, %v4255_v40 }
 0x2ee   :  { %7226 = vmatmul.mubr.bf16.gmra.mrb[8].mxu1 %v3813_v19  ;;  %v4260_v19 = vld [vmem:[#allocation2 + $0x129] sm:$0xff] }
 0x2ef   :  { %7229 = vmatprep.mubr.bf16.mxu1 %v3814_v25  ;;  %v4257_v25 = vld [vmem:[#allocation2 + $0x109] sm:$0xff] }
 0x2f0   :  { %v4312_v44 = vpack.c.bf16 %v4258_v63, %v4257_v25 }
 0x2f6   :  { %7230 = vmatmul.mubr.bf16.gmra.mrb[12].mxu1 %v3815_v48  ;;  %v4313_v48 = vpack.c.bf16 %v4260_v19, %v4259_v46  ;;  %v4282_v19 = vld [vmem:[#allocation2 + $0x261] sm:$0xff] }
 0x2f7   :  { %7233 = vmatprep.mubr.bf16.mxu1 %v3816_v8  ;;  %v4262_v8 = vld [vmem:[#allocation2 + $0x141] sm:$0xff] }
 0x2fe   :  { %7234 = vmatmul.mubr.bf16.gmra.mrb[16].mxu1 %v3817_v42  ;;  %v4261_v42 = vld [vmem:[#allocation2 + $0x139] sm:$0xff] }
 0x2ff   :  { %7237 = vmatprep.mubr.bf16.mxu1 %v3818_v56  ;;  %v4314_v56 = vpack.c.bf16 %v4262_v8, %v4261_v42  ;;  %v4283_v42 = vld [vmem:[#allocation2 + $0x271] sm:$0xff] }
 0x306   :  { %7238 = vmatmul.mubr.bf16.gmra.mrb[20].mxu1 %v3819_v2  ;;  %v4266_v2 = vld [vmem:[#allocation2 + $0x171] sm:$0xff] }
 0x307   :  { %7241 = vmatprep.mubr.bf16.mxu1 %v3820_v30  ;;  %v4268_v30 = vld [vmem:[#allocation2 + $0x189] sm:$0xff] }
 0x30e   :  { %7242 = vmatmul.mubr.bf16.gmra.mrb[24].mxu1 %v3821_v32  ;;  %v4265_v32 = vld [vmem:[#allocation2 + $0x169] sm:$0xff] }
 0x30f   :  { %7261 = vmatprep.mubr.bf16.mxu1 %v4303_v22  ;;  %v4316_v36 = vpack.c.bf16 %v4266_v2, %v4265_v32  ;;  %v4267_v22 = vld [vmem:[#allocation2 + $0x181] sm:$0xff] }
 0x310   :  { %v4317_v38 = vpack.c.bf16 %v4268_v30, %v4267_v22  ;;  %v4288_v30 = vld [vmem:[#allocation2 + $0x2a9] sm:$0xff] }
 0x316   :  { %7262 = vmatmul.mubr.bf16.vlgmr.msra.gmra.mrb[28].mxu1 %v4304_v49 }
 0x317   :  { %7326 = vmatpush3.bf16.msra.mxu1 %v8603_v28  ;;  %7265 = vmatprep.mubr.bf16.mxu1 %v4305_v53  ;;  %v4249_v28 = vld [vmem:[#allocation2 + $0xa9] sm:$0xff] }
 0x318   :  { %7327 = vmatprep.subr.bf16.mxu1 %v8088_v52  ;;  %v4308_v15 = vpack.c.bf16 %v4250_v11, %v4249_v28  ;;  %v4272_v53 = vld [vmem:[#allocation2 + $0x1e9] sm:$0xff]  ;;  %v4273_v11 = vld [vmem:[#allocation2 + $0x1f9] sm:$0xff] }
 0x319   :  { %v4319_v0 = vpack.c.bf16 %v4272_v53, %v4271_v60  ;;  %v4320_v28 = vpack.c.bf16 %v4274_v5, %v4273_v11  ;;  %v4290_v53 = vld [vmem:[#allocation2 + $0x2c1] sm:$0xff] }
 0x31b   :  { %7328 = vmatpush3.bf16.msra.mxu1 %v8088_v52  ;;  %v4318_v52 = vpack.c.bf16 %v4270_v45, %v4269_v41  ;;  %v4287_v41 = vld [vmem:[#allocation2 + $0x2a1] sm:$0xff] }
 0x31c   :  { %7329 = vmatprep.subr.bf16.mxu1 %v8089_v55  ;;  %v4327_v45 = vpack.c.bf16 %v4288_v30, %v4287_v41  ;;  %v4300_v30 = vld [vmem:[#allocation2 + $0x339] sm:$0xff] }
 0x31e   :  { %7266 = vmatmul.mubr.bf16.gmra.mrb[32].mxu1 %v4306_v3 }
 0x31f   :  { %7269 = vmatprep.mubr.bf16.mxu1 %v4307_v7  ;;  %7330 = vmatpush3.bf16.msra.mxu1 %v8089_v55  ;;  %v4276_v7 = vld [vmem:[#allocation2 + $0x219] sm:$0xff] }
 0x320   :  { %7331 = vmatprep.subr.bf16.mxu1 %v8090_v6 }
 0x323   :  { %7332 = vmatpush3.bf16.msra.mxu1 %v8090_v6 }
 0x324   :  { %7333 = vmatprep.subr.bf16.mxu1 %v8091_v9 }
 0x326   :  { %7270 = vmatmul.mubr.bf16.gmra.mrb[36].mxu1 %v4308_v15  ;;  %v4275_v15 = vld [vmem:[#allocation2 + $0x211] sm:$0xff] }
 0x327   :  { %7273 = vmatprep.mubr.bf16.mxu1 %v4309_v23  ;;  %7334 = vmatpush3.bf16.msra.mxu1 %v8091_v9  ;;  %v4321_v20 = vpack.c.bf16 %v4276_v7, %v4275_v15  ;;  %v4278_v23 = vld [vmem:[#allocation2 + $0x231] sm:$0xff]  ;;  %v4289_v7 = vld [vmem:[#allocation2 + $0x2b9] sm:$0xff] }
 0x328   :  { %v8611_v24 = vpop.f32.mrb[100].mxu0  ;;  %7335 = vmatprep.subr.bf16.mxu1 %v8092_v39  ;;  %v4322_v40 = vpack.c.bf16 %v4278_v23, %v4277_v33  ;;  %v4291_v15 = vld [vmem:[#allocation2 + $0x2d1] sm:$0xff] }
 0x329   :  { %v8613_v4 = vpop.f32.mrb[101].mxu0 }
 0x32a   :  { %v8615_v18 = vpop.f32.mrb[102].mxu0 }
 0x32b   :  { %v8617_v35 = vpop.f32.mrb[103].mxu0  ;;  %7336 = vmatpush3.bf16.msra.mxu1 %v8092_v39 }
 0x32c   :  { %7337 = vmatprep.subr.bf16.mxu1 %v8093_v26 }
 0x32e   :  { %7274 = vmatmul.mubr.bf16.gmra.mrb[40].mxu1 %v4310_v37 }
 0x32f   :  { %7277 = vmatprep.mubr.bf16.mxu1 %v4311_v59  ;;  %7338 = vmatpush3.bf16.msra.mxu1 %v8093_v26 }
 0x330   :  { %v8619_v61 = vpop.f32.mrb[104].mxu0  ;;  %7339 = vmatprep.subr.bf16.mxu1 %v8094_v57 }
 0x331   :  { %v8621_v16 = vpop.f32.mrb[105].mxu0 }
 0x332   :  { %v8623_v21 = vpop.f32.mrb[106].mxu0 }
 0x333   :  { %v8625_v1 = vpop.f32.mrb[107].mxu0  ;;  %7340 = vmatpush3.bf16.msra.mxu1 %v8094_v57  ;;  %v4279_v57 = vld [vmem:[#allocation2 + $0x241] sm:$0xff] }
 0x334   :  { %v4323_v59 = vpack.c.bf16 %v4280_v27, %v4279_v57  ;;  %v4294_v27 = vld [vmem:[#allocation2 + $0x2f1] sm:$0xff] }
 0x336   :  { %7278 = vmatmul.mubr.bf16.gmra.mrb[44].mxu1 %v4312_v44  ;;  %v4284_v44 = vld [vmem:[#allocation2 + $0x279] sm:$0xff] }
 0x337   :  { %7281 = vmatprep.mubr.bf16.mxu1 %v4313_v48  ;;  %v4281_v48 = vld [vmem:[#allocation2 + $0x259] sm:$0xff] }
 0x338   :  { %v8627_v51 = vpop.f32.mrb[108].mxu0  ;;  %v4324_v12 = vpack.c.bf16 %v4282_v19, %v4281_v48  ;;  %v4295_v48 = vld [vmem:[#allocation2 + $0x301] sm:$0xff] }
 0x339   :  { %v8629_v10 = vpop.f32.mrb[109].mxu0 }
 0x33a   :  { %9052 = vst [vmem:[#allocation12_spill] sm:$0xff] %v8629_v10  ;;  %v8631_v17 = vpop.f32.mrb[110].mxu0 }
 0x33b   :  { %9053 = vst [vmem:[#allocation13_spill] sm:$0xff] %v8631_v17  ;;  %v8633_v43 = vpop.f32.mrb[111].mxu0  ;;  %v4773_v17 = vld [vmem:[#allocation2 + $0x12a] sm:$0xff] }
 0x33c   :  { %9054 = vst [vmem:[#allocation14_spill] sm:$0xff] %v8633_v43  ;;  %v4772_v43 = vld [vmem:[#allocation2 + $0x122] sm:$0xff] }
 0x33e   :  { %7282 = vmatmul.mubr.bf16.gmra.mrb[48].mxu1 %v4314_v56  ;;  %v4325_v56 = vpack.c.bf16 %v4284_v44, %v4283_v42 }
 0x33f   :  { %7285 = vmatprep.mubr.bf16.mxu1 %v4315_v54  ;;  %v4286_v54 = vld [vmem:[#allocation2 + $0x291] sm:$0xff] }
 0x340   :  { %v8635_v62 = vpop.f32.mrb[112].mxu0 }
 0x341   :  { %9055 = vst [vmem:[#allocation15_spill] sm:$0xff] %v8635_v62  ;;  %v8637_v29 = vpop.f32.mrb[113].mxu0  ;;  %v4771_v62 = vld [vmem:[#allocation2 + $0x112] sm:$0xff] }
 0x342   :  { %9056 = vst [vmem:[#allocation16_spill] sm:$0xff] %v8637_v29  ;;  %v8639_v31 = vpop.f32.mrb[114].mxu0  ;;  %v4770_v29 = vld [vmem:[#allocation2 + $0x10a] sm:$0xff] }
 0x343   :  { %9057 = vst [vmem:[#allocation17_spill] sm:$0xff] %v8639_v31  ;;  %v8641_v34 = vpop.f32.mrb[115].mxu0  ;;  %v4825_v10 = vpack.c.bf16 %v4771_v62, %v4770_v29  ;;  %v4782_v62 = vld [vmem:[#allocation2 + $0x19a] sm:$0xff]  ;;  %v4785_v29 = vld [vmem:[#allocation2 + $0x1ea] sm:$0xff] }
 0x344   :  { %9058 = vst [vmem:[#allocation18_spill] sm:$0xff] %v8641_v34 }
 0x346   :  { %7286 = vmatmul.mubr.bf16.gmra.mrb[52].mxu1 %v4316_v36  ;;  %v4285_v36 = vld [vmem:[#allocation2 + $0x289] sm:$0xff] }
 0x347   :  { %7289 = vmatprep.mubr.bf16.mxu1 %v4317_v38  ;;  %v4326_v38 = vpack.c.bf16 %v4286_v54, %v4285_v36 }
 0x348   :  { %v8643_v49 = vpop.f32.mrb[116].mxu0 }
 0x349   :  { %9059 = vst [vmem:[#allocation19_spill] sm:$0xff] %v8643_v49  ;;  %v8645_v50 = vpop.f32.mrb[117].mxu0 }
 0x34a   :  { %9060 = vst [vmem:[#allocation20_spill] sm:$0xff] %v8645_v50  ;;  %v8647_v55 = vpop.f32.mrb[118].mxu0  ;;  %v4765_v50 = vld [vmem:[#allocation2 + $0xca] sm:$0xff] }
 0x34b   :  { %9061 = vst [vmem:[#allocation21_spill] sm:$0xff] %v8647_v55  ;;  %v8649_v58 = vpop.f32.mrb[119].mxu0  ;;  %v4764_v55 = vld [vmem:[#allocation2 + $0xc2] sm:$0xff] }
 0x34c   :  { %9062 = vst [vmem:[#allocation22_spill] sm:$0xff] %v8649_v58 }
 0x34e   :  { %7290 = vmatmul.mubr.bf16.gmra.mrb[56].mxu1 %v4318_v52 }
 0x34f   :  { %7293 = vmatprep.mubr.bf16.mxu1 %v4319_v0  ;;  %v4292_v0 = vld [vmem:[#allocation2 + $0x2d9] sm:$0xff] }
 0x350   :  { %v8651_v3 = vpop.f32.mrb[120].mxu0 }
 0x351   :  { %9063 = vst [vmem:[#allocation23_spill] sm:$0xff] %v8651_v3  ;;  %v8653_v6 = vpop.f32.mrb[121].mxu0 }
 0x352   :  { %9064 = vst [vmem:[#allocation24_spill] sm:$0xff] %v8653_v6  ;;  %v8655_v9 = vpop.f32.mrb[122].mxu0  ;;  %v4761_v6 = vld [vmem:[#allocation2 + $0x9a] sm:$0xff] }
 0x353   :  { %9065 = vst [vmem:[#allocation25_spill] sm:$0xff] %v8655_v9  ;;  %v8657_v13 = vpop.f32.mrb[123].mxu0  ;;  %v4760_v9 = vld [vmem:[#allocation2 + $0x92] sm:$0xff] }
 0x354   :  { %9066 = vst [vmem:[#allocation26_spill] sm:$0xff] %v8657_v13 }
 0x356   :  { %7294 = vmatmul.mubr.bf16.gmra.mrb[60].mxu1 %v4320_v28  ;;  %v4328_v28 = vpack.c.bf16 %v4290_v53, %v4289_v7  ;;  %v4299_v53 = vld [vmem:[#allocation2 + $0x331] sm:$0xff]  ;;  %v4301_v7 = vld [vmem:[#allocation2 + $0x349] sm:$0xff] }
 0x357   :  { %7297 = vmatprep.mubr.bf16.mxu1 %v4321_v20  ;;  %v4329_v20 = vpack.c.bf16 %v4292_v0, %v4291_v15  ;;  %v4333_v0 = vpack.c.bf16 %v4300_v30, %v4299_v53  ;;  %v8096_v30 = vld [vmem:[%s9049_s5 + $0x8] sm:$0xff]   ;;  %v4755_v53 = vld [vmem:[#allocation2 + $0x52] sm:$0xff] }
 0x358   :  { %v8659_v39 = vpop.f32.mrb[124].mxu0 }
 0x359   :  { %9067 = vst [vmem:[#allocation27_spill] sm:$0xff] %v8659_v39  ;;  %v8661_v26 = vpop.f32.mrb[125].mxu0  ;;  %v4759_v39 = vld [vmem:[#allocation2 + $0x82] sm:$0xff] }
 0x35a   :  { %9068 = vst [vmem:[#allocation28_spill] sm:$0xff] %v8661_v26  ;;  %v8663_v14 = vpop.f32.mrb[126].mxu0  ;;  %v4758_v26 = vld [vmem:[#allocation2 + $0x7a] sm:$0xff] }
 0x35b   :  { %9069 = vst [vmem:[#allocation29_spill] sm:$0xff] %v8663_v14  ;;  %v8665_v37 = vpop.f32.mrb[127].mxu0 }
 0x35c   :  { %9070 = vst [vmem:[#allocation30_spill] sm:$0xff] %v8665_v37 }
 0x35e   :  { %7298 = vmatmul.mubr.bf16.gmra.mrb[0].mxu1 %v4322_v40  ;;  %v4296_v40 = vld [vmem:[#allocation2 + $0x309] sm:$0xff] }
 0x35f   :  { %7301 = vmatprep.mubr.bf16.mxu1 %v4323_v59  ;;  %v4293_v59 = vld [vmem:[#allocation2 + $0x2e9] sm:$0xff] }
 0x360   :  { %v8667_v63 = vpop.f32.mrb[64].mxu0  ;;  %v4330_v44 = vpack.c.bf16 %v4294_v27, %v4293_v59  ;;  %v4753_v59 = vld [vmem:[#allocation2 + $0x3a] sm:$0xff] }
 0x361   :  { %v8669_v25 = vpop.f32.mrb[65].mxu0 }
 0x362   :  { %v8671_v46 = vpop.f32.mrb[66].mxu0 }
 0x363   :  { %v8673_v8 = vpop.f32.mrb[67].mxu0 }
 0x366   :  { %7302 = vmatmul.mubr.bf16.gmra.mrb[4].mxu1 %v4324_v12  ;;  %v4331_v12 = vpack.c.bf16 %v4296_v40, %v4295_v48  ;;  %v4752_v40 = vld [vmem:[#allocation2 + $0x32] sm:$0xff] }
 0x367   :  { %7305 = vmatprep.mubr.bf16.mxu1 %v4325_v56  ;;  %v4298_v56 = vld [vmem:[#allocation2 + $0x321] sm:$0xff] }
 0x368   :  { %v8675_v47 = vpop.f32.mrb[68].mxu0 }
 0x369   :  { %v8677_v2 = vpop.f32.mrb[69].mxu0 }
 0x36a   :  { %v8679_v32 = vpop.f32.mrb[70].mxu0 }
 0x36b   :  { %v8681_v22 = vpop.f32.mrb[71].mxu0 }
 0x36e   :  { %7306 = vmatmul.mubr.bf16.gmra.mrb[8].mxu1 %v4326_v38  ;;  %v4297_v38 = vld [vmem:[#allocation2 + $0x319] sm:$0xff] }
 0x36f   :  { %7309 = vmatprep.mubr.bf16.mxu1 %v4327_v45  ;;  %v4332_v45 = vpack.c.bf16 %v4298_v56, %v4297_v38  ;;  %v8095_v56 = vld [vmem:[%s9049_s5] sm:$0xff]  }
 0x370   :  { %v8683_v52 = vpop.f32.mrb[72].mxu0  ;;  %7405 = vmatprep.subr.bf16.mxu0 %v8095_v56 }
 0x371   :  { %v8685_v60 = vpop.f32.mrb[73].mxu0  ;;  %7406 = vmatpush3.bf16.msra.mxu0 %v8095_v56  ;;  %v8098_v56 = vld [vmem:[%s9049_s5 + $0x18] sm:$0xff]  }
 0x372   :  { %v8687_v5 = vpop.f32.mrb[74].mxu0  ;;  %7407 = vmatprep.subr.bf16.mxu0 %v8096_v30 }
 0x373   :  { %v8689_v11 = vpop.f32.mrb[75].mxu0 }
 0x375   :  { %7408 = vmatpush3.bf16.msra.mxu0 %v8096_v30  ;;  %v8099_v30 = vld [vmem:[%s9049_s5 + $0x20] sm:$0xff]  }
 0x376   :  { %7310 = vmatmul.mubr.bf16.gmra.mrb[12].mxu1 %v4328_v28  ;;  %v4302_v28 = vld [vmem:[#allocation2 + $0x351] sm:$0xff] }
 0x377   :  { %7313 = vmatprep.mubr.bf16.mxu1 %v4329_v20  ;;  %v4334_v27 = vpack.c.bf16 %v4302_v28, %v4301_v7  ;;  %v4756_v7 = vld [vmem:[#allocation2 + $0x62] sm:$0xff]  ;;  %v4757_v28 = vld [vmem:[#allocation2 + $0x6a] sm:$0xff] }
 0x378   :  { %v8691_v23 = vpop.f32.mrb[76].mxu0  ;;  %v4818_v37 = vpack.c.bf16 %v4757_v28, %v4756_v7  ;;  %v8100_v7 = vld [vmem:[%s9049_s5 + $0x28] sm:$0xff]  }
 0x379   :  { %v8693_v33 = vpop.f32.mrb[77].mxu0 }
 0x37a   :  { %v8695_v57 = vpop.f32.mrb[78].mxu0 }
 0x37b   :  { %v8697_v19 = vpop.f32.mrb[79].mxu0 }
 0x37e   :  { %7314 = vmatmul.mubr.bf16.gmra.mrb[16].mxu1 %v4330_v44 }
 0x37f   :  { %7317 = vmatprep.mubr.bf16.mxu1 %v4331_v12  ;;  %v4816_v12 = vpack.c.bf16 %v4753_v59, %v4752_v40  ;;  %v8097_v40 = vld [vmem:[%s9049_s5 + $0x10] sm:$0xff]  }
 0x380   :  { %v8699_v42 = vpop.f32.mrb[80].mxu0  ;;  %7409 = vmatprep.subr.bf16.mxu0 %v8097_v40 }
 0x381   :  { %v8701_v54 = vpop.f32.mrb[81].mxu0  ;;  %7410 = vmatpush3.bf16.msra.mxu0 %v8097_v40  ;;  %v4762_v40 = vld [vmem:[#allocation2 + $0xaa] sm:$0xff] }
 0x382   :  { %v8703_v36 = vpop.f32.mrb[82].mxu0  ;;  %7411 = vmatprep.subr.bf16.mxu0 %v8098_v56 }
 0x383   :  { %v8705_v41 = vpop.f32.mrb[83].mxu0 }
 0x385   :  { %7412 = vmatpush3.bf16.msra.mxu0 %v8098_v56  ;;  %v4766_v56 = vld [vmem:[#allocation2 + $0xda] sm:$0xff] }
 0x386   :  { %7318 = vmatmul.mubr.bf16.gmra.mrb[20].mxu1 %v4332_v45  ;;  %v4754_v45 = vld [vmem:[#allocation2 + $0x4a] sm:$0xff]  ;;  %7413 = vmatprep.subr.bf16.mxu0 %v8099_v30 }
 0x387   :  { %7321 = vmatprep.mubr.bf16.mxu1 %v4333_v0 }
 0x388   :  { %v8707_v15 = vpop.f32.mrb[84].mxu0 }
 0x389   :  { %v8709_v20 = vpop.f32.mrb[85].mxu0  ;;  %7414 = vmatpush3.bf16.msra.mxu0 %v8099_v30  ;;  %v4768_v30 = vld [vmem:[#allocation2 + $0xf2] sm:$0xff] }
 0x38a   :  { %v8711_v44 = vpop.f32.mrb[86].mxu0  ;;  %7415 = vmatprep.subr.bf16.mxu0 %v8100_v7 }
 0x38b   :  { %v8713_v48 = vpop.f32.mrb[87].mxu0 }
 0x38d   :  { %7416 = vmatpush3.bf16.msra.mxu0 %v8100_v7  ;;  %v4776_v7 = vld [vmem:[#allocation2 + $0x152] sm:$0xff] }
 0x38e   :  { %7322 = vmatmul.mubr.bf16.gmra.mrb[24].mxu1 %v4334_v27 }
 0x38f   :  { %7341 = vmatprep.mubr.bf16.mxu1 %v4816_v12  ;;  %v4817_v12 = vpack.c.bf16 %v4755_v53, %v4754_v45  ;;  %v4819_v53 = vpack.c.bf16 %v4759_v39, %v4758_v26  ;;  %v4822_v26 = vpack.c.bf16 %v4765_v50, %v4764_v55  ;;  %v4774_v50 = vld [vmem:[#allocation2 + $0x13a] sm:$0xff]  ;;  %v4775_v55 = vld [vmem:[#allocation2 + $0x142] sm:$0xff] }
 0x390   :  { %v8721_v38 = vpop.f32.mrb[88].mxu0 }
 0x391   :  { %v8723_v0 = vpop.f32.mrb[89].mxu0 }
 0x392   :  { %v8725_v27 = vpop.f32.mrb[90].mxu0 }
 0x393   :  { %v8730_v59 = vpop.f32.mrb[91].mxu0 }
 0x396   :  { %7342 = vmatmul.mubr.bf16.vlgmr.msra.gmra.mrb[28].mxu1 %v4817_v12  ;;  %v4763_v12 = vld [vmem:[#allocation2 + $0xb2] sm:$0xff] }
 0x397   :  { %7345 = vmatprep.mubr.bf16.mxu1 %v4818_v37  ;;  %v4820_v37 = vpack.c.bf16 %v4761_v6, %v4760_v9  ;;  %v8101_v6 = vld [vmem:[%s9049_s5 + $0x30] sm:$0xff]   ;;  %v4821_v39 = vpack.c.bf16 %v4763_v12, %v4762_v40  ;;  %v4826_v40 = vpack.c.bf16 %v4773_v17, %v4772_v43  ;;  %v4777_v12 = vld [vmem:[#allocation2 + $0x15a] sm:$0xff]  ;;  %v4783_v17 = vld [vmem:[#allocation2 + $0x1a2] sm:$0xff] }
 0x398   :  { %v8735_v14 = vpop.f32.mrb[92].mxu0  ;;  %7417 = vmatprep.subr.bf16.mxu0 %v8101_v6  ;;  %v4784_v43 = vld [vmem:[#allocation2 + $0x1e2] sm:$0xff] }
 0x399   :  { %v8737_v13 = vpop.f32.mrb[93].mxu0  ;;  %7418 = vmatpush3.bf16.msra.mxu0 %v8101_v6  ;;  %v4828_v6 = vpack.c.bf16 %v4777_v12, %v4776_v7  ;;  %v4789_v7 = vld [vmem:[#allocation2 + $0x21a] sm:$0xff] }
 0x39a   :  { %v8739_v3 = vpop.f32.mrb[94].mxu0 }
 0x39b   :  { %v8744_v45 = vpop.f32.mrb[95].mxu0 }
 0x39e   :  { %7346 = vmatmul.mubr.bf16.gmra.mrb[32].mxu1 %v4819_v53  ;;  %v4767_v53 = vld [vmem:[#allocation2 + $0xe2] sm:$0xff] }
 0x39f   :  { %7349 = vmatprep.mubr.bf16.mxu1 %v4820_v37  ;;  %v4769_v37 = vld [vmem:[#allocation2 + $0xfa] sm:$0xff]  ;;  %v4823_v34 = vpack.c.bf16 %v4767_v53, %v4766_v56  ;;  %v4779_v56 = vld [vmem:[#allocation2 + $0x172] sm:$0xff] }
 0x3a0   :  { %v8749_v28 = vpop.f32.mrb[96].mxu0  ;;  %v4824_v31 = vpack.c.bf16 %v4769_v37, %v4768_v30  ;;  %v4832_v37 = vpack.c.bf16 %v4785_v29, %v4784_v43 }
 0x3a1   :  { %v8751_v58 = vpop.f32.mrb[97].mxu0 }
 0x3a2   :  { %v8753_v49 = vpop.f32.mrb[98].mxu0 }
 0x3a3   :  { %v8758_v9 = vpop.f32.mrb[99].mxu0 }
 0x3a6   :  { %7350 = vmatmul.mubr.bf16.gmra.mrb[36].mxu1 %v4821_v39  ;;  %v4827_v39 = vpack.c.bf16 %v4775_v55, %v4774_v50  ;;  %v4787_v50 = vld [vmem:[#allocation2 + $0x202] sm:$0xff]  ;;  %v4788_v55 = vld [vmem:[#allocation2 + $0x212] sm:$0xff] }
 0x3a7   :  { %7353 = vmatprep.mubr.bf16.mxu1 %v4822_v26  ;;  %v4778_v26 = vld [vmem:[#allocation2 + $0x16a] sm:$0xff] }
 0x3a8   :  { %v4829_v53 = vpack.c.bf16 %v4779_v56, %v4778_v26  ;;  %v4791_v26 = vld [vmem:[#allocation2 + $0x232] sm:$0xff]  ;;  %v4792_v56 = vld [vmem:[#allocation2 + $0x242] sm:$0xff] }
 0x3ae   :  { %7354 = vmatmul.mubr.bf16.gmra.mrb[40].mxu1 %v4823_v34  ;;  %v4780_v34 = vld [vmem:[#allocation2 + $0x182] sm:$0xff] }
 0x3af   :  { %7357 = vmatprep.mubr.bf16.mxu1 %v4824_v31  ;;  %v4781_v31 = vld [vmem:[#allocation2 + $0x18a] sm:$0xff] }
 0x3b0   :  { %v4830_v30 = vpack.c.bf16 %v4781_v31, %v4780_v34  ;;  %v4793_v34 = vld [vmem:[#allocation2 + $0x24a] sm:$0xff] }
 0x3b6   :  { %7358 = vmatmul.mubr.bf16.gmra.mrb[44].mxu1 %v4825_v10  ;;  %v4831_v10 = vpack.c.bf16 %v4783_v17, %v4782_v62  ;;  %v4795_v62 = vld [vmem:[#allocation2 + $0x262] sm:$0xff]  ;;  %v4796_v17 = vld [vmem:[#allocation2 + $0x272] sm:$0xff] }
 0x3b7   :  { %7361 = vmatprep.mubr.bf16.mxu1 %v4826_v40  ;;  %v4786_v40 = vld [vmem:[#allocation2 + $0x1fa] sm:$0xff] }
 0x3b8   :  { %v4833_v12 = vpack.c.bf16 %v4787_v50, %v4786_v40  ;;  %v4799_v40 = vld [vmem:[#allocation2 + $0x292] sm:$0xff]  ;;  %v4800_v50 = vld [vmem:[#allocation2 + $0x2a2] sm:$0xff] }
 0x3be   :  { %7362 = vmatmul.mubr.bf16.gmra.mrb[48].mxu1 %v4827_v39  ;;  %v4834_v39 = vpack.c.bf16 %v4789_v7, %v4788_v55  ;;  %v4801_v55 = vld [vmem:[#allocation2 + $0x2aa] sm:$0xff] }
 0x3bf   :  { %7365 = vmatprep.mubr.bf16.mxu1 %v4828_v6  ;;  %v4790_v6 = vld [vmem:[#allocation2 + $0x22a] sm:$0xff] }
 0x3c0   :  { %v4835_v31 = vpack.c.bf16 %v4791_v26, %v4790_v6  ;;  %v4803_v6 = vld [vmem:[#allocation2 + $0x2c2] sm:$0xff]  ;;  %v4804_v26 = vld [vmem:[#allocation2 + $0x2d2] sm:$0xff] }
 0x3c6   :  { %7366 = vmatmul.mubr.bf16.gmra.mrb[52].mxu1 %v4829_v53  ;;  %v4836_v53 = vpack.c.bf16 %v4793_v34, %v4792_v56  ;;  %v4805_v56 = vld [vmem:[#allocation2 + $0x2da] sm:$0xff] }
 0x3c7   :  { %7369 = vmatprep.mubr.bf16.mxu1 %v4830_v30  ;;  %v4794_v30 = vld [vmem:[#allocation2 + $0x25a] sm:$0xff] }
 0x3c8   :  { %v4837_v43 = vpack.c.bf16 %v4795_v62, %v4794_v30  ;;  %v8102_v34 = vld [vmem:[%s9049_s5 + $0x38] sm:$0xff]   ;;  %v4806_v30 = vld [vmem:[#allocation2 + $0x2ea] sm:$0xff] }
 0x3c9   :  { %7419 = vmatprep.subr.bf16.mxu0 %v8102_v34  ;;  %v4807_v62 = vld [vmem:[#allocation2 + $0x2f2] sm:$0xff] }
 0x3ca   :  { %7420 = vmatpush3.bf16.msra.mxu0 %v8102_v34  ;;  %v8766_v34 = vld [vmem:[%s9048_s4] ss:$0 sm:$0xff] }
 0x3ce   :  { %7370 = vmatmul.mubr.bf16.gmra.mrb[56].mxu1 %v4831_v10  ;;  %v4797_v10 = vld [vmem:[#allocation2 + $0x27a] sm:$0xff] }
 0x3cf   :  { %7373 = vmatprep.mubr.bf16.mxu1 %v4832_v37  ;;  %v4838_v29 = vpack.c.bf16 %v4797_v10, %v4796_v17  ;;  %v4798_v37 = vld [vmem:[#allocation2 + $0x28a] sm:$0xff]  ;;  %v4808_v17 = vld [vmem:[#allocation2 + $0x302] sm:$0xff] }
 0x3d0   :  { %v4839_v7 = vpack.c.bf16 %v4799_v40, %v4798_v37  ;;  %v4809_v10 = vld [vmem:[#allocation2 + $0x30a] sm:$0xff]  ;;  %v4810_v37 = vld [vmem:[#allocation2 + $0x31a] sm:$0xff]  ;;  %v4811_v40 = vld [vmem:[#allocation2 + $0x322] sm:$0xff] }
 0x3d6   :  { %7374 = vmatmul.mubr.bf16.gmra.mrb[60].mxu1 %v4833_v12  ;;  %v4840_v12 = vpack.c.bf16 %v4801_v55, %v4800_v50  ;;  %v4812_v50 = vld [vmem:[#allocation2 + $0x332] sm:$0xff]  ;;  %v4813_v55 = vld [vmem:[#allocation2 + $0x33a] sm:$0xff] }
 0x3d7   :  { %7377 = vmatprep.mubr.bf16.mxu1 %v4834_v39  ;;  %v4802_v39 = vld [vmem:[#allocation2 + $0x2ba] sm:$0xff] }
 0x3de   :  { %7378 = vmatmul.mubr.bf16.gmra.mrb[0].mxu1 %v4835_v31  ;;  %v4841_v31 = vpack.c.bf16 %v4803_v6, %v4802_v39  ;;  %v4814_v39 = vld [vmem:[#allocation2 + $0x34a] sm:$0xff]  ;;  %v4815_v6 = vld [vmem:[#allocation2 + $0x352] sm:$0xff] }
 0x3df   :  { %7381 = vmatprep.mubr.bf16.mxu1 %v4836_v53  ;;  %v4842_v53 = vpack.c.bf16 %v4805_v56, %v4804_v26  ;;  %v4847_v26 = vpack.c.bf16 %v4815_v6, %v4814_v39 }
 0x3e6   :  { %7382 = vmatmul.mubr.bf16.gmra.mrb[4].mxu1 %v4837_v43  ;;  %v4843_v43 = vpack.c.bf16 %v4807_v62, %v4806_v30 }
 0x3e7   :  { %7385 = vmatprep.mubr.bf16.mxu1 %v4838_v29  ;;  %v4844_v29 = vpack.c.bf16 %v4809_v10, %v4808_v17 }
 0x3ee   :  { %7386 = vmatmul.mubr.bf16.gmra.mrb[8].mxu1 %v4839_v7  ;;  %v4845_v7 = vpack.c.bf16 %v4811_v40, %v4810_v37 }
 0x3ef   :  { %7389 = vmatprep.mubr.bf16.mxu1 %v4840_v12  ;;  %v4846_v12 = vpack.c.bf16 %v4813_v55, %v4812_v50 }
 0x3f6   :  { %7390 = vmatmul.mubr.bf16.gmra.mrb[12].mxu1 %v4841_v31 }
 0x3f7   :  { %7393 = vmatprep.mubr.bf16.mxu1 %v4842_v53 }
 0x3fe   :  { %7394 = vmatmul.mubr.bf16.gmra.mrb[16].mxu1 %v4843_v43 }
 0x3ff   :  { %7397 = vmatprep.mubr.bf16.mxu1 %v4844_v29 }
 0x406   :  { %7398 = vmatmul.mubr.bf16.gmra.mrb[20].mxu1 %v4845_v7 }
 0x407   :  { %7401 = vmatprep.mubr.bf16.mxu1 %v4846_v12 }
 0x40e   :  { %7402 = vmatmul.mubr.bf16.gmra.mrb[24].mxu1 %v4847_v26 }
 0x469   :  { %v7343_v56 = vpop.f32.mrb[28].mxu1 }
 0x46a   :  { %v7501_v31 = vadd.f32 %v7343_v56, %v8667_v63  ;;  %v4946_v53 = vpop.f32.mrb[29].mxu1 }
 0x46b   :  { %v7502_v30 = vadd.f32 %v4946_v53, %v8669_v25  ;;  %v7344_v62 = vpop.f32.mrb[30].mxu1 }
 0x46c   :  { %v5274_v17 = vadd.f32 %v7501_v31, %v8766_v34  ;;  %v7503_v10 = vadd.f32 %v7344_v62, %v8671_v46  ;;  %v4949_v43 = vpop.f32.mrb[31].mxu1 }
 0x46d   :  { %v5272_v29 = vadd.f32 %v7502_v30, %v8766_v34  ;;  %v7504_v37 = vadd.f32 %v4949_v43, %v8673_v8 }
 0x46e   :  { %v5275_v40 = vadd.f32 %v7503_v10, %v8766_v34  ;;  %v5338_v55 = vmax.f32 %v5274_v17, 0.0 }
 0x46f   :  { %v5273_v50 = vadd.f32 %v7504_v37, %v8766_v34  ;;  %v5336_v63 = vmax.f32 %v5272_v29, 0.0 }
 0x470   :  { %v5339_v7 = vmax.f32 %v5275_v40, 0.0 }
 0x471   :  { %v5337_v12 = vmax.f32 %v5273_v50, 0.0  ;;  %v7347_v39 = vpop.f32.mrb[32].mxu1 }
 0x472   :  { %v5401_v25 = vpack.c.bf16 %v5339_v7, %v5338_v55  ;;  %v7505_v6 = vadd.f32 %v7347_v39, %v8675_v47  ;;  %v4962_v26 = vpop.f32.mrb[33].mxu1 }
 0x473   :  { %v7506_v46 = vadd.f32 %v4962_v26, %v8677_v2  ;;  %v7348_v56 = vpop.f32.mrb[34].mxu1  ;;  %v5400_v31 = vpack.c.bf16 %v5337_v12, %v5336_v63 }
 0x474   :  { %v5278_v53 = vadd.f32 %v7505_v6, %v8766_v34  ;;  %v7507_v8 = vadd.f32 %v7348_v56, %v8679_v32  ;;  %v4965_v30 = vpop.f32.mrb[35].mxu1 }
 0x475   :  { %v5276_v62 = vadd.f32 %v7506_v46, %v8766_v34  ;;  %v7508_v17 = vadd.f32 %v4965_v30, %v8681_v22  ;;  %7421 = vmatprep.mubr.bf16.mxu0 %v5400_v31 }
 0x476   :  { %v5279_v10 = vadd.f32 %v7507_v8, %v8766_v34  ;;  %7422 = vmatmul.mubr.bf16.vlgmr.msra.gmra.mrb[128].mxu0 %v5401_v25  ;;  %v5342_v43 = vmax.f32 %v5278_v53, 0.0 }
 0x477   :  { %v5277_v47 = vadd.f32 %v7508_v17, %v8766_v34  ;;  %v5340_v2 = vmax.f32 %v5276_v62, 0.0 }
 0x478   :  { %v5343_v29 = vmax.f32 %v5279_v10, 0.0 }
 0x479   :  { %v5341_v37 = vmax.f32 %v5277_v47, 0.0  ;;  %v7351_v40 = vpop.f32.mrb[36].mxu1 }
 0x47a   :  { %v7509_v50 = vadd.f32 %v7351_v40, %v8683_v52  ;;  %v4978_v55 = vpop.f32.mrb[37].mxu1  ;;  %v5403_v32 = vpack.c.bf16 %v5343_v29, %v5342_v43 }
 0x47b   :  { %v7510_v7 = vadd.f32 %v4978_v55, %v8685_v60  ;;  %v7352_v63 = vpop.f32.mrb[38].mxu1  ;;  %v5402_v12 = vpack.c.bf16 %v5341_v37, %v5340_v2 }
 0x47c   :  { %v5282_v22 = vadd.f32 %v7509_v50, %v8766_v34  ;;  %v7511_v39 = vadd.f32 %v7352_v63, %v8687_v5  ;;  %v4981_v25 = vpop.f32.mrb[39].mxu1 }
 0x47d   :  { %v5280_v6 = vadd.f32 %v7510_v7, %v8766_v34  ;;  %v7512_v26 = vadd.f32 %v4981_v25, %v8689_v11  ;;  %7425 = vmatprep.mubr.bf16.mxu0 %v5402_v12 }
 0x47e   :  { %v5283_v46 = vadd.f32 %v7511_v39, %v8766_v34  ;;  %7426 = vmatmul.mubr.bf16.gmra.mrb[132].mxu0 %v5403_v32  ;;  %v5346_v56 = vmax.f32 %v5282_v22, 0.0 }
 0x47f   :  { %v5281_v52 = vadd.f32 %v7512_v26, %v8766_v34  ;;  %v5344_v60 = vmax.f32 %v5280_v6, 0.0 }
 0x480   :  { %v5347_v31 = vmax.f32 %v5283_v46, 0.0 }
 0x481   :  { %v5345_v53 = vmax.f32 %v5281_v52, 0.0  ;;  %v7355_v8 = vpop.f32.mrb[40].mxu1 }
 0x482   :  { %v7513_v30 = vadd.f32 %v7355_v8, %v8691_v23  ;;  %v4994_v62 = vpop.f32.mrb[41].mxu1  ;;  %v5405_v5 = vpack.c.bf16 %v5347_v31, %v5346_v56 }
 0x483   :  { %v7514_v17 = vadd.f32 %v4994_v62, %v8693_v33  ;;  %v7356_v10 = vpop.f32.mrb[42].mxu1  ;;  %v5404_v47 = vpack.c.bf16 %v5345_v53, %v5344_v60 }
 0x484   :  { %v5286_v11 = vadd.f32 %v7513_v30, %v8766_v34  ;;  %v7515_v43 = vadd.f32 %v7356_v10, %v8695_v57  ;;  %v4997_v29 = vpop.f32.mrb[43].mxu1 }
 0x485   :  { %v5284_v2 = vadd.f32 %v7514_v17, %v8766_v34  ;;  %v7516_v37 = vadd.f32 %v4997_v29, %v8697_v19  ;;  %7429 = vmatprep.mubr.bf16.mxu0 %v5404_v47 }
 0x486   :  { %v5287_v40 = vadd.f32 %v7515_v43, %v8766_v34  ;;  %7430 = vmatmul.mubr.bf16.gmra.mrb[136].mxu0 %v5405_v5  ;;  %v5350_v50 = vmax.f32 %v5286_v11, 0.0 }
 0x487   :  { %v5285_v23 = vadd.f32 %v7516_v37, %v8766_v34  ;;  %v5348_v33 = vmax.f32 %v5284_v2, 0.0 }
 0x488   :  { %v5351_v55 = vmax.f32 %v5287_v40, 0.0 }
 0x489   :  { %v5349_v32 = vmax.f32 %v5285_v23, 0.0  ;;  %v7359_v7 = vpop.f32.mrb[44].mxu1 }
 0x48a   :  { %v7517_v63 = vadd.f32 %v7359_v7, %v8699_v42  ;;  %v5010_v12 = vpop.f32.mrb[45].mxu1  ;;  %v5407_v57 = vpack.c.bf16 %v5351_v55, %v5350_v50 }
 0x48b   :  { %v7518_v22 = vadd.f32 %v5010_v12, %v8701_v54  ;;  %v7360_v39 = vpop.f32.mrb[46].mxu1  ;;  %v5406_v25 = vpack.c.bf16 %v5349_v32, %v5348_v33 }
 0x48c   :  { %v5290_v19 = vadd.f32 %v7517_v63, %v8766_v34  ;;  %v7519_v6 = vadd.f32 %v7360_v39, %v8703_v36  ;;  %v5013_v26 = vpop.f32.mrb[47].mxu1 }
 0x48d   :  { %v5288_v46 = vadd.f32 %v7518_v22, %v8766_v34  ;;  %v7520_v52 = vadd.f32 %v5013_v26, %v8705_v41  ;;  %7433 = vmatprep.mubr.bf16.mxu0 %v5406_v25 }
 0x48e   :  { %v5291_v56 = vadd.f32 %v7519_v6, %v8766_v34  ;;  %7434 = vmatmul.mubr.bf16.gmra.mrb[140].mxu0 %v5407_v57  ;;  %v5354_v31 = vmax.f32 %v5290_v19, 0.0 }
 0x48f   :  { %v5289_v42 = vadd.f32 %v7520_v52, %v8766_v34  ;;  %v5352_v54 = vmax.f32 %v5288_v46, 0.0 }
 0x490   :  { %v5355_v60 = vmax.f32 %v5291_v56, 0.0 }
 0x491   :  { %v5353_v53 = vmax.f32 %v5289_v42, 0.0  ;;  %v7363_v8 = vpop.f32.mrb[48].mxu1 }
 0x492   :  { %v7521_v30 = vadd.f32 %v7363_v8, %v8707_v15  ;;  %v5026_v62 = vpop.f32.mrb[49].mxu1  ;;  %v5409_v36 = vpack.c.bf16 %v5355_v60, %v5354_v31 }
 0x493   :  { %v7522_v5 = vadd.f32 %v5026_v62, %v8709_v20  ;;  %v7364_v17 = vpop.f32.mrb[50].mxu1  ;;  %v5408_v10 = vpack.c.bf16 %v5353_v53, %v5352_v54 }
 0x494   :  { %v5294_v41 = vadd.f32 %v7521_v30, %v8766_v34  ;;  %v7523_v47 = vadd.f32 %v7364_v17, %v8711_v44  ;;  %v5029_v11 = vpop.f32.mrb[51].mxu1 }
 0x495   :  { %v5292_v43 = vadd.f32 %v7522_v5, %v8766_v34  ;;  %v7524_v29 = vadd.f32 %v5029_v11, %v8713_v48  ;;  %7437 = vmatprep.mubr.bf16.mxu0 %v5408_v10 }
 0x496   :  { %v5295_v2 = vadd.f32 %v7523_v47, %v8766_v34  ;;  %7438 = vmatmul.mubr.bf16.gmra.mrb[144].mxu0 %v5409_v36  ;;  %v5358_v37 = vmax.f32 %v5294_v41, 0.0 }
 0x497   :  { %v5293_v15 = vadd.f32 %v7524_v29, %v8766_v34  ;;  %v5356_v20 = vmax.f32 %v5292_v43, 0.0 }
 0x498   :  { %v5359_v40 = vmax.f32 %v5295_v2, 0.0 }
 0x499   :  { %v5357_v23 = vmax.f32 %v5293_v15, 0.0  ;;  %v7367_v50 = vpop.f32.mrb[52].mxu1 }
 0x49a   :  { %v7525_v55 = vadd.f32 %v7367_v50, %v8721_v38  ;;  %v5042_v33 = vpop.f32.mrb[53].mxu1  ;;  %v5411_v44 = vpack.c.bf16 %v5359_v40, %v5358_v37 }
 0x49b   :  { %v7526_v32 = vadd.f32 %v5042_v33, %v8723_v0  ;;  %v7368_v7 = vpop.f32.mrb[54].mxu1  ;;  %v5410_v63 = vpack.c.bf16 %v5357_v23, %v5356_v20 }
 0x49c   :  { %v5298_v48 = vadd.f32 %v7525_v55, %v8766_v34  ;;  %v7527_v12 = vadd.f32 %v7368_v7, %v8725_v27  ;;  %v5045_v57 = vpop.f32.mrb[55].mxu1 }
 0x49d   :  { %v5296_v22 = vadd.f32 %v7526_v32, %v8766_v34  ;;  %v7528_v39 = vadd.f32 %v5045_v57, %v8730_v59  ;;  %7441 = vmatprep.mubr.bf16.mxu0 %v5410_v63 }
 0x49e   :  { %v5299_v25 = vadd.f32 %v7527_v12, %v8766_v34  ;;  %7442 = vmatmul.mubr.bf16.gmra.mrb[148].mxu0 %v5411_v44  ;;  %v5362_v19 = vmax.f32 %v5298_v48, 0.0 }
 0x49f   :  { %v5297_v38 = vadd.f32 %v7528_v39, %v8766_v34  ;;  %v5360_v0 = vmax.f32 %v5296_v22, 0.0 }
 0x4a0   :  { %v5363_v6 = vmax.f32 %v5299_v25, 0.0 }
 0x4a1   :  { %v5361_v26 = vmax.f32 %v5297_v38, 0.0  ;;  %v7371_v46 = vpop.f32.mrb[56].mxu1 }
 0x4a2   :  { %v7529_v52 = vadd.f32 %v7371_v46, %v8735_v14  ;;  %v5058_v56 = vpop.f32.mrb[57].mxu1  ;;  %v5413_v27 = vpack.c.bf16 %v5363_v6, %v5362_v19 }
 0x4a3   :  { %v7530_v42 = vadd.f32 %v5058_v56, %v8737_v13  ;;  %v7372_v31 = vpop.f32.mrb[58].mxu1  ;;  %v5412_v60 = vpack.c.bf16 %v5361_v26, %v5360_v0 }
 0x4a4   :  { %v5302_v59 = vadd.f32 %v7529_v52, %v8766_v34  ;;  %v7531_v54 = vadd.f32 %v7372_v31, %v8739_v3  ;;  %v5061_v53 = vpop.f32.mrb[59].mxu1 }
 0x4a5   :  { %v5300_v8 = vadd.f32 %v7530_v42, %v8766_v34  ;;  %v7532_v30 = vadd.f32 %v5061_v53, %v8744_v45  ;;  %7445 = vmatprep.mubr.bf16.mxu0 %v5412_v60 }
 0x4a6   :  { %v5303_v62 = vadd.f32 %v7531_v54, %v8766_v34  ;;  %7446 = vmatmul.mubr.bf16.gmra.mrb[152].mxu0 %v5413_v27  ;;  %v5366_v36 = vmax.f32 %v5302_v59, 0.0 }
 0x4a7   :  { %v5301_v14 = vadd.f32 %v7532_v30, %v8766_v34  ;;  %v5364_v13 = vmax.f32 %v5300_v8, 0.0 }
 0x4a8   :  { %v5367_v5 = vmax.f32 %v5303_v62, 0.0 }
 0x4a9   :  { %v5365_v17 = vmax.f32 %v5301_v14, 0.0  ;;  %v7375_v10 = vpop.f32.mrb[60].mxu1 }
 0x4aa   :  { %v7533_v41 = vadd.f32 %v7375_v10, %v8749_v28  ;;  %v5074_v47 = vpop.f32.mrb[61].mxu1  ;;  %v5415_v3 = vpack.c.bf16 %v5367_v5, %v5366_v36  ;;  %v9071_v5 = vld [vmem:[#allocation12_spill] sm:$0xff] }
 0x4ab   :  { %v7534_v11 = vadd.f32 %v5074_v47, %v8751_v58  ;;  %v7376_v43 = vpop.f32.mrb[62].mxu1  ;;  %v5414_v29 = vpack.c.bf16 %v5365_v17, %v5364_v13 }
 0x4ac   :  { %v5306_v45 = vadd.f32 %v7533_v41, %v8766_v34  ;;  %v7535_v2 = vadd.f32 %v7376_v43, %v8753_v49  ;;  %v5077_v15 = vpop.f32.mrb[63].mxu1  ;;  %v9072_v41 = vld [vmem:[#allocation13_spill] sm:$0xff]  ;;  %v9073_v43 = vld [vmem:[#allocation14_spill] sm:$0xff] }
 0x4ad   :  { %v5304_v37 = vadd.f32 %v7534_v11, %v8766_v34  ;;  %v7536_v40 = vadd.f32 %v5077_v15, %v8758_v9  ;;  %7449 = vmatprep.mubr.bf16.mxu0 %v5414_v29 }
 0x4ae   :  { %v5307_v20 = vadd.f32 %v7535_v2, %v8766_v34  ;;  %7450 = vmatmul.mubr.bf16.gmra.mrb[156].mxu0 %v5415_v3  ;;  %v5370_v23 = vmax.f32 %v5306_v45, 0.0 }
 0x4af   :  { %v5305_v28 = vadd.f32 %v7536_v40, %v8766_v34  ;;  %v5368_v58 = vmax.f32 %v5304_v37, 0.0 }
 0x4b0   :  { %v5371_v50 = vmax.f32 %v5307_v20, 0.0 }
 0x4b1   :  { %v5369_v55 = vmax.f32 %v5305_v28, 0.0  ;;  %v7379_v33 = vpop.f32.mrb[0].mxu1  ;;  %v9074_v28 = vld [vmem:[#allocation15_spill] sm:$0xff] }
 0x4b2   :  { %v7537_v44 = vadd.f32 %v7379_v33, %v8611_v24  ;;  %v5090_v32 = vpop.f32.mrb[1].mxu1  ;;  %v5417_v49 = vpack.c.bf16 %v5371_v50, %v5370_v23 }
 0x4b3   :  { %v7538_v7 = vadd.f32 %v5090_v32, %v8613_v4  ;;  %v7380_v63 = vpop.f32.mrb[2].mxu1  ;;  %v5416_v48 = vpack.c.bf16 %v5369_v55, %v5368_v58  ;;  %v9075_v55 = vld [vmem:[#allocation16_spill] sm:$0xff] }
 0x4b4   :  { %v5310_v9 = vadd.f32 %v7537_v44, %v8766_v34  ;;  %v7539_v12 = vadd.f32 %v7380_v63, %v8615_v18  ;;  %v5093_v57 = vpop.f32.mrb[3].mxu1 }
 0x4b5   :  { %v5308_v22 = vadd.f32 %v7538_v7, %v8766_v34  ;;  %v7540_v39 = vadd.f32 %v5093_v57, %v8617_v35  ;;  %7453 = vmatprep.mubr.bf16.mxu0 %v5416_v48  ;;  %v9076_v7 = vld [vmem:[#allocation17_spill] sm:$0xff] }
 0x4b6   :  { %v5311_v25 = vadd.f32 %v7539_v12, %v8766_v34  ;;  %7454 = vmatmul.mubr.bf16.gmra.mrb[160].mxu0 %v5417_v49  ;;  %v5374_v38 = vmax.f32 %v5310_v9, 0.0  ;;  %v9077_v12 = vld [vmem:[#allocation18_spill] sm:$0xff] }
 0x4b7   :  { %v5309_v24 = vadd.f32 %v7540_v39, %v8766_v34  ;;  %v5372_v4 = vmax.f32 %v5308_v22, 0.0 }
 0x4b8   :  { %v5375_v19 = vmax.f32 %v5311_v25, 0.0 }
 0x4b9   :  { %v5373_v6 = vmax.f32 %v5309_v24, 0.0  ;;  %v7383_v0 = vpop.f32.mrb[4].mxu1 }
 0x4ba   :  { %v7541_v26 = vadd.f32 %v7383_v0, %v8619_v61  ;;  %v5106_v46 = vpop.f32.mrb[5].mxu1  ;;  %v5419_v18 = vpack.c.bf16 %v5375_v19, %v5374_v38 }
 0x4bb   :  { %v7542_v52 = vadd.f32 %v5106_v46, %v8621_v16  ;;  %v7384_v56 = vpop.f32.mrb[6].mxu1  ;;  %v5418_v27 = vpack.c.bf16 %v5373_v6, %v5372_v4  ;;  %v9078_v6 = vld [vmem:[#allocation19_spill] sm:$0xff] }
 0x4bc   :  { %v5314_v35 = vadd.f32 %v7541_v26, %v8766_v34  ;;  %v7543_v42 = vadd.f32 %v7384_v56, %v8623_v21  ;;  %v5109_v31 = vpop.f32.mrb[7].mxu1 }
 0x4bd   :  { %v5312_v60 = vadd.f32 %v7542_v52, %v8766_v34  ;;  %v7544_v59 = vadd.f32 %v5109_v31, %v8625_v1  ;;  %7457 = vmatprep.mubr.bf16.mxu0 %v5418_v27 }
 0x4be   :  { %v5315_v54 = vadd.f32 %v7543_v42, %v8766_v34  ;;  %7458 = vmatmul.mubr.bf16.gmra.mrb[164].mxu0 %v5419_v18  ;;  %v5378_v53 = vmax.f32 %v5314_v35, 0.0  ;;  %v9079_v18 = vld [vmem:[#allocation20_spill] sm:$0xff]  ;;  %v9080_v42 = vld [vmem:[#allocation21_spill] sm:$0xff] }
 0x4bf   :  { %v5313_v61 = vadd.f32 %v7544_v59, %v8766_v34  ;;  %v5376_v16 = vmax.f32 %v5312_v60, 0.0 }
 0x4c0   :  { %v5379_v8 = vmax.f32 %v5315_v54, 0.0  ;;  %v9081_v54 = vld [vmem:[#allocation22_spill] sm:$0xff] }
 0x4c1   :  { %v5377_v30 = vmax.f32 %v5313_v61, 0.0  ;;  %v7387_v62 = vpop.f32.mrb[8].mxu1 }
 0x4c2   :  { %v7545_v14 = vadd.f32 %v7387_v62, %v8627_v51  ;;  %v5122_v36 = vpop.f32.mrb[9].mxu1  ;;  %v5421_v21 = vpack.c.bf16 %v5379_v8, %v5378_v53 }
 0x4c3   :  { %v7546_v13 = vadd.f32 %v5122_v36, %v9071_v5  ;;  %v7388_v17 = vpop.f32.mrb[10].mxu1  ;;  %v5420_v10 = vpack.c.bf16 %v5377_v30, %v5376_v16 }
 0x4c4   :  { %v5318_v1 = vadd.f32 %v7545_v14, %v8766_v34  ;;  %v7547_v47 = vadd.f32 %v7388_v17, %v9072_v41  ;;  %v5125_v3 = vpop.f32.mrb[11].mxu1 }
 0x4c5   :  { %v5316_v11 = vadd.f32 %v7546_v13, %v8766_v34  ;;  %v7548_v29 = vadd.f32 %v5125_v3, %v9073_v43  ;;  %7461 = vmatprep.mubr.bf16.mxu0 %v5420_v10  ;;  %v9083_v10 = vld [vmem:[#allocation24_spill] sm:$0xff] }
 0x4c6   :  { %v5319_v45 = vadd.f32 %v7547_v47, %v8766_v34  ;;  %7462 = vmatmul.mubr.bf16.gmra.mrb[168].mxu0 %v5421_v21  ;;  %v5382_v2 = vmax.f32 %v5318_v1, 0.0  ;;  %v9082_v21 = vld [vmem:[#allocation23_spill] sm:$0xff] }
 0x4c7   :  { %v5317_v51 = vadd.f32 %v7548_v29, %v8766_v34  ;;  %v5380_v37 = vmax.f32 %v5316_v11, 0.0  ;;  %v9084_v11 = vld [vmem:[#allocation25_spill] sm:$0xff] }
 0x4c8   :  { %v5383_v15 = vmax.f32 %v5319_v45, 0.0 }
 0x4c9   :  { %v5381_v40 = vmax.f32 %v5317_v51, 0.0  ;;  %v7391_v20 = vpop.f32.mrb[12].mxu1  ;;  %v9085_v51 = vld [vmem:[#allocation26_spill] sm:$0xff] }
 0x4ca   :  { %v7549_v23 = vadd.f32 %v7391_v20, %v9074_v28  ;;  %v5138_v50 = vpop.f32.mrb[13].mxu1  ;;  %v5423_v58 = vpack.c.bf16 %v5383_v15, %v5382_v2 }
 0x4cb   :  { %v7550_v33 = vadd.f32 %v5138_v50, %v9075_v55  ;;  %v7392_v44 = vpop.f32.mrb[14].mxu1  ;;  %v5422_v32 = vpack.c.bf16 %v5381_v40, %v5380_v37 }
 0x4cc   :  { %v5322_v49 = vadd.f32 %v7549_v23, %v8766_v34  ;;  %v7551_v63 = vadd.f32 %v7392_v44, %v9076_v7  ;;  %v5141_v48 = vpop.f32.mrb[15].mxu1 }
 0x4cd   :  { %v5320_v9 = vadd.f32 %v7550_v33, %v8766_v34  ;;  %v7552_v57 = vadd.f32 %v5141_v48, %v9077_v12  ;;  %7465 = vmatprep.mubr.bf16.mxu0 %v5422_v32  ;;  %v9087_v32 = vld [vmem:[#allocation28_spill] sm:$0xff] }
 0x4ce   :  { %v5323_v22 = vadd.f32 %v7551_v63, %v8766_v34  ;;  %7466 = vmatmul.mubr.bf16.gmra.mrb[172].mxu0 %v5423_v58  ;;  %v5386_v25 = vmax.f32 %v5322_v49, 0.0  ;;  %v9086_v58 = vld [vmem:[#allocation27_spill] sm:$0xff] }
 0x4cf   :  { %v5321_v39 = vadd.f32 %v7552_v57, %v8766_v34  ;;  %v5384_v38 = vmax.f32 %v5320_v9, 0.0  ;;  %v9088_v9 = vld [vmem:[#allocation29_spill] sm:$0xff] }
 0x4d0   :  { %v5387_v24 = vmax.f32 %v5323_v22, 0.0 }
 0x4d1   :  { %v5385_v19 = vmax.f32 %v5321_v39, 0.0  ;;  %v7395_v4 = vpop.f32.mrb[16].mxu1  ;;  %v9089_v39 = vld [vmem:[#allocation30_spill] sm:$0xff] }
 0x4d2   :  { %v7553_v0 = vadd.f32 %v7395_v4, %v9078_v6  ;;  %v5154_v26 = vpop.f32.mrb[17].mxu1  ;;  %v5425_v46 = vpack.c.bf16 %v5387_v24, %v5386_v25 }
 0x4d3   :  { %v7554_v52 = vadd.f32 %v5154_v26, %v9079_v18  ;;  %v7396_v56 = vpop.f32.mrb[18].mxu1  ;;  %v5424_v27 = vpack.c.bf16 %v5385_v19, %v5384_v38  ;;  %v8899_v18 = vld [vmem:[%s9050_s6] ss:$0 sm:$0xff]  ;;  %s8192_s6 = smov [#allocation8]  }
 0x4d4   :  { %v5326_v35 = vadd.f32 %v7553_v0, %v8766_v34  ;;  %v7555_v31 = vadd.f32 %v7396_v56, %v9080_v42  ;;  %v5157_v60 = vpop.f32.mrb[19].mxu1  ;;  %s6053_s27 = sshll.u32 %s8192_s6, 4  ;;  %s6054_s27 = int_to_ptr.vmem [resolvable:$true] %s6053_s27 }
 0x4d5   :  { %v5324_v59 = vadd.f32 %v7554_v52, %v8766_v34  ;;  %v7556_v61 = vadd.f32 %v5157_v60, %v9081_v54  ;;  %7469 = vmatprep.mubr.bf16.mxu0 %v5424_v27  ;;  %v5450_v52 = vld [vmem:[#allocation3 + $0x10] sm:$0xff]  ;;  %s8157_s28 = scalar_lea.vmem %s6054_s27, 8192  ;;  %p8162_p3 = scmp.lt.s32.totalorder %s6054_s27, %s6054_s27 }
 0x4d6   :  { %v5327_v53 = vadd.f32 %v7555_v31, %v8766_v34  ;;  %7470 = vmatmul.mubr.bf16.gmra.mrb[176].mxu0 %v5425_v46  ;;  %v5390_v16 = vmax.f32 %v5326_v35, 0.0  ;;  %v5448_v35 = vld [vmem:[#allocation3] sm:$0xff]  ;;  %v5451_v31 = vld [vmem:[#allocation3 + $0x18] sm:$0xff]  ;;  %p8158_p2 = scmp.ne.s32.totalorder %s6054_s27, %s8157_s28  ;;  %p8163_p4 = scmp.lt.s32.totalorder %s8157_s28, %s8157_s28 }
 0x4d7   :  { %v5325_v8 = vadd.f32 %v7556_v61, %v8766_v34  ;;  %v5388_v62 = vmax.f32 %v5324_v59, 0.0  ;;  %v5449_v61 = vld [vmem:[#allocation3 + $0x8] sm:$0xff] }
 0x4d8   :  { %v5391_v30 = vmax.f32 %v5327_v53, 0.0  ;;  %p8164_p5 = por %p8163_p4, %p8162_p3 }
 0x4d9   :  { %v5389_v14 = vmax.f32 %v5325_v8, 0.0  ;;  %v7399_v36 = vpop.f32.mrb[20].mxu1 }
 0x4da   :  { %v7557_v5 = vadd.f32 %v7399_v36, %v9082_v21  ;;  %v5170_v13 = vpop.f32.mrb[21].mxu1  ;;  %v5427_v17 = vpack.c.bf16 %v5391_v30, %v5390_v16  ;;  %p8165_p6 = pnand %p8164_p5, %p8158_p2 }
 0x4db   :  { %v7558_v1 = vadd.f32 %v5170_v13, %v9083_v10  ;;  %v7400_v41 = vpop.f32.mrb[22].mxu1  ;;  %v5426_v47 = vpack.c.bf16 %v5389_v14, %v5388_v62  ;;  %v5454_v13 = vld [vmem:[#allocation3 + $0x30] sm:$0xff] }
 0x4dc   :  { %v5330_v3 = vadd.f32 %v7557_v5, %v8766_v34  ;;  %v7559_v43 = vadd.f32 %v7400_v41, %v9084_v11  ;;  %v5173_v29 = vpop.f32.mrb[23].mxu1 }
 0x4dd   :  { %v5328_v45 = vadd.f32 %v7558_v1, %v8766_v34  ;;  %v7560_v2 = vadd.f32 %v5173_v29, %v9085_v51  ;;  %7473 = vmatprep.mubr.bf16.mxu0 %v5426_v47  ;;  %v5452_v1 = vld [vmem:[#allocation3 + $0x20] sm:$0xff] }
 0x4de   :  { %v5331_v15 = vadd.f32 %v7559_v43, %v8766_v34  ;;  %7474 = vmatmul.mubr.bf16.gmra.mrb[180].mxu0 %v5427_v17  ;;  %v5394_v40 = vmax.f32 %v5330_v3, 0.0  ;;  %v5455_v3 = vld [vmem:[#allocation3 + $0x38] sm:$0xff] }
 0x4df   :  { %v5329_v37 = vadd.f32 %v7560_v2, %v8766_v34  ;;  %v5392_v28 = vmax.f32 %v5328_v45, 0.0  ;;  %v5453_v45 = vld [vmem:[#allocation3 + $0x28] sm:$0xff] }
 0x4e0   :  { %v5395_v20 = vmax.f32 %v5331_v15, 0.0 }
 0x4e1   :  { %v5393_v23 = vmax.f32 %v5329_v37, 0.0  ;;  %v7403_v50 = vpop.f32.mrb[24].mxu1 }
 0x4e2   :  { %v7561_v55 = vadd.f32 %v7403_v50, %v9086_v58  ;;  %v5186_v33 = vpop.f32.mrb[25].mxu1  ;;  %v5429_v44 = vpack.c.bf16 %v5395_v20, %v5394_v40  ;;  %v5458_v58 = vld [vmem:[#allocation3 + $0x50] sm:$0xff] }
 0x4e3   :  { %v7562_v49 = vadd.f32 %v5186_v33, %v9087_v32  ;;  %v7404_v7 = vpop.f32.mrb[26].mxu1  ;;  %v5428_v63 = vpack.c.bf16 %v5393_v23, %v5392_v28 }
 0x4e4   :  { %v5334_v48 = vadd.f32 %v7561_v55, %v8766_v34  ;;  %v7563_v12 = vadd.f32 %v7404_v7, %v9088_v9  ;;  %v5189_v57 = vpop.f32.mrb[27].mxu1  ;;  %v5459_v7 = vld [vmem:[#allocation3 + $0x58] sm:$0xff] }
 0x4e5   :  { %v5332_v22 = vadd.f32 %v7562_v49, %v8766_v34  ;;  %v7564_v25 = vadd.f32 %v5189_v57, %v9089_v39  ;;  %7477 = vmatprep.mubr.bf16.mxu0 %v5428_v63 }
 0x4e6   :  { %v5335_v24 = vadd.f32 %v7563_v12, %v8766_v34  ;;  %7478 = vmatmul.mubr.bf16.gmra.mrb[184].mxu0 %v5429_v44  ;;  %v5398_v19 = vmax.f32 %v5334_v48, 0.0  ;;  %v5456_v44 = vld [vmem:[#allocation3 + $0x40] sm:$0xff]  ;;  %v5457_v12 = vld [vmem:[#allocation3 + $0x48] sm:$0xff] }
 0x4e7   :  { %v5333_v38 = vadd.f32 %v7564_v25, %v8766_v34  ;;  %v5396_v6 = vmax.f32 %v5332_v22, 0.0 }
 0x4e8   :  { %v5399_v4 = vmax.f32 %v5335_v24, 0.0 }
 0x4e9   :  { %v5397_v0 = vmax.f32 %v5333_v38, 0.0 }
 0x4ea   :  { %v5431_v26 = vpack.c.bf16 %v5399_v4, %v5398_v19 }
 0x4eb   :  { %v5430_v46 = vpack.c.bf16 %v5397_v0, %v5396_v6  ;;  %v5462_v0 = vld [vmem:[#allocation3 + $0x70] sm:$0xff] }
 0x4ed   :  { %7481 = vmatprep.mubr.bf16.mxu0 %v5430_v46 }
 0x4ee   :  { %7482 = vmatmul.mubr.bf16.gmra.mrb[188].mxu0 %v5431_v26 }
 0x549   :  { %v7423_v56 = vpop.f32.mrb[128].mxu0 }
 0x54a   :  { %v5610_v27 = vadd.f32 %v7423_v56, %v8899_v18  ;;  %v5601_v42 = vpop.f32.mrb[129].mxu0 }
 0x54b   :  { %v5602_v34 = vadd.f32 %v8899_v18, %v5601_v42  ;;  %v7424_v60 = vpop.f32.mrb[130].mxu0 }
 0x54c   :  { %v5858_v59 = vadd.f32 %v5610_v27, %v5450_v52  ;;  %v5613_v54 = vadd.f32 %v7424_v60, %v8899_v18  ;;  %v5604_v53 = vpop.f32.mrb[131].mxu0  ;;  %v5460_v52 = vld [vmem:[#allocation3 + $0x60] sm:$0xff]  ;;  %v5461_v60 = vld [vmem:[#allocation3 + $0x68] sm:$0xff] }
 0x54d   :  { %v5856_v8 = vadd.f32 %v5602_v34, %v5448_v35  ;;  %v5605_v16 = vadd.f32 %v8899_v18, %v5604_v53  ;;  %v5463_v35 = vld [vmem:[#allocation3 + $0x78] sm:$0xff] }
 0x54e   :  { %v5922_v30 = vmax.f32 %v5858_v59, 0.0  ;;  %v5859_v62 = vadd.f32 %v5613_v54, %v5451_v31 }
 0x54f   :  { %v5920_v14 = vmax.f32 %v5856_v8, 0.0  ;;  %v5857_v36 = vadd.f32 %v5605_v16, %v5449_v61 }
 0x550   :  { %5986 = vst.msk [vmem:[#allocation8 + $0x10] sm:$0xff] %vm175_vm0, %v5922_v30  ;;  %v5923_v21 = vmax.f32 %v5859_v62, 0.0 }
 0x551   :  { %5984 = vst.msk [vmem:[#allocation8] sm:$0xff] %vm175_vm0, %v5920_v14  ;;  %v5921_v5 = vmax.f32 %v5857_v36, 0.0  ;;  %v7427_v17 = vpop.f32.mrb[132].mxu0  ;;  %v5466_v36 = vld [vmem:[#allocation3 + $0x90] sm:$0xff] }
 0x552   :  { %5987 = vst.msk [vmem:[#allocation8 + $0x18] sm:$0xff] %vm175_vm0, %v5923_v21  ;;  %v5626_v10 = vadd.f32 %v7427_v17, %v8899_v18  ;;  %v5617_v41 = vpop.f32.mrb[133].mxu0 }
 0x553   :  { %5985 = vst.msk [vmem:[#allocation8 + $0x8] sm:$0xff] %vm175_vm0, %v5921_v5  ;;  %v5618_v47 = vadd.f32 %v8899_v18, %v5617_v41  ;;  %v7428_v11 = vpop.f32.mrb[134].mxu0 }
 0x554   :  { %v5862_v43 = vadd.f32 %v5626_v10, %v5454_v13  ;;  %v5629_v29 = vadd.f32 %v7428_v11, %v8899_v18  ;;  %v5620_v51 = vpop.f32.mrb[135].mxu0  ;;  %v5464_v13 = vld [vmem:[#allocation3 + $0x80] sm:$0xff]  ;;  %v5465_v11 = vld [vmem:[#allocation3 + $0x88] sm:$0xff] }
 0x555   :  { %v5860_v2 = vadd.f32 %v5618_v47, %v5452_v1  ;;  %v5621_v15 = vadd.f32 %v8899_v18, %v5620_v51  ;;  %v5467_v1 = vld [vmem:[#allocation3 + $0x98] sm:$0xff] }
 0x556   :  { %v5926_v37 = vmax.f32 %v5862_v43, 0.0  ;;  %v5863_v40 = vadd.f32 %v5629_v29, %v5455_v3 }
 0x557   :  { %v5924_v20 = vmax.f32 %v5860_v2, 0.0  ;;  %v5861_v28 = vadd.f32 %v5621_v15, %v5453_v45 }
 0x558   :  { %5990 = vst.msk [vmem:[#allocation8 + $0x30] sm:$0xff] %vm175_vm0, %v5926_v37  ;;  %v5927_v23 = vmax.f32 %v5863_v40, 0.0 }
 0x559   :  { %5988 = vst.msk [vmem:[#allocation8 + $0x20] sm:$0xff] %vm175_vm0, %v5924_v20  ;;  %v5925_v50 = vmax.f32 %v5861_v28, 0.0  ;;  %v7431_v55 = vpop.f32.mrb[136].mxu0  ;;  %v5470_v28 = vld [vmem:[#allocation3 + $0xb0] sm:$0xff] }
 0x55a   :  { %5991 = vst.msk [vmem:[#allocation8 + $0x38] sm:$0xff] %vm175_vm0, %v5927_v23  ;;  %v5642_v33 = vadd.f32 %v7431_v55, %v8899_v18  ;;  %v5633_v32 = vpop.f32.mrb[137].mxu0 }
 0x55b   :  { %5989 = vst.msk [vmem:[#allocation8 + $0x28] sm:$0xff] %vm175_vm0, %v5925_v50  ;;  %v5634_v49 = vadd.f32 %v8899_v18, %v5633_v32  ;;  %v7432_v63 = vpop.f32.mrb[138].mxu0 }
 0x55c   :  { %v5866_v48 = vadd.f32 %v5642_v33, %v5458_v58  ;;  %v5645_v9 = vadd.f32 %v7432_v63, %v8899_v18  ;;  %v5636_v57 = vpop.f32.mrb[139].mxu0  ;;  %v5468_v58 = vld [vmem:[#allocation3 + $0xa0] sm:$0xff]  ;;  %v5469_v63 = vld [vmem:[#allocation3 + $0xa8] sm:$0xff] }
 0x55d   :  { %v5864_v22 = vadd.f32 %v5634_v49, %v5456_v44  ;;  %v5637_v39 = vadd.f32 %v8899_v18, %v5636_v57  ;;  %v5471_v44 = vld [vmem:[#allocation3 + $0xb8] sm:$0xff] }
 0x55e   :  { %v5930_v25 = vmax.f32 %v5866_v48, 0.0  ;;  %v5867_v24 = vadd.f32 %v5645_v9, %v5459_v7 }
 0x55f   :  { %v5928_v38 = vmax.f32 %v5864_v22, 0.0  ;;  %v5865_v19 = vadd.f32 %v5637_v39, %v5457_v12 }
 0x560   :  { %5994 = vst.msk [vmem:[#allocation8 + $0x50] sm:$0xff] %vm175_vm0, %v5930_v25  ;;  %v5931_v4 = vmax.f32 %v5867_v24, 0.0 }
 0x561   :  { %5992 = vst.msk [vmem:[#allocation8 + $0x40] sm:$0xff] %vm175_vm0, %v5928_v38  ;;  %v5929_v6 = vmax.f32 %v5865_v19, 0.0  ;;  %v7435_v26 = vpop.f32.mrb[140].mxu0  ;;  %v5474_v19 = vld [vmem:[#allocation3 + $0xd0] sm:$0xff] }
 0x562   :  { %5995 = vst.msk [vmem:[#allocation8 + $0x58] sm:$0xff] %vm175_vm0, %v5931_v4  ;;  %v5658_v46 = vadd.f32 %v7435_v26, %v8899_v18  ;;  %v5649_v56 = vpop.f32.mrb[141].mxu0 }
 0x563   :  { %5993 = vst.msk [vmem:[#allocation8 + $0x48] sm:$0xff] %vm175_vm0, %v5929_v6  ;;  %v5650_v27 = vadd.f32 %v8899_v18, %v5649_v56  ;;  %v7436_v42 = vpop.f32.mrb[142].mxu0 }
 0x564   :  { %v5870_v34 = vadd.f32 %v5658_v46, %v5462_v0  ;;  %v5661_v31 = vadd.f32 %v7436_v42, %v8899_v18  ;;  %v5652_v59 = vpop.f32.mrb[143].mxu0  ;;  %v5472_v0 = vld [vmem:[#allocation3 + $0xc0] sm:$0xff]  ;;  %v5473_v42 = vld [vmem:[#allocation3 + $0xc8] sm:$0xff] }
 0x565   :  { %v5868_v54 = vadd.f32 %v5650_v27, %v5460_v52  ;;  %v5653_v61 = vadd.f32 %v8899_v18, %v5652_v59  ;;  %v5475_v52 = vld [vmem:[#allocation3 + $0xd8] sm:$0xff] }
 0x566   :  { %v5934_v53 = vmax.f32 %v5870_v34, 0.0  ;;  %v5871_v8 = vadd.f32 %v5661_v31, %v5463_v35 }
 0x567   :  { %v5932_v16 = vmax.f32 %v5868_v54, 0.0  ;;  %v5869_v30 = vadd.f32 %v5653_v61, %v5461_v60 }
 0x568   :  { %5998 = vst.msk [vmem:[#allocation8 + $0x70] sm:$0xff] %vm175_vm0, %v5934_v53  ;;  %v5935_v62 = vmax.f32 %v5871_v8, 0.0 }
 0x569   :  { %5996 = vst.msk [vmem:[#allocation8 + $0x60] sm:$0xff] %vm175_vm0, %v5932_v16  ;;  %v5933_v14 = vmax.f32 %v5869_v30, 0.0  ;;  %v7439_v21 = vpop.f32.mrb[144].mxu0  ;;  %v5478_v30 = vld [vmem:[#allocation3 + $0xf0] sm:$0xff] }
 0x56a   :  { %5999 = vst.msk [vmem:[#allocation8 + $0x78] sm:$0xff] %vm175_vm0, %v5935_v62  ;;  %v5674_v5 = vadd.f32 %v7439_v21, %v8899_v18  ;;  %v5665_v17 = vpop.f32.mrb[145].mxu0 }
 0x56b   :  { %5997 = vst.msk [vmem:[#allocation8 + $0x68] sm:$0xff] %vm175_vm0, %v5933_v14  ;;  %v5666_v10 = vadd.f32 %v8899_v18, %v5665_v17  ;;  %v7440_v41 = vpop.f32.mrb[146].mxu0 }
 0x56c   :  { %v5874_v47 = vadd.f32 %v5674_v5, %v5466_v36  ;;  %v5677_v3 = vadd.f32 %v7440_v41, %v8899_v18  ;;  %v5668_v43 = vpop.f32.mrb[147].mxu0  ;;  %v5476_v36 = vld [vmem:[#allocation3 + $0xe0] sm:$0xff]  ;;  %v5477_v41 = vld [vmem:[#allocation3 + $0xe8] sm:$0xff] }
 0x56d   :  { %v5872_v29 = vadd.f32 %v5666_v10, %v5464_v13  ;;  %v5669_v45 = vadd.f32 %v8899_v18, %v5668_v43  ;;  %v5479_v13 = vld [vmem:[#allocation3 + $0xf8] sm:$0xff] }
 0x56e   :  { %v5938_v51 = vmax.f32 %v5874_v47, 0.0  ;;  %v5875_v2 = vadd.f32 %v5677_v3, %v5467_v1 }
 0x56f   :  { %v5936_v15 = vmax.f32 %v5872_v29, 0.0  ;;  %v5873_v37 = vadd.f32 %v5669_v45, %v5465_v11 }
 0x570   :  { %6002 = vst.msk [vmem:[#allocation8 + $0x90] sm:$0xff] %vm175_vm0, %v5938_v51  ;;  %v5939_v40 = vmax.f32 %v5875_v2, 0.0 }
 0x571   :  { %6000 = vst.msk [vmem:[#allocation8 + $0x80] sm:$0xff] %vm175_vm0, %v5936_v15  ;;  %v5937_v20 = vmax.f32 %v5873_v37, 0.0  ;;  %v7443_v23 = vpop.f32.mrb[148].mxu0  ;;  %v5482_v37 = vld [vmem:[#allocation3 + $0x110] sm:$0xff] }
 0x572   :  { %6003 = vst.msk [vmem:[#allocation8 + $0x98] sm:$0xff] %vm175_vm0, %v5939_v40  ;;  %v5690_v50 = vadd.f32 %v7443_v23, %v8899_v18  ;;  %v5681_v55 = vpop.f32.mrb[149].mxu0 }
 0x573   :  { %6001 = vst.msk [vmem:[#allocation8 + $0x88] sm:$0xff] %vm175_vm0, %v5937_v20  ;;  %v5682_v33 = vadd.f32 %v8899_v18, %v5681_v55  ;;  %v7444_v32 = vpop.f32.mrb[150].mxu0 }
 0x574   :  { %v5878_v49 = vadd.f32 %v5690_v50, %v5470_v28  ;;  %v5693_v7 = vadd.f32 %v7444_v32, %v8899_v18  ;;  %v5684_v48 = vpop.f32.mrb[151].mxu0  ;;  %v5480_v28 = vld [vmem:[#allocation3 + $0x100] sm:$0xff]  ;;  %v5481_v32 = vld [vmem:[#allocation3 + $0x108] sm:$0xff] }
 0x575   :  { %v5876_v9 = vadd.f32 %v5682_v33, %v5468_v58  ;;  %v5685_v12 = vadd.f32 %v8899_v18, %v5684_v48  ;;  %v5483_v58 = vld [vmem:[#allocation3 + $0x118] sm:$0xff] }
 0x576   :  { %v5942_v57 = vmax.f32 %v5878_v49, 0.0  ;;  %v5879_v22 = vadd.f32 %v5693_v7, %v5471_v44 }
 0x577   :  { %v5940_v39 = vmax.f32 %v5876_v9, 0.0  ;;  %v5877_v25 = vadd.f32 %v5685_v12, %v5469_v63 }
 0x578   :  { %6006 = vst.msk [vmem:[#allocation8 + $0xb0] sm:$0xff] %vm175_vm0, %v5942_v57  ;;  %v5943_v24 = vmax.f32 %v5879_v22, 0.0 }
 0x579   :  { %6004 = vst.msk [vmem:[#allocation8 + $0xa0] sm:$0xff] %vm175_vm0, %v5940_v39  ;;  %v5941_v38 = vmax.f32 %v5877_v25, 0.0  ;;  %v7447_v4 = vpop.f32.mrb[152].mxu0  ;;  %v5486_v25 = vld [vmem:[#allocation3 + $0x130] sm:$0xff] }
 0x57a   :  { %6007 = vst.msk [vmem:[#allocation8 + $0xb8] sm:$0xff] %vm175_vm0, %v5943_v24  ;;  %v5706_v6 = vadd.f32 %v7447_v4, %v8899_v18  ;;  %v5697_v26 = vpop.f32.mrb[153].mxu0 }
 0x57b   :  { %6005 = vst.msk [vmem:[#allocation8 + $0xa8] sm:$0xff] %vm175_vm0, %v5941_v38  ;;  %v5698_v46 = vadd.f32 %v8899_v18, %v5697_v26  ;;  %v7448_v56 = vpop.f32.mrb[154].mxu0 }
 0x57c   :  { %v5882_v27 = vadd.f32 %v5706_v6, %v5474_v19  ;;  %v5709_v35 = vadd.f32 %v7448_v56, %v8899_v18  ;;  %v5700_v34 = vpop.f32.mrb[155].mxu0  ;;  %v5484_v19 = vld [vmem:[#allocation3 + $0x120] sm:$0xff]  ;;  %v5485_v56 = vld [vmem:[#allocation3 + $0x128] sm:$0xff] }
 0x57d   :  { %v5880_v31 = vadd.f32 %v5698_v46, %v5472_v0  ;;  %v5701_v60 = vadd.f32 %v8899_v18, %v5700_v34  ;;  %v5487_v0 = vld [vmem:[#allocation3 + $0x138] sm:$0xff] }
 0x57e   :  { %v5946_v59 = vmax.f32 %v5882_v27, 0.0  ;;  %v5883_v54 = vadd.f32 %v5709_v35, %v5475_v52 }
 0x57f   :  { %v5944_v61 = vmax.f32 %v5880_v31, 0.0  ;;  %v5881_v53 = vadd.f32 %v5701_v60, %v5473_v42 }
 0x580   :  { %6010 = vst.msk [vmem:[#allocation8 + $0xd0] sm:$0xff] %vm175_vm0, %v5946_v59  ;;  %v5947_v8 = vmax.f32 %v5883_v54, 0.0 }
 0x581   :  { %6008 = vst.msk [vmem:[#allocation8 + $0xc0] sm:$0xff] %vm175_vm0, %v5944_v61  ;;  %v5945_v16 = vmax.f32 %v5881_v53, 0.0  ;;  %v7451_v62 = vpop.f32.mrb[156].mxu0  ;;  %v5490_v53 = vld [vmem:[#allocation3 + $0x150] sm:$0xff] }
 0x582   :  { %6011 = vst.msk [vmem:[#allocation8 + $0xd8] sm:$0xff] %vm175_vm0, %v5947_v8  ;;  %v5722_v14 = vadd.f32 %v7451_v62, %v8899_v18  ;;  %v5713_v21 = vpop.f32.mrb[157].mxu0 }
 0x583   :  { %6009 = vst.msk [vmem:[#allocation8 + $0xc8] sm:$0xff] %vm175_vm0, %v5945_v16  ;;  %v5714_v5 = vadd.f32 %v8899_v18, %v5713_v21  ;;  %v7452_v17 = vpop.f32.mrb[158].mxu0 }
 0x584   :  { %v5886_v10 = vadd.f32 %v5722_v14, %v5478_v30  ;;  %v5725_v1 = vadd.f32 %v7452_v17, %v8899_v18  ;;  %v5716_v47 = vpop.f32.mrb[159].mxu0  ;;  %v5488_v30 = vld [vmem:[#allocation3 + $0x140] sm:$0xff]  ;;  %v5489_v17 = vld [vmem:[#allocation3 + $0x148] sm:$0xff] }
 0x585   :  { %v5884_v3 = vadd.f32 %v5714_v5, %v5476_v36  ;;  %v5717_v11 = vadd.f32 %v8899_v18, %v5716_v47  ;;  %v5491_v36 = vld [vmem:[#allocation3 + $0x158] sm:$0xff] }
 0x586   :  { %v5950_v43 = vmax.f32 %v5886_v10, 0.0  ;;  %v5887_v29 = vadd.f32 %v5725_v1, %v5479_v13 }
 0x587   :  { %v5948_v45 = vmax.f32 %v5884_v3, 0.0  ;;  %v5885_v51 = vadd.f32 %v5717_v11, %v5477_v41 }
 0x588   :  { %6014 = vst.msk [vmem:[#allocation8 + $0xf0] sm:$0xff] %vm175_vm0, %v5950_v43  ;;  %v5951_v2 = vmax.f32 %v5887_v29, 0.0 }
 0x589   :  { %6012 = vst.msk [vmem:[#allocation8 + $0xe0] sm:$0xff] %vm175_vm0, %v5948_v45  ;;  %v5949_v15 = vmax.f32 %v5885_v51, 0.0  ;;  %v7455_v40 = vpop.f32.mrb[160].mxu0  ;;  %v5494_v51 = vld [vmem:[#allocation3 + $0x170] sm:$0xff] }
 0x58a   :  { %6015 = vst.msk [vmem:[#allocation8 + $0xf8] sm:$0xff] %vm175_vm0, %v5951_v2  ;;  %v5738_v20 = vadd.f32 %v7455_v40, %v8899_v18  ;;  %v5729_v23 = vpop.f32.mrb[161].mxu0 }
 0x58b   :  { %6013 = vst.msk [vmem:[#allocation8 + $0xe8] sm:$0xff] %vm175_vm0, %v5949_v15  ;;  %v5730_v50 = vadd.f32 %v8899_v18, %v5729_v23  ;;  %v7456_v55 = vpop.f32.mrb[162].mxu0 }
 0x58c   :  { %v5890_v33 = vadd.f32 %v5738_v20, %v5482_v37  ;;  %v5741_v44 = vadd.f32 %v7456_v55, %v8899_v18  ;;  %v5732_v49 = vpop.f32.mrb[163].mxu0  ;;  %v5492_v37 = vld [vmem:[#allocation3 + $0x160] sm:$0xff]  ;;  %v5493_v55 = vld [vmem:[#allocation3 + $0x168] sm:$0xff] }
 0x58d   :  { %v5888_v7 = vadd.f32 %v5730_v50, %v5480_v28  ;;  %v5733_v63 = vadd.f32 %v8899_v18, %v5732_v49  ;;  %v5495_v28 = vld [vmem:[#allocation3 + $0x178] sm:$0xff] }
 0x58e   :  { %v5954_v48 = vmax.f32 %v5890_v33, 0.0  ;;  %v5891_v9 = vadd.f32 %v5741_v44, %v5483_v58 }
 0x58f   :  { %v5952_v12 = vmax.f32 %v5888_v7, 0.0  ;;  %v5889_v57 = vadd.f32 %v5733_v63, %v5481_v32 }
 0x590   :  { %6018 = vst.msk [vmem:[#allocation8 + $0x110] sm:$0xff] %vm175_vm0, %v5954_v48  ;;  %v5955_v22 = vmax.f32 %v5891_v9, 0.0 }
 0x591   :  { %6016 = vst.msk [vmem:[#allocation8 + $0x100] sm:$0xff] %vm175_vm0, %v5952_v12  ;;  %v5953_v39 = vmax.f32 %v5889_v57, 0.0  ;;  %v7459_v24 = vpop.f32.mrb[164].mxu0  ;;  %v5498_v57 = vld [vmem:[#allocation3 + $0x190] sm:$0xff] }
 0x592   :  { %6019 = vst.msk [vmem:[#allocation8 + $0x118] sm:$0xff] %vm175_vm0, %v5955_v22  ;;  %v5754_v38 = vadd.f32 %v7459_v24, %v8899_v18  ;;  %v5745_v4 = vpop.f32.mrb[165].mxu0 }
 0x593   :  { %6017 = vst.msk [vmem:[#allocation8 + $0x108] sm:$0xff] %vm175_vm0, %v5953_v39  ;;  %v5746_v6 = vadd.f32 %v8899_v18, %v5745_v4  ;;  %v7460_v26 = vpop.f32.mrb[166].mxu0 }
 0x594   :  { %v5894_v46 = vadd.f32 %v5754_v38, %v5486_v25  ;;  %v5757_v52 = vadd.f32 %v7460_v26, %v8899_v18  ;;  %v5748_v27 = vpop.f32.mrb[167].mxu0  ;;  %v5496_v25 = vld [vmem:[#allocation3 + $0x180] sm:$0xff]  ;;  %v5497_v26 = vld [vmem:[#allocation3 + $0x188] sm:$0xff] }
 0x595   :  { %v5892_v35 = vadd.f32 %v5746_v6, %v5484_v19  ;;  %v5749_v42 = vadd.f32 %v8899_v18, %v5748_v27  ;;  %v5499_v19 = vld [vmem:[#allocation3 + $0x198] sm:$0xff] }
 0x596   :  { %v5958_v34 = vmax.f32 %v5894_v46, 0.0  ;;  %v5895_v31 = vadd.f32 %v5757_v52, %v5487_v0 }
 0x597   :  { %v5956_v60 = vmax.f32 %v5892_v35, 0.0  ;;  %v5893_v59 = vadd.f32 %v5749_v42, %v5485_v56 }
 0x598   :  { %6022 = vst.msk [vmem:[#allocation8 + $0x130] sm:$0xff] %vm175_vm0, %v5958_v34  ;;  %v5959_v54 = vmax.f32 %v5895_v31, 0.0 }
 0x599   :  { %6020 = vst.msk [vmem:[#allocation8 + $0x120] sm:$0xff] %vm175_vm0, %v5956_v60  ;;  %v5957_v61 = vmax.f32 %v5893_v59, 0.0  ;;  %v7463_v8 = vpop.f32.mrb[168].mxu0  ;;  %v5502_v59 = vld [vmem:[#allocation3 + $0x1b0] sm:$0xff] }
 0x59a   :  { %6023 = vst.msk [vmem:[#allocation8 + $0x138] sm:$0xff] %vm175_vm0, %v5959_v54  ;;  %v5770_v16 = vadd.f32 %v7463_v8, %v8899_v18  ;;  %v5761_v62 = vpop.f32.mrb[169].mxu0 }
 0x59b   :  { %6021 = vst.msk [vmem:[#allocation8 + $0x128] sm:$0xff] %vm175_vm0, %v5957_v61  ;;  %v5762_v14 = vadd.f32 %v8899_v18, %v5761_v62  ;;  %v7464_v21 = vpop.f32.mrb[170].mxu0 }
 0x59c   :  { %v5898_v5 = vadd.f32 %v5770_v16, %v5490_v53  ;;  %v5773_v13 = vadd.f32 %v7464_v21, %v8899_v18  ;;  %v5764_v10 = vpop.f32.mrb[171].mxu0  ;;  %v5500_v53 = vld [vmem:[#allocation3 + $0x1a0] sm:$0xff]  ;;  %v5501_v21 = vld [vmem:[#allocation3 + $0x1a8] sm:$0xff] }
 0x59d   :  { %v5896_v1 = vadd.f32 %v5762_v14, %v5488_v30  ;;  %v5765_v41 = vadd.f32 %v8899_v18, %v5764_v10  ;;  %v5503_v30 = vld [vmem:[#allocation3 + $0x1b8] sm:$0xff] }
 0x59e   :  { %v5962_v47 = vmax.f32 %v5898_v5, 0.0  ;;  %v5899_v3 = vadd.f32 %v5773_v13, %v5491_v36 }
 0x59f   :  { %v5960_v11 = vmax.f32 %v5896_v1, 0.0  ;;  %v5897_v43 = vadd.f32 %v5765_v41, %v5489_v17 }
 0x5a0   :  { %6026 = vst.msk [vmem:[#allocation8 + $0x150] sm:$0xff] %vm175_vm0, %v5962_v47  ;;  %v5963_v29 = vmax.f32 %v5899_v3, 0.0 }
 0x5a1   :  { %6024 = vst.msk [vmem:[#allocation8 + $0x140] sm:$0xff] %vm175_vm0, %v5960_v11  ;;  %v5961_v45 = vmax.f32 %v5897_v43, 0.0  ;;  %v7467_v2 = vpop.f32.mrb[172].mxu0  ;;  %v5506_v43 = vld [vmem:[#allocation3 + $0x1d0] sm:$0xff] }
 0x5a2   :  { %6027 = vst.msk [vmem:[#allocation8 + $0x158] sm:$0xff] %vm175_vm0, %v5963_v29  ;;  %v5786_v15 = vadd.f32 %v7467_v2, %v8899_v18  ;;  %v5777_v40 = vpop.f32.mrb[173].mxu0 }
 0x5a3   :  { %6025 = vst.msk [vmem:[#allocation8 + $0x148] sm:$0xff] %vm175_vm0, %v5961_v45  ;;  %v5778_v20 = vadd.f32 %v8899_v18, %v5777_v40  ;;  %v7468_v23 = vpop.f32.mrb[174].mxu0 }
 0x5a4   :  { %v5902_v50 = vadd.f32 %v5786_v15, %v5494_v51  ;;  %v5789_v58 = vadd.f32 %v7468_v23, %v8899_v18  ;;  %v5780_v33 = vpop.f32.mrb[175].mxu0  ;;  %v5504_v51 = vld [vmem:[#allocation3 + $0x1c0] sm:$0xff]  ;;  %v5505_v23 = vld [vmem:[#allocation3 + $0x1c8] sm:$0xff] }
 0x5a5   :  { %v5900_v44 = vadd.f32 %v5778_v20, %v5492_v37  ;;  %v5781_v32 = vadd.f32 %v8899_v18, %v5780_v33  ;;  %v5507_v37 = vld [vmem:[#allocation3 + $0x1d8] sm:$0xff] }
 0x5a6   :  { %v5966_v49 = vmax.f32 %v5902_v50, 0.0  ;;  %v5903_v7 = vadd.f32 %v5789_v58, %v5495_v28 }
 0x5a7   :  { %v5964_v63 = vmax.f32 %v5900_v44, 0.0  ;;  %v5901_v48 = vadd.f32 %v5781_v32, %v5493_v55 }
 0x5a8   :  { %6030 = vst.msk [vmem:[#allocation8 + $0x170] sm:$0xff] %vm175_vm0, %v5966_v49  ;;  %v5967_v9 = vmax.f32 %v5903_v7, 0.0 }
 0x5a9   :  { %6028 = vst.msk [vmem:[#allocation8 + $0x160] sm:$0xff] %vm175_vm0, %v5964_v63  ;;  %v5965_v12 = vmax.f32 %v5901_v48, 0.0  ;;  %v7471_v22 = vpop.f32.mrb[176].mxu0  ;;  %v5510_v48 = vld [vmem:[#allocation3 + $0x1f0] sm:$0xff] }
 0x5aa   :  { %6031 = vst.msk [vmem:[#allocation8 + $0x178] sm:$0xff] %vm175_vm0, %v5967_v9  ;;  %v5802_v39 = vadd.f32 %v7471_v22, %v8899_v18  ;;  %v5793_v24 = vpop.f32.mrb[177].mxu0 }
 0x5ab   :  { %6029 = vst.msk [vmem:[#allocation8 + $0x168] sm:$0xff] %vm175_vm0, %v5965_v12  ;;  %v5794_v38 = vadd.f32 %v8899_v18, %v5793_v24  ;;  %v7472_v4 = vpop.f32.mrb[178].mxu0 }
 0x5ac   :  { %v5906_v6 = vadd.f32 %v5802_v39, %v5498_v57  ;;  %v5805_v0 = vadd.f32 %v7472_v4, %v8899_v18  ;;  %v5796_v46 = vpop.f32.mrb[179].mxu0  ;;  %v5508_v57 = vld [vmem:[#allocation3 + $0x1e0] sm:$0xff]  ;;  %v5509_v4 = vld [vmem:[#allocation3 + $0x1e8] sm:$0xff] }
 0x5ad   :  { %v5904_v52 = vadd.f32 %v5794_v38, %v5496_v25  ;;  %v5797_v56 = vadd.f32 %v8899_v18, %v5796_v46  ;;  %v5511_v25 = vld [vmem:[#allocation3 + $0x1f8] sm:$0xff] }
 0x5ae   :  { %v5970_v27 = vmax.f32 %v5906_v6, 0.0  ;;  %v5907_v35 = vadd.f32 %v5805_v0, %v5499_v19 }
 0x5af   :  { %v5968_v42 = vmax.f32 %v5904_v52, 0.0  ;;  %v5905_v34 = vadd.f32 %v5797_v56, %v5497_v26 }
 0x5b0   :  { %6034 = vst.msk [vmem:[#allocation8 + $0x190] sm:$0xff] %vm175_vm0, %v5970_v27  ;;  %v5971_v31 = vmax.f32 %v5907_v35, 0.0 }
 0x5b1   :  { %6032 = vst.msk [vmem:[#allocation8 + $0x180] sm:$0xff] %vm175_vm0, %v5968_v42  ;;  %v5969_v60 = vmax.f32 %v5905_v34, 0.0  ;;  %v7475_v54 = vpop.f32.mrb[180].mxu0 }
 0x5b2   :  { %6035 = vst.msk [vmem:[#allocation8 + $0x198] sm:$0xff] %vm175_vm0, %v5971_v31  ;;  %v5818_v61 = vadd.f32 %v7475_v54, %v8899_v18  ;;  %v5809_v8 = vpop.f32.mrb[181].mxu0 }
 0x5b3   :  { %6033 = vst.msk [vmem:[#allocation8 + $0x188] sm:$0xff] %vm175_vm0, %v5969_v60  ;;  %v5810_v16 = vadd.f32 %v8899_v18, %v5809_v8  ;;  %v7476_v62 = vpop.f32.mrb[182].mxu0 }
 0x5b4   :  { %v5910_v14 = vadd.f32 %v5818_v61, %v5502_v59  ;;  %v5821_v36 = vadd.f32 %v7476_v62, %v8899_v18  ;;  %v5812_v5 = vpop.f32.mrb[183].mxu0 }
 0x5b5   :  { %v5908_v13 = vadd.f32 %v5810_v16, %v5500_v53  ;;  %v5813_v17 = vadd.f32 %v8899_v18, %v5812_v5 }
 0x5b6   :  { %v5974_v10 = vmax.f32 %v5910_v14, 0.0  ;;  %v5911_v1 = vadd.f32 %v5821_v36, %v5503_v30 }
 0x5b7   :  { %v5972_v41 = vmax.f32 %v5908_v13, 0.0  ;;  %v5909_v47 = vadd.f32 %v5813_v17, %v5501_v21 }
 0x5b8   :  { %6038 = vst.msk [vmem:[#allocation8 + $0x1b0] sm:$0xff] %vm175_vm0, %v5974_v10  ;;  %v5975_v3 = vmax.f32 %v5911_v1, 0.0 }
 0x5b9   :  { %6036 = vst.msk [vmem:[#allocation8 + $0x1a0] sm:$0xff] %vm175_vm0, %v5972_v41  ;;  %v5973_v11 = vmax.f32 %v5909_v47, 0.0  ;;  %v7479_v29 = vpop.f32.mrb[184].mxu0 }
 0x5ba   :  { %6039 = vst.msk [vmem:[#allocation8 + $0x1b8] sm:$0xff] %vm175_vm0, %v5975_v3  ;;  %v5834_v45 = vadd.f32 %v7479_v29, %v8899_v18  ;;  %v5825_v2 = vpop.f32.mrb[185].mxu0 }
 0x5bb   :  { %6037 = vst.msk [vmem:[#allocation8 + $0x1a8] sm:$0xff] %vm175_vm0, %v5973_v11  ;;  %v5826_v15 = vadd.f32 %v8899_v18, %v5825_v2  ;;  %v7480_v40 = vpop.f32.mrb[186].mxu0 }
 0x5bc   :  { %v5914_v20 = vadd.f32 %v5834_v45, %v5506_v43  ;;  %v5837_v28 = vadd.f32 %v7480_v40, %v8899_v18  ;;  %v5828_v50 = vpop.f32.mrb[187].mxu0 }
 0x5bd   :  { %v5912_v58 = vadd.f32 %v5826_v15, %v5504_v51  ;;  %v5829_v55 = vadd.f32 %v8899_v18, %v5828_v50 }
 0x5be   :  { %v5978_v33 = vmax.f32 %v5914_v20, 0.0  ;;  %v5915_v44 = vadd.f32 %v5837_v28, %v5507_v37 }
 0x5bf   :  { %v5976_v32 = vmax.f32 %v5912_v58, 0.0  ;;  %v5913_v49 = vadd.f32 %v5829_v55, %v5505_v23 }
 0x5c0   :  { %6042 = vst.msk [vmem:[#allocation8 + $0x1d0] sm:$0xff] %vm175_vm0, %v5978_v33  ;;  %v5979_v7 = vmax.f32 %v5915_v44, 0.0 }
 0x5c1   :  { %6040 = vst.msk [vmem:[#allocation8 + $0x1c0] sm:$0xff] %vm175_vm0, %v5976_v32  ;;  %v5977_v63 = vmax.f32 %v5913_v49, 0.0  ;;  %v7483_v9 = vpop.f32.mrb[188].mxu0 }
 0x5c2   :  { %6043 = vst.msk [vmem:[#allocation8 + $0x1d8] sm:$0xff] %vm175_vm0, %v5979_v7  ;;  %v5850_v12 = vadd.f32 %v7483_v9, %v8899_v18  ;;  %v5841_v22 = vpop.f32.mrb[189].mxu0 }
 0x5c3   :  { %6041 = vst.msk [vmem:[#allocation8 + $0x1c8] sm:$0xff] %vm175_vm0, %v5977_v63  ;;  %v5842_v39 = vadd.f32 %v8899_v18, %v5841_v22  ;;  %v7484_v24 = vpop.f32.mrb[190].mxu0 }
 0x5c4   :  { %v5918_v38 = vadd.f32 %v5850_v12, %v5510_v48  ;;  %v5853_v19 = vadd.f32 %v7484_v24, %v8899_v18  ;;  %v5844_v6 = vpop.f32.mrb[191].mxu0 }
 0x5c5   :  { %v5916_v0 = vadd.f32 %v5842_v39, %v5508_v57  ;;  %v5845_v26 = vadd.f32 %v8899_v18, %v5844_v6 }
 0x5c6   :  { %v5982_v46 = vmax.f32 %v5918_v38, 0.0  ;;  %v5919_v52 = vadd.f32 %v5853_v19, %v5511_v25 }
 0x5c7   :  { %v5980_v56 = vmax.f32 %v5916_v0, 0.0  ;;  %v5917_v27 = vadd.f32 %v5845_v26, %v5509_v4 }
 0x5c8   :  { %6046 = vst.msk [vmem:[#allocation8 + $0x1f0] sm:$0xff] %vm175_vm0, %v5982_v46  ;;  %v5983_v35 = vmax.f32 %v5919_v52, 0.0 }
 0x5c9   :  { %6044 = vst.msk [vmem:[#allocation8 + $0x1e0] sm:$0xff] %vm175_vm0, %v5980_v56  ;;  %v5981_v42 = vmax.f32 %v5917_v27, 0.0 }
 0x5ca   :  { %6047 = vst.msk [vmem:[#allocation8 + $0x1f8] sm:$0xff] %vm175_vm0, %v5983_v35 }
 0x5cb   :  { %6045 = vst.msk [vmem:[#allocation8 + $0x1e8] sm:$0xff] %vm175_vm0, %v5981_v42 }
 0x5cc   :  { %8168 = shalt.err (!%p8165_p6)
}
 0x5cd   :  { %s8169_s8 = scalar_lea.hbm %s9051_s7, 8192 }
 0x5ce   :  { %p8170_p7 = scmp.ne.s32.totalorder %s9051_s7, %s8169_s8  ;;  %p8173_p8 = scmp.lt.u32.totalorder %s8169_s8, %s9051_s7 }
 0x5d0   :  { %p8175_p9 = pnand %p8173_p8, %p8170_p7 }
 0x5d2   :  { %8178 = shalt.err (!%p8175_p9)
}
 0x5d3   :  { %6059 = dma.vmem_to_hbm [thread:$0]  %s6054_s27, 8192, %s9051_s7, [#allocation5], %s8186_s11, %s8186_s11, %s8187_s12  }
 0x5d4   :  { %8183 = dma.done.wait [#allocation5], 8192  }
 0x5d5   :  { %8184 = vsyncadd [#allocation5], 4294959104 }
 0x5d6   :  { %6063 = vsyncpa [#allocation4], 1 }
 0x5d7   :  { %6064 = vsyncpa [#allocation7], 1 }
 0x5d8   :  { %6065 = vsyncpa [#allocation5], 1 }

</bundles_post_ra>
